<compile_context>
chip_gen: v7x
topology: tpu7x:2x2x1
jax: 0.10.0
libtpu: 0.0.40
codegen_flags: <defaults>
</compile_context>

<pallas_src>
import functools

import jax
import jax.numpy as jnp
from jax.experimental import pallas as pl
from jax.experimental.pallas import tpu as pltpu


# ----------------------------------------------------------------------------
# Fused BasicBlock kernel (one image per grid step, row-tiled inside)
# ----------------------------------------------------------------------------
def _make_basic_block_kernel(s, OH, OW, CP, CPW, TR, n_tiles, has_sc):
    """Builds the fused kernel for a fixed static configuration."""
    M_TILE = TR * OW
    TAPS = [(dy, dx) for dy in range(3) for dx in range(3)]
    f32 = jnp.float32

    def body(x_ref, w1_ref, bn1_ref, w2_ref, bn2_ref, o_ref,
             h1p_ref, p_ref, *maybe_sc):
        sc_ref = maybe_sc[0] if has_sc else None

        # Zero only the halo strips of the padded conv1->conv2 intermediate;
        # the interior is fully overwritten by phase 1 below.
        zrow = jnp.zeros((1, 1, OW + 2, CP), jnp.bfloat16)
        zcol = jnp.zeros((1, OH + 2, 1, CP), jnp.bfloat16)
        h1p_ref[:, 0:1, :, :] = zrow
        h1p_ref[:, OH + 1:OH + 2, :, :] = zrow
        h1p_ref[:, :, 0:1, :] = zcol
        h1p_ref[:, :, OW + 1:OW + 2, :] = zcol

        def conv1_tile(oy0):
            # In-kernel im2col of the 3x3 stride-s taps for TR output rows,
            # written straight into the lane-aligned column slots of p_ref.
            for k, (dy, dx) in enumerate(TAPS):
                r0, pr = dy // s, dy % s
                c0, pc = dx // s, dx % s
                tap = x_ref[:, pl.ds(oy0 + r0, TR), pr:pr + 1, pc:pc + 1,
                            c0:c0 + OW, :]
                p_ref[:, k * CP:(k + 1) * CP] = tap.reshape(M_TILE, CP)
            # One MXU matmul: conv1 in columns [0:CP], merged 1x1 shortcut
            # (centre-tap rows only) in columns [CP:2*CP].
            acc = jnp.dot(p_ref[...], w1_ref[...], preferred_element_type=f32)
            z = acc * bn1_ref[0:1, :] + bn1_ref[1:2, :]        # BN1 | BNsc (f32)
            h1 = jnp.maximum(z[:, :CP], 0.0)                   # ReLU on conv1 only
            h1p_ref[:, pl.ds(1 + oy0, TR), 1:1 + OW, :] = (
                h1.reshape(1, TR, OW, CP).astype(jnp.bfloat16))
            if has_sc:
                sc_ref[:, pl.ds(oy0, TR), :, :] = z[:, CP:].reshape(1, TR, OW, CP)

        def conv2_tile(oy0):
            # conv2: 3x3, stride 1, pad 1 over the h1p scratch.
            for k, (dy, dx) in enumerate(TAPS):
                tap = h1p_ref[:, pl.ds(oy0 + dy, TR), dx:dx + OW, :]
                p_ref[:, k * CP:(k + 1) * CP] = tap.reshape(M_TILE, CP)
            acc = jnp.dot(p_ref[...], w2_ref[...], preferred_element_type=f32)
            h2 = acc * bn2_ref[0:1, :] + bn2_ref[1:2, :]       # BN2 (f32)
            if has_sc:
                sc = sc_ref[:, pl.ds(oy0, TR), :, :].reshape(M_TILE, CP)
            else:
                # identity shortcut (stride 1): centre tap of the padded input
                xc = x_ref[:, pl.ds(oy0 + 1 // s, TR), (1 % s):(1 % s) + 1,
                           (1 % s):(1 % s) + 1, 1 // s:1 // s + OW, :]
                sc = xc.reshape(M_TILE, CP).astype(f32)
            out = jnp.maximum(h2 + sc, 0.0)                    # residual add + ReLU
            o_ref[:, pl.ds(oy0, TR), :, :] = (
                out.reshape(1, TR, OW, CP).astype(o_ref.dtype))

        if n_tiles == 1:
            conv1_tile(0)
            conv2_tile(0)
        else:
            # conv1 for ALL row tiles first (conv2 needs h1 halo rows from the
            # neighbouring tiles), then conv2 + shortcut + store per tile.
            @pl.loop(0, n_tiles)
            def _(t):
                conv1_tile(t * TR)

            @pl.loop(0, n_tiles)
            def _(t):
                conv2_tile(t * TR)

    return body


# ----------------------------------------------------------------------------
# Parameter packing helpers (one-time, host/XLA side)
# ----------------------------------------------------------------------------
def _pack_conv3x3(w, cp):
    """PyTorch (Cout, Cin, 3, 3) -> (9*cp, cp) bf16, row order (dy, dx, ci)."""
    co, ci, kh, kw = w.shape
    wt = jnp.transpose(w, (2, 3, 1, 0))                       # (kh, kw, ci, co)
    wt = jnp.pad(wt, ((0, 0), (0, 0), (0, cp - ci), (0, cp - co)))
    return wt.reshape(kh * kw * cp, cp).astype(jnp.bfloat16)


def _pack_conv1x1_center(w, cp):
    """1x1 shortcut weight placed on the centre-tap rows of a (9*cp, cp) slab."""
    co, ci = w.shape[0], w.shape[1]
    wt = jnp.pad(w.reshape(co, ci).T, ((0, cp - ci), (0, cp - co)))
    out = jnp.zeros((9 * cp, cp), wt.dtype).at[4 * cp:5 * cp, :].set(wt)
    return out.astype(jnp.bfloat16)


def _fold_bn(bn, cp, eps):
    """Eval-mode BN -> (2, cp) f32: row0 = scale, row1 = shift (zero in padding)."""
    scale = bn["gamma"] / jnp.sqrt(bn["var"] + eps)
    shift = bn["beta"] - bn["mean"] * scale
    c = scale.shape[0]
    return jnp.stack([jnp.pad(scale, (0, cp - c)),
                      jnp.pad(shift, (0, cp - c))]).astype(jnp.float32)


# ----------------------------------------------------------------------------
# Wrappers
# ----------------------------------------------------------------------------
def basic_block_forward_nhwc(x, params, *, stride=1, eps=1e-5):
    """Performance entry point.

    x: (N, H, W, C) with C == in_planes or C == CP (already 128-padded), any
    float dtype (cast to bf16).  Returns (N, OH, OW, CP) bf16 NHWC with
    CP-padded channels -- keep chained BasicBlocks in this layout and only
    slice/transpose once at the very end of the network.
    """
    N, H, W, Cx = x.shape
    planes, cin = params["conv1_w"].shape[0], params["conv1_w"].shape[1]
    has_sc = "sc_w" in params
    s = stride
    assert s in (1, 2), "BasicBlock only uses stride 1 or 2"
    assert H % s == 0 and W % s == 0, "phase-split stride path needs H, W divisible by stride"
    if not has_sc:
        assert s == 1 and cin == planes, "identity shortcut requires stride=1 and in_planes==planes"

    CP = -(-max(cin, planes) // 128) * 128        # lane-dense channel padding
    CPW = 2 * CP if has_sc else CP                # merged conv1 + shortcut N dim
    assert Cx == cin or Cx == CP
    OH = (H - 1) // s + 1
    OW = (W - 1) // s + 1
    HP2 = 2 // s + OH
    WP2 = 2 // s + OW

    # zero halo + channel pad + phase split for the stride, bf16 MXU operand:
    # element [n, r2, pr, pc, c2, ci] = x_pad[n, r2*s + pr, c2*s + pc, ci]
    xb = x.astype(jnp.bfloat16)
    xp = jnp.pad(xb, ((0, 0), (1, 1), (1, 1), (0, CP - Cx)))
    xp = xp.reshape(N, HP2, s, WP2, s, CP).transpose(0, 1, 2, 4, 3, 5)

    # fold BN (inference) and merge the 1x1 shortcut into conv1's RHS
    w1m = _pack_conv3x3(params["conv1_w"], CP)
    bn1m = _fold_bn(params["bn1"], CP, eps)
    if has_sc:
        w1m = jnp.concatenate([w1m, _pack_conv1x1_center(params["sc_w"], CP)], axis=1)
        bn1m = jnp.concatenate([bn1m, _fold_bn(params["bnsc"], CP, eps)], axis=1)
    w2m = _pack_conv3x3(params["conv2_w"], CP)
    bn2m = _fold_bn(params["bn2"], CP, eps)

    # row-tile size: largest divisor of OH keeping the bf16 im2col tile <= ~2 MiB
    max_tr = max(1, (2 * 1024 * 1024) // (OW * 9 * CP * 2))
    TR = max(d for d in range(1, OH + 1) if OH % d == 0 and d <= max_tr)
    n_tiles = OH // TR
    M_TILE = TR * OW

    in_specs = [
        pl.BlockSpec((1, HP2, s, s, WP2, CP), lambda i: (i, 0, 0, 0, 0, 0)),
        pl.BlockSpec((9 * CP, CPW), lambda i: (0, 0)),
        pl.BlockSpec((2, CPW), lambda i: (0, 0)),
        pl.BlockSpec((9 * CP, CP), lambda i: (0, 0)),
        pl.BlockSpec((2, CP), lambda i: (0, 0)),
    ]
    scratch_shapes = [
        pltpu.VMEM((1, OH + 2, OW + 2, CP), jnp.bfloat16),   # conv1 out + zero halo
        pltpu.VMEM((M_TILE, 9 * CP), jnp.bfloat16),          # im2col row tile
    ]
    if has_sc:
        scratch_shapes.append(pltpu.VMEM((1, OH, OW, CP), jnp.float32))  # BN'd shortcut

    # explicit scoped-VMEM budget (double-buffered blocks + scratch + transients)
    est = (2 * HP2 * s * s * WP2 * CP * 2 + 2 * OH * OW * CP * 2
           + 2 * (9 * CP * CPW + 9 * CP * CP) * 2 + 2 * (2 * CPW + 2 * CP) * 4
           + (OH + 2) * (OW + 2) * CP * 2 + M_TILE * 9 * CP * 2
           + (OH * OW * CP * 4 if has_sc else 0)
           + 4 * M_TILE * CPW * 4)
    vmem_limit = int(min(max(2 * est, 32 * 1024 * 1024), 56 * 1024 * 1024))

    kernel = _make_basic_block_kernel(s, OH, OW, CP, CPW, TR, n_tiles, has_sc)
    return pl.pallas_call(
        kernel,
        out_shape=jax.ShapeDtypeStruct((N, OH, OW, CP), jnp.bfloat16),
        grid_spec=pltpu.PrefetchScalarGridSpec(
            num_scalar_prefetch=0,
            grid=(N,),                      # one image per step: multi-step for N>=2
            in_specs=in_specs,
            out_specs=pl.BlockSpec((1, OH, OW, CP), lambda i: (i, 0, 0, 0)),
            scratch_shapes=scratch_shapes,
        ),
        compiler_params=pltpu.CompilerParams(
            dimension_semantics=("parallel",),
            vmem_limit_bytes=vmem_limit,
        ),
    )(xp, w1m, bn1m, w2m, bn2m)


def basic_block_forward(x, params, *, stride=1, eps=1e-5):
    """PyTorch-compatible wrapper: (N, Cin, H, W) f32 -> (N, planes, OH, OW) f32.

    Only this single-block compatibility path pays the NCHW<->NHWC relayout and
    f32 cast; chained blocks should use basic_block_forward_nhwc directly.
    """
    planes = params["conv1_w"].shape[0]
    out = basic_block_forward_nhwc(jnp.transpose(x, (0, 2, 3, 1)), params,
                                   stride=stride, eps=eps)
    return jnp.transpose(out[..., :planes].astype(jnp.float32), (0, 3, 1, 2))


# ----------------------------------------------------------------------------
# Pure-JAX reference (matches the kernel's bf16-operand / f32-accumulate math)
# ----------------------------------------------------------------------------
def basic_block_ref(x, params, *, stride=1, eps=1e-5):
    def conv(inp, w, s, pad):
        return jax.lax.conv_general_dilated(
            inp.astype(jnp.bfloat16), w.astype(jnp.bfloat16),
            window_strides=(s, s), padding=pad,
            dimension_numbers=("NCHW", "OIHW", "NCHW"),
            preferred_element_type=jnp.float32)

    def bn(h, p):
        scale = p["gamma"] / jnp.sqrt(p["var"] + eps)
        shift = p["beta"] - p["mean"] * scale
        return h * scale[None, :, None, None] + shift[None, :, None, None]

    h = jax.nn.relu(bn(conv(x, params["conv1_w"], stride, ((1, 1), (1, 1))), params["bn1"]))
    h = bn(conv(h, params["conv2_w"], 1, ((1, 1), (1, 1))), params["bn2"])
    if "sc_w" in params:
        sc = bn(conv(x, params["sc_w"], stride, ((0, 0), (0, 0))), params["bnsc"])
    else:
        sc = x.astype(jnp.bfloat16).astype(jnp.float32)
    return jax.nn.relu(h + sc)


# ----------------------------------------------------------------------------
# Deterministic example (exercises both the conv-shortcut and identity paths)
# ----------------------------------------------------------------------------
if __name__ == "__main__":
    key = jax.random.PRNGKey(0)

    def wconv(k, co, ci, kh, kw):
        return jax.random.normal(k, (co, ci, kh, kw), jnp.float32) / jnp.sqrt(float(ci * kh * kw))

    def bn_params(k, c):
        k1, k2, k3, k4 = jax.random.split(k, 4)
        return {"gamma": 1.0 + 0.1 * jax.random.normal(k1, (c,), jnp.float32),
                "beta": 0.1 * jax.random.normal(k2, (c,), jnp.float32),
                "mean": 0.1 * jax.random.normal(k3, (c,), jnp.float32),
                "var": jax.random.uniform(k4, (c,), jnp.float32, minval=0.5, maxval=1.5)}

    def make_block(k, in_planes, planes, stride):
        ks = jax.random.split(k, 6)
        p = {"conv1_w": wconv(ks[0], planes, in_planes, 3, 3),
             "bn1": bn_params(ks[1], planes),
             "conv2_w": wconv(ks[2], planes, planes, 3, 3),
             "bn2": bn_params(ks[3], planes)}
        if stride != 1 or in_planes != planes:
            p["sc_w"] = wconv(ks[4], planes, in_planes, 1, 1)
            p["bnsc"] = bn_params(ks[5], planes)
        return p

    cases = [
        dict(N=2, in_planes=4, planes=8, H=16, W=16, stride=2),   # conv-shortcut path
        dict(N=2, in_planes=8, planes=8, H=16, W=16, stride=1),   # identity-shortcut path
    ]
    for idx, c in enumerate(cases):
        kp, kx, key = jax.random.split(key, 3)
        params = make_block(kp, c["in_planes"], c["planes"], c["stride"])
        x = jax.random.normal(kx, (c["N"], c["in_planes"], c["H"], c["W"]), jnp.float32)

        fwd = jax.jit(functools.partial(basic_block_forward, stride=c["stride"]))
        out = jax.block_until_ready(fwd(x, params))
        ref = basic_block_ref(x, params, stride=c["stride"])

        assert out.shape == (c["N"], c["planes"], c["H"] // c["stride"], c["W"] // c["stride"])
        assert bool(jnp.all(jnp.isfinite(out)))
        err = float(jnp.max(jnp.abs(out - ref)))
        rel = err / max(1.0, float(jnp.max(jnp.abs(ref))))
        assert rel < 2e-2, f"case {idx}: mismatch vs reference (max abs {err}, rel {rel})"

    print("KERNEL_OK")
</pallas_src>

<mosaic_0001>
module attributes {stable_mosaic.version = 11 : i64} {
  func.func @body(%arg0: i32, %arg1: memref<1x9x2x2x9x128xbf16, #tpu.memory_space<vmem>>, %arg2: memref<1152x256xbf16, #tpu.memory_space<vmem>>, %arg3: memref<2x256xf32, #tpu.memory_space<vmem>>, %arg4: memref<1152x128xbf16, #tpu.memory_space<vmem>>, %arg5: memref<2x128xf32, #tpu.memory_space<vmem>>, %arg6: memref<1x8x8x128xbf16, #tpu.memory_space<vmem>>, %arg7: memref<1x10x10x128xbf16, #tpu.memory_space<vmem>>, %arg8: memref<64x1152xbf16, #tpu.memory_space<vmem>>, %arg9: memref<1x8x8x128xf32, #tpu.memory_space<vmem>>) attributes {dimension_semantics = [#tpu.dimension_semantics<parallel>], iteration_bounds = array<i64: 2>, scalar_prefetch = 0 : i64, scratch_operands = 3 : i64, tpu.core_type = #tpu.core_type<tc>, window_params = [{transform_indices = @transform_0, window_bounds = array<i64: 1, 9, 2, 2, 9, 128>}, {pipeline_mode = #tpu.pipeline_mode<synchronous>, transform_indices = @transform_1, window_bounds = array<i64: 1152, 256>}, {pipeline_mode = #tpu.pipeline_mode<synchronous>, transform_indices = @transform_2, window_bounds = array<i64: 2, 256>}, {pipeline_mode = #tpu.pipeline_mode<synchronous>, transform_indices = @transform_3, window_bounds = array<i64: 1152, 128>}, {pipeline_mode = #tpu.pipeline_mode<synchronous>, transform_indices = @transform_4, window_bounds = array<i64: 2, 128>}, {transform_indices = @transform_5, window_bounds = array<i64: 1, 8, 8, 128>}]} {
    %cst = arith.constant 0.000000e+00 : bf16
    %0 = vector.broadcast %cst : bf16 to vector<1x1x10x128xbf16>
    %cst_0 = arith.constant 0.000000e+00 : bf16
    %1 = vector.broadcast %cst_0 : bf16 to vector<1x10x1x128xbf16>
    %c0 = arith.constant 0 : index
    %c0_1 = arith.constant 0 : index
    %c0_2 = arith.constant 0 : index
    %c0_3 = arith.constant 0 : index
    %2 = vector.load %arg7[%c0, %c0_1, %c0_2, %c0_3] : memref<1x10x10x128xbf16, #tpu.memory_space<vmem>>, vector<1x1x10x128xbf16>
    tpu.vector_store %arg7[%c0, %c0_1, %c0_2, %c0_3], %0 {strides = array<i32>} : memref<1x10x10x128xbf16, #tpu.memory_space<vmem>>, vector<1x1x10x128xbf16>,
    %c0_4 = arith.constant 0 : index
    %c9 = arith.constant 9 : index
    %c0_5 = arith.constant 0 : index
    %c0_6 = arith.constant 0 : index
    %3 = vector.load %arg7[%c0_4, %c9, %c0_5, %c0_6] : memref<1x10x10x128xbf16, #tpu.memory_space<vmem>>, vector<1x1x10x128xbf16>
    tpu.vector_store %arg7[%c0_4, %c9, %c0_5, %c0_6], %0 {strides = array<i32>} : memref<1x10x10x128xbf16, #tpu.memory_space<vmem>>, vector<1x1x10x128xbf16>,
    %c0_7 = arith.constant 0 : index
    %c0_8 = arith.constant 0 : index
    %c0_9 = arith.constant 0 : index
    %c0_10 = arith.constant 0 : index
    %4 = vector.load %arg7[%c0_7, %c0_8, %c0_9, %c0_10] : memref<1x10x10x128xbf16, #tpu.memory_space<vmem>>, vector<1x10x1x128xbf16>
    tpu.vector_store %arg7[%c0_7, %c0_8, %c0_9, %c0_10], %1 {strides = array<i32>} : memref<1x10x10x128xbf16, #tpu.memory_space<vmem>>, vector<1x10x1x128xbf16>,
    %c0_11 = arith.constant 0 : index
    %c0_12 = arith.constant 0 : index
    %c9_13 = arith.constant 9 : index
    %c0_14 = arith.constant 0 : index
    %5 = vector.load %arg7[%c0_11, %c0_12, %c9_13, %c0_14] : memref<1x10x10x128xbf16, #tpu.memory_space<vmem>>, vector<1x10x1x128xbf16>
    tpu.vector_store %arg7[%c0_11, %c0_12, %c9_13, %c0_14], %1 {strides = array<i32>} : memref<1x10x10x128xbf16, #tpu.memory_space<vmem>>, vector<1x10x1x128xbf16>,
    %c0_15 = arith.constant 0 : index
    %c0_16 = arith.constant 0 : index
    %c0_17 = arith.constant 0 : index
    %c0_18 = arith.constant 0 : index
    %c0_19 = arith.constant 0 : index
    %c0_20 = arith.constant 0 : index
    %6 = vector.load %arg1[%c0_15, %c0_16, %c0_17, %c0_18, %c0_19, %c0_20] : memref<1x9x2x2x9x128xbf16, #tpu.memory_space<vmem>>, vector<1x8x1x1x8x128xbf16>
    %7 = vector.shape_cast %6 : vector<1x8x1x1x8x128xbf16> to vector<64x128xbf16>
    %c0_21 = arith.constant 0 : index
    %c0_22 = arith.constant 0 : index
    %8 = vector.load %arg8[%c0_21, %c0_22] : memref<64x1152xbf16, #tpu.memory_space<vmem>>, vector<64x128xbf16>
    tpu.vector_store %arg8[%c0_21, %c0_22], %7 {strides = array<i32>} : memref<64x1152xbf16, #tpu.memory_space<vmem>>, vector<64x128xbf16>,
    %c0_23 = arith.constant 0 : index
    %c0_24 = arith.constant 0 : index
    %c0_25 = arith.constant 0 : index
    %c1 = arith.constant 1 : index
    %c0_26 = arith.constant 0 : index
    %c0_27 = arith.constant 0 : index
    %9 = vector.load %arg1[%c0_23, %c0_24, %c0_25, %c1, %c0_26, %c0_27] : memref<1x9x2x2x9x128xbf16, #tpu.memory_space<vmem>>, vector<1x8x1x1x8x128xbf16>
    %10 = vector.shape_cast %9 : vector<1x8x1x1x8x128xbf16> to vector<64x128xbf16>
    %c0_28 = arith.constant 0 : index
    %c128 = arith.constant 128 : index
    %11 = vector.load %arg8[%c0_28, %c128] : memref<64x1152xbf16, #tpu.memory_space<vmem>>, vector<64x128xbf16>
    tpu.vector_store %arg8[%c0_28, %c128], %10 {strides = array<i32>} : memref<64x1152xbf16, #tpu.memory_space<vmem>>, vector<64x128xbf16>,
    %c0_29 = arith.constant 0 : index
    %c0_30 = arith.constant 0 : index
    %c0_31 = arith.constant 0 : index
    %c0_32 = arith.constant 0 : index
    %c1_33 = arith.constant 1 : index
    %c0_34 = arith.constant 0 : index
    %12 = vector.load %arg1[%c0_29, %c0_30, %c0_31, %c0_32, %c1_33, %c0_34] : memref<1x9x2x2x9x128xbf16, #tpu.memory_space<vmem>>, vector<1x8x1x1x8x128xbf16>
    %13 = vector.shape_cast %12 : vector<1x8x1x1x8x128xbf16> to vector<64x128xbf16>
    %c0_35 = arith.constant 0 : index
    %c256 = arith.constant 256 : index
    %14 = vector.load %arg8[%c0_35, %c256] : memref<64x1152xbf16, #tpu.memory_space<vmem>>, vector<64x128xbf16>
    tpu.vector_store %arg8[%c0_35, %c256], %13 {strides = array<i32>} : memref<64x1152xbf16, #tpu.memory_space<vmem>>, vector<64x128xbf16>,
    %c0_36 = arith.constant 0 : index
    %c0_37 = arith.constant 0 : index
    %c1_38 = arith.constant 1 : index
    %c0_39 = arith.constant 0 : index
    %c0_40 = arith.constant 0 : index
    %c0_41 = arith.constant 0 : index
    %15 = vector.load %arg1[%c0_36, %c0_37, %c1_38, %c0_39, %c0_40, %c0_41] : memref<1x9x2x2x9x128xbf16, #tpu.memory_space<vmem>>, vector<1x8x1x1x8x128xbf16>
    %16 = vector.shape_cast %15 : vector<1x8x1x1x8x128xbf16> to vector<64x128xbf16>
    %c0_42 = arith.constant 0 : index
    %c384 = arith.constant 384 : index
    %17 = vector.load %arg8[%c0_42, %c384] : memref<64x1152xbf16, #tpu.memory_space<vmem>>, vector<64x128xbf16>
    tpu.vector_store %arg8[%c0_42, %c384], %16 {strides = array<i32>} : memref<64x1152xbf16, #tpu.memory_space<vmem>>, vector<64x128xbf16>,
    %c0_43 = arith.constant 0 : index
    %c0_44 = arith.constant 0 : index
    %c1_45 = arith.constant 1 : index
    %c1_46 = arith.constant 1 : index
    %c0_47 = arith.constant 0 : index
    %c0_48 = arith.constant 0 : index
    %18 = vector.load %arg1[%c0_43, %c0_44, %c1_45, %c1_46, %c0_47, %c0_48] : memref<1x9x2x2x9x128xbf16, #tpu.memory_space<vmem>>, vector<1x8x1x1x8x128xbf16>
    %19 = vector.shape_cast %18 : vector<1x8x1x1x8x128xbf16> to vector<64x128xbf16>
    %c0_49 = arith.constant 0 : index
    %c512 = arith.constant 512 : index
    %20 = vector.load %arg8[%c0_49, %c512] : memref<64x1152xbf16, #tpu.memory_space<vmem>>, vector<64x128xbf16>
    tpu.vector_store %arg8[%c0_49, %c512], %19 {strides = array<i32>} : memref<64x1152xbf16, #tpu.memory_space<vmem>>, vector<64x128xbf16>,
    %c0_50 = arith.constant 0 : index
    %c0_51 = arith.constant 0 : index
    %c1_52 = arith.constant 1 : index
    %c0_53 = arith.constant 0 : index
    %c1_54 = arith.constant 1 : index
    %c0_55 = arith.constant 0 : index
    %21 = vector.load %arg1[%c0_50, %c0_51, %c1_52, %c0_53, %c1_54, %c0_55] : memref<1x9x2x2x9x128xbf16, #tpu.memory_space<vmem>>, vector<1x8x1x1x8x128xbf16>
    %22 = vector.shape_cast %21 : vector<1x8x1x1x8x128xbf16> to vector<64x128xbf16>
    %c0_56 = arith.constant 0 : index
    %c640 = arith.constant 640 : index
    %23 = vector.load %arg8[%c0_56, %c640] : memref<64x1152xbf16, #tpu.memory_space<vmem>>, vector<64x128xbf16>
    tpu.vector_store %arg8[%c0_56, %c640], %22 {strides = array<i32>} : memref<64x1152xbf16, #tpu.memory_space<vmem>>, vector<64x128xbf16>,
    %c0_57 = arith.constant 0 : index
    %c1_58 = arith.constant 1 : index
    %c0_59 = arith.constant 0 : index
    %c0_60 = arith.constant 0 : index
    %c0_61 = arith.constant 0 : index
    %c0_62 = arith.constant 0 : index
    %24 = vector.load %arg1[%c0_57, %c1_58, %c0_59, %c0_60, %c0_61, %c0_62] : memref<1x9x2x2x9x128xbf16, #tpu.memory_space<vmem>>, vector<1x8x1x1x8x128xbf16>
    %25 = vector.shape_cast %24 : vector<1x8x1x1x8x128xbf16> to vector<64x128xbf16>
    %c0_63 = arith.constant 0 : index
    %c768 = arith.constant 768 : index
    %26 = vector.load %arg8[%c0_63, %c768] : memref<64x1152xbf16, #tpu.memory_space<vmem>>, vector<64x128xbf16>
    tpu.vector_store %arg8[%c0_63, %c768], %25 {strides = array<i32>} : memref<64x1152xbf16, #tpu.memory_space<vmem>>, vector<64x128xbf16>,
    %c0_64 = arith.constant 0 : index
    %c1_65 = arith.constant 1 : index
    %c0_66 = arith.constant 0 : index
    %c1_67 = arith.constant 1 : index
    %c0_68 = arith.constant 0 : index
    %c0_69 = arith.constant 0 : index
    %27 = vector.load %arg1[%c0_64, %c1_65, %c0_66, %c1_67, %c0_68, %c0_69] : memref<1x9x2x2x9x128xbf16, #tpu.memory_space<vmem>>, vector<1x8x1x1x8x128xbf16>
    %28 = vector.shape_cast %27 : vector<1x8x1x1x8x128xbf16> to vector<64x128xbf16>
    %c0_70 = arith.constant 0 : index
    %c896 = arith.constant 896 : index
    %29 = vector.load %arg8[%c0_70, %c896] : memref<64x1152xbf16, #tpu.memory_space<vmem>>, vector<64x128xbf16>
    tpu.vector_store %arg8[%c0_70, %c896], %28 {strides = array<i32>} : memref<64x1152xbf16, #tpu.memory_space<vmem>>, vector<64x128xbf16>,
    %c0_71 = arith.constant 0 : index
    %c1_72 = arith.constant 1 : index
    %c0_73 = arith.constant 0 : index
    %c0_74 = arith.constant 0 : index
    %c1_75 = arith.constant 1 : index
    %c0_76 = arith.constant 0 : index
    %30 = vector.load %arg1[%c0_71, %c1_72, %c0_73, %c0_74, %c1_75, %c0_76] : memref<1x9x2x2x9x128xbf16, #tpu.memory_space<vmem>>, vector<1x8x1x1x8x128xbf16>
    %31 = vector.shape_cast %30 : vector<1x8x1x1x8x128xbf16> to vector<64x128xbf16>
    %c0_77 = arith.constant 0 : index
    %c1024 = arith.constant 1024 : index
    %32 = vector.load %arg8[%c0_77, %c1024] : memref<64x1152xbf16, #tpu.memory_space<vmem>>, vector<64x128xbf16>
    tpu.vector_store %arg8[%c0_77, %c1024], %31 {strides = array<i32>} : memref<64x1152xbf16, #tpu.memory_space<vmem>>, vector<64x128xbf16>,
    %c0_78 = arith.constant 0 : index
    %c0_79 = arith.constant 0 : index
    %33 = vector.load %arg8[%c0_78, %c0_79] : memref<64x1152xbf16, #tpu.memory_space<vmem>>, vector<64x1152xbf16>
    %c0_80 = arith.constant 0 : index
    %c0_81 = arith.constant 0 : index
    %34 = vector.load %arg2[%c0_80, %c0_81] : memref<1152x256xbf16, #tpu.memory_space<vmem>>, vector<1152x256xbf16>
    %cst_82 = arith.constant dense<0.000000e+00> : vector<64x256xf32>
    %35 = tpu.matmul %33, %34, %cst_82 {dimension_numbers = #tpu.dot_dimension_numbers<[1], [0], [0], [1], [0, 0, 1, 1], [], []>} : vector<64x1152xbf16>, vector<1152x256xbf16>, vector<64x256xf32> -> vector<64x256xf32>
    %c0_83 = arith.constant 0 : index
    %c0_84 = arith.constant 0 : index
    %36 = vector.load %arg3[%c0_83, %c0_84] : memref<2x256xf32, #tpu.memory_space<vmem>>, vector<1x256xf32>
    %37 = vector.broadcast %36 : vector<1x256xf32> to vector<64x256xf32>
    %38 = arith.mulf %35, %37 : vector<64x256xf32>
    %c1_85 = arith.constant 1 : index
    %c0_86 = arith.constant 0 : index
    %39 = vector.load %arg3[%c1_85, %c0_86] : memref<2x256xf32, #tpu.memory_space<vmem>>, vector<1x256xf32>
    %40 = vector.broadcast %39 : vector<1x256xf32> to vector<64x256xf32>
    %41 = arith.addf %38, %40 : vector<64x256xf32>
    %42 = vector.extract_strided_slice %41 {offsets = [0, 0], sizes = [64, 128], strides = [1, 1]} : vector<64x256xf32> to vector<64x128xf32>
    %cst_87 = arith.constant 0.000000e+00 : f32
    %43 = vector.broadcast %cst_87 : f32 to vector<64x128xf32>
    %44 = arith.maximumf %42, %43 : vector<64x128xf32>
    %45 = vector.shape_cast %44 : vector<64x128xf32> to vector<1x8x8x128xf32>
    %46 = arith.truncf %45 : vector<1x8x8x128xf32> to vector<1x8x8x128xbf16>
    %c0_88 = arith.constant 0 : index
    %c1_89 = arith.constant 1 : index
    %c1_90 = arith.constant 1 : index
    %c0_91 = arith.constant 0 : index
    %47 = vector.load %arg7[%c0_88, %c1_89, %c1_90, %c0_91] : memref<1x10x10x128xbf16, #tpu.memory_space<vmem>>, vector<1x8x8x128xbf16>
    tpu.vector_store %arg7[%c0_88, %c1_89, %c1_90, %c0_91], %46 {strides = array<i32>} : memref<1x10x10x128xbf16, #tpu.memory_space<vmem>>, vector<1x8x8x128xbf16>,
    %48 = vector.extract_strided_slice %41 {offsets = [0, 128], sizes = [64, 128], strides = [1, 1]} : vector<64x256xf32> to vector<64x128xf32>
    %49 = vector.shape_cast %48 : vector<64x128xf32> to vector<1x8x8x128xf32>
    %c0_92 = arith.constant 0 : index
    %c0_93 = arith.constant 0 : index
    %c0_94 = arith.constant 0 : index
    %c0_95 = arith.constant 0 : index
    %50 = vector.load %arg9[%c0_92, %c0_93, %c0_94, %c0_95] : memref<1x8x8x128xf32, #tpu.memory_space<vmem>>, vector<1x8x8x128xf32>
    tpu.vector_store %arg9[%c0_92, %c0_93, %c0_94, %c0_95], %49 {strides = array<i32>} : memref<1x8x8x128xf32, #tpu.memory_space<vmem>>, vector<1x8x8x128xf32>,
    %c0_96 = arith.constant 0 : index
    %c0_97 = arith.constant 0 : index
    %c0_98 = arith.constant 0 : index
    %c0_99 = arith.constant 0 : index
    %51 = vector.load %arg7[%c0_96, %c0_97, %c0_98, %c0_99] : memref<1x10x10x128xbf16, #tpu.memory_space<vmem>>, vector<1x8x8x128xbf16>
    %52 = vector.shape_cast %51 : vector<1x8x8x128xbf16> to vector<64x128xbf16>
    %c0_100 = arith.constant 0 : index
    %c0_101 = arith.constant 0 : index
    %53 = vector.load %arg8[%c0_100, %c0_101] : memref<64x1152xbf16, #tpu.memory_space<vmem>>, vector<64x128xbf16>
    tpu.vector_store %arg8[%c0_100, %c0_101], %52 {strides = array<i32>} : memref<64x1152xbf16, #tpu.memory_space<vmem>>, vector<64x128xbf16>,
    %c0_102 = arith.constant 0 : index
    %c0_103 = arith.constant 0 : index
    %c1_104 = arith.constant 1 : index
    %c0_105 = arith.constant 0 : index
    %54 = vector.load %arg7[%c0_102, %c0_103, %c1_104, %c0_105] : memref<1x10x10x128xbf16, #tpu.memory_space<vmem>>, vector<1x8x8x128xbf16>
    %55 = vector.shape_cast %54 : vector<1x8x8x128xbf16> to vector<64x128xbf16>
    %c0_106 = arith.constant 0 : index
    %c128_107 = arith.constant 128 : index
    %56 = vector.load %arg8[%c0_106, %c128_107] : memref<64x1152xbf16, #tpu.memory_space<vmem>>, vector<64x128xbf16>
    tpu.vector_store %arg8[%c0_106, %c128_107], %55 {strides = array<i32>} : memref<64x1152xbf16, #tpu.memory_space<vmem>>, vector<64x128xbf16>,
    %c0_108 = arith.constant 0 : index
    %c0_109 = arith.constant 0 : index
    %c2 = arith.constant 2 : index
    %c0_110 = arith.constant 0 : index
    %57 = vector.load %arg7[%c0_108, %c0_109, %c2, %c0_110] : memref<1x10x10x128xbf16, #tpu.memory_space<vmem>>, vector<1x8x8x128xbf16>
    %58 = vector.shape_cast %57 : vector<1x8x8x128xbf16> to vector<64x128xbf16>
    %c0_111 = arith.constant 0 : index
    %c256_112 = arith.constant 256 : index
    %59 = vector.load %arg8[%c0_111, %c256_112] : memref<64x1152xbf16, #tpu.memory_space<vmem>>, vector<64x128xbf16>
    tpu.vector_store %arg8[%c0_111, %c256_112], %58 {strides = array<i32>} : memref<64x1152xbf16, #tpu.memory_space<vmem>>, vector<64x128xbf16>,
    %c0_113 = arith.constant 0 : index
    %c1_114 = arith.constant 1 : index
    %c0_115 = arith.constant 0 : index
    %c0_116 = arith.constant 0 : index
    %60 = vector.load %arg7[%c0_113, %c1_114, %c0_115, %c0_116] : memref<1x10x10x128xbf16, #tpu.memory_space<vmem>>, vector<1x8x8x128xbf16>
    %61 = vector.shape_cast %60 : vector<1x8x8x128xbf16> to vector<64x128xbf16>
    %c0_117 = arith.constant 0 : index
    %c384_118 = arith.constant 384 : index
    %62 = vector.load %arg8[%c0_117, %c384_118] : memref<64x1152xbf16, #tpu.memory_space<vmem>>, vector<64x128xbf16>
    tpu.vector_store %arg8[%c0_117, %c384_118], %61 {strides = array<i32>} : memref<64x1152xbf16, #tpu.memory_space<vmem>>, vector<64x128xbf16>,
    %c0_119 = arith.constant 0 : index
    %c1_120 = arith.constant 1 : index
    %c1_121 = arith.constant 1 : index
    %c0_122 = arith.constant 0 : index
    %63 = vector.load %arg7[%c0_119, %c1_120, %c1_121, %c0_122] : memref<1x10x10x128xbf16, #tpu.memory_space<vmem>>, vector<1x8x8x128xbf16>
    %64 = vector.shape_cast %63 : vector<1x8x8x128xbf16> to vector<64x128xbf16>
    %c0_123 = arith.constant 0 : index
    %c512_124 = arith.constant 512 : index
    %65 = vector.load %arg8[%c0_123, %c512_124] : memref<64x1152xbf16, #tpu.memory_space<vmem>>, vector<64x128xbf16>
    tpu.vector_store %arg8[%c0_123, %c512_124], %64 {strides = array<i32>} : memref<64x1152xbf16, #tpu.memory_space<vmem>>, vector<64x128xbf16>,
    %c0_125 = arith.constant 0 : index
    %c1_126 = arith.constant 1 : index
    %c2_127 = arith.constant 2 : index
    %c0_128 = arith.constant 0 : index
    %66 = vector.load %arg7[%c0_125, %c1_126, %c2_127, %c0_128] : memref<1x10x10x128xbf16, #tpu.memory_space<vmem>>, vector<1x8x8x128xbf16>
    %67 = vector.shape_cast %66 : vector<1x8x8x128xbf16> to vector<64x128xbf16>
    %c0_129 = arith.constant 0 : index
    %c640_130 = arith.constant 640 : index
    %68 = vector.load %arg8[%c0_129, %c640_130] : memref<64x1152xbf16, #tpu.memory_space<vmem>>, vector<64x128xbf16>
    tpu.vector_store %arg8[%c0_129, %c640_130], %67 {strides = array<i32>} : memref<64x1152xbf16, #tpu.memory_space<vmem>>, vector<64x128xbf16>,
    %c0_131 = arith.constant 0 : index
    %c2_132 = arith.constant 2 : index
    %c0_133 = arith.constant 0 : index
    %c0_134 = arith.constant 0 : index
    %69 = vector.load %arg7[%c0_131, %c2_132, %c0_133, %c0_134] : memref<1x10x10x128xbf16, #tpu.memory_space<vmem>>, vector<1x8x8x128xbf16>
    %70 = vector.shape_cast %69 : vector<1x8x8x128xbf16> to vector<64x128xbf16>
    %c0_135 = arith.constant 0 : index
    %c768_136 = arith.constant 768 : index
    %71 = vector.load %arg8[%c0_135, %c768_136] : memref<64x1152xbf16, #tpu.memory_space<vmem>>, vector<64x128xbf16>
    tpu.vector_store %arg8[%c0_135, %c768_136], %70 {strides = array<i32>} : memref<64x1152xbf16, #tpu.memory_space<vmem>>, vector<64x128xbf16>,
    %c0_137 = arith.constant 0 : index
    %c2_138 = arith.constant 2 : index
    %c1_139 = arith.constant 1 : index
    %c0_140 = arith.constant 0 : index
    %72 = vector.load %arg7[%c0_137, %c2_138, %c1_139, %c0_140] : memref<1x10x10x128xbf16, #tpu.memory_space<vmem>>, vector<1x8x8x128xbf16>
    %73 = vector.shape_cast %72 : vector<1x8x8x128xbf16> to vector<64x128xbf16>
    %c0_141 = arith.constant 0 : index
    %c896_142 = arith.constant 896 : index
    %74 = vector.load %arg8[%c0_141, %c896_142] : memref<64x1152xbf16, #tpu.memory_space<vmem>>, vector<64x128xbf16>
    tpu.vector_store %arg8[%c0_141, %c896_142], %73 {strides = array<i32>} : memref<64x1152xbf16, #tpu.memory_space<vmem>>, vector<64x128xbf16>,
    %c0_143 = arith.constant 0 : index
    %c2_144 = arith.constant 2 : index
    %c2_145 = arith.constant 2 : index
    %c0_146 = arith.constant 0 : index
    %75 = vector.load %arg7[%c0_143, %c2_144, %c2_145, %c0_146] : memref<1x10x10x128xbf16, #tpu.memory_space<vmem>>, vector<1x8x8x128xbf16>
    %76 = vector.shape_cast %75 : vector<1x8x8x128xbf16> to vector<64x128xbf16>
    %c0_147 = arith.constant 0 : index
    %c1024_148 = arith.constant 1024 : index
    %77 = vector.load %arg8[%c0_147, %c1024_148] : memref<64x1152xbf16, #tpu.memory_space<vmem>>, vector<64x128xbf16>
    tpu.vector_store %arg8[%c0_147, %c1024_148], %76 {strides = array<i32>} : memref<64x1152xbf16, #tpu.memory_space<vmem>>, vector<64x128xbf16>,
    %c0_149 = arith.constant 0 : index
    %c0_150 = arith.constant 0 : index
    %78 = vector.load %arg8[%c0_149, %c0_150] : memref<64x1152xbf16, #tpu.memory_space<vmem>>, vector<64x1152xbf16>
    %c0_151 = arith.constant 0 : index
    %c0_152 = arith.constant 0 : index
    %79 = vector.load %arg4[%c0_151, %c0_152] : memref<1152x128xbf16, #tpu.memory_space<vmem>>, vector<1152x128xbf16>
    %cst_153 = arith.constant dense<0.000000e+00> : vector<64x128xf32>
    %80 = tpu.matmul %78, %79, %cst_153 {dimension_numbers = #tpu.dot_dimension_numbers<[1], [0], [0], [1], [0, 0, 1, 1], [], []>} : vector<64x1152xbf16>, vector<1152x128xbf16>, vector<64x128xf32> -> vector<64x128xf32>
    %c0_154 = arith.constant 0 : index
    %c0_155 = arith.constant 0 : index
    %81 = vector.load %arg5[%c0_154, %c0_155] : memref<2x128xf32, #tpu.memory_space<vmem>>, vector<1x128xf32>
    %82 = vector.broadcast %81 : vector<1x128xf32> to vector<64x128xf32>
    %83 = arith.mulf %80, %82 : vector<64x128xf32>
    %c1_156 = arith.constant 1 : index
    %c0_157 = arith.constant 0 : index
    %84 = vector.load %arg5[%c1_156, %c0_157] : memref<2x128xf32, #tpu.memory_space<vmem>>, vector<1x128xf32>
    %85 = vector.broadcast %84 : vector<1x128xf32> to vector<64x128xf32>
    %86 = arith.addf %83, %85 : vector<64x128xf32>
    %c0_158 = arith.constant 0 : index
    %c0_159 = arith.constant 0 : index
    %c0_160 = arith.constant 0 : index
    %c0_161 = arith.constant 0 : index
    %87 = vector.load %arg9[%c0_158, %c0_159, %c0_160, %c0_161] : memref<1x8x8x128xf32, #tpu.memory_space<vmem>>, vector<1x8x8x128xf32>
    %88 = vector.shape_cast %87 : vector<1x8x8x128xf32> to vector<64x128xf32>
    %89 = arith.addf %86, %88 : vector<64x128xf32>
    %cst_162 = arith.constant 0.000000e+00 : f32
    %90 = vector.broadcast %cst_162 : f32 to vector<64x128xf32>
    %91 = arith.maximumf %89, %90 : vector<64x128xf32>
    %92 = vector.shape_cast %91 : vector<64x128xf32> to vector<1x8x8x128xf32>
    %93 = arith.truncf %92 : vector<1x8x8x128xf32> to vector<1x8x8x128xbf16>
    %c0_163 = arith.constant 0 : index
    %c0_164 = arith.constant 0 : index
    %c0_165 = arith.constant 0 : index
    %c0_166 = arith.constant 0 : index
    %94 = vector.load %arg6[%c0_163, %c0_164, %c0_165, %c0_166] : memref<1x8x8x128xbf16, #tpu.memory_space<vmem>>, vector<1x8x8x128xbf16>
    tpu.vector_store %arg6[%c0_163, %c0_164, %c0_165, %c0_166], %93 {strides = array<i32>} : memref<1x8x8x128xbf16, #tpu.memory_space<vmem>>, vector<1x8x8x128xbf16>,
    return
  }
  func.func @transform_0(%arg0: i32) -> (i32, i32, i32, i32, i32, i32) {
    %c0_i32 = arith.constant 0 : i32
    %c0_i32_0 = arith.constant 0 : i32
    %c0_i32_1 = arith.constant 0 : i32
    %c0_i32_2 = arith.constant 0 : i32
    %c0_i32_3 = arith.constant 0 : i32
    %c0_i32_4 = arith.constant 0 : i32
    return %arg0, %c0_i32, %c0_i32_0, %c0_i32_1, %c0_i32_2, %c0_i32_3 : i32, i32, i32, i32, i32, i32
  }
  func.func @transform_1(%arg0: i32) -> (i32, i32) {
    %c0_i32 = arith.constant 0 : i32
    %c0_i32_0 = arith.constant 0 : i32
    %c0_i32_1 = arith.constant 0 : i32
    return %c0_i32, %c0_i32_0 : i32, i32
  }
  func.func @transform_2(%arg0: i32) -> (i32, i32) {
    %c0_i32 = arith.constant 0 : i32
    %c0_i32_0 = arith.constant 0 : i32
    %c0_i32_1 = arith.constant 0 : i32
    return %c0_i32, %c0_i32_0 : i32, i32
  }
  func.func @transform_3(%arg0: i32) -> (i32, i32) {
    %c0_i32 = arith.constant 0 : i32
    %c0_i32_0 = arith.constant 0 : i32
    %c0_i32_1 = arith.constant 0 : i32
    return %c0_i32, %c0_i32_0 : i32, i32
  }
  func.func @transform_4(%arg0: i32) -> (i32, i32) {
    %c0_i32 = arith.constant 0 : i32
    %c0_i32_0 = arith.constant 0 : i32
    %c0_i32_1 = arith.constant 0 : i32
    return %c0_i32, %c0_i32_0 : i32, i32
  }
  func.func @transform_5(%arg0: i32) -> (i32, i32, i32, i32) {
    %c0_i32 = arith.constant 0 : i32
    %c0_i32_0 = arith.constant 0 : i32
    %c0_i32_1 = arith.constant 0 : i32
    %c0_i32_2 = arith.constant 0 : i32
    return %arg0, %c0_i32, %c0_i32_0, %c0_i32_1 : i32, i32, i32, i32
  }
}

</mosaic_0001>

<bundles_post_ra>
// kernel: basic_block_forward.1
= control target key start
LH: loop header
LB: loop body
LE: loop exit
PB: predicated region body
PF: predicated region fallthrough
CT: control target
= control target key end

     0   :  { %s5377_s18 = smov 0   ;;  %s6533_s0 = inlined_call_operand.vmem [shape: bf16[2,9,2,2,9,128], index: 0, kind: input, shape index: {}]   ;;  %s6534_s1 = inlined_call_operand.vmem [shape: bf16[1152,256], index: 1, kind: input, shape index: {}]   ;;  %s6535_s2 = inlined_call_operand.vmem [shape: f32[2,256], index: 2, kind: input, shape index: {}]   ;;  %s6536_s3 = inlined_call_operand.vmem [shape: bf16[1152,128], index: 3, kind: input, shape index: {}]   ;;  %s6537_s4 = inlined_call_operand.vmem [shape: f32[2,128], index: 4, kind: input, shape index: {}]   ;;  %s6538_s5 = inlined_call_operand.vmem [shape: bf16[2,8,8,128], index: 5, kind: output, shape index: {}]  }
   0x1 LB: > { %s4331_s19 = sadd.s32 4294967295, %s5344_s18   ;;  %p4335_p0 = scmp.ge.s32.totalorder %s5344_s18, 1  ;;  %s5344_s18 = sphi %s5377_s18, %s15_s18  }
   0x2   : > { %p187_p1 = scmp.lt.s32.totalorder %s5344_s18, 3 }
   0x4   : > { %p188_p2 = pnand %p4335_p0, %p187_p1 }
   0x5   : > { %v5038_v0 = vld [vmem:[%s6534_s1 + $0x104] ss:$8 sps:$4 sm:$0xff] (!%p188_p2)   ;;  %v5040_v1 = vld [vmem:[%s6534_s1 + $0x100] ss:$8 sps:$4 sm:$0xff] (!%p188_p2)   ;;  %v5041_v2 = vld [vmem:[%s6534_s1 + $0x114] ss:$8 sps:$4 sm:$0xff] (!%p188_p2)  }
   0x6   : > { %191 = sbr.rel (%p188_p2) target bundleno = 851 (0x353), region = 40  ;;  %1937 = vmatprep.subr.bf16.mxu0 (!%p188_p2), %v5038_v0  ;;  %v5043_v3 = vld [vmem:[%s6534_s1 + $0x110] ss:$8 sps:$4 sm:$0xff] (!%p188_p2)   ;;  %v5044_v4 = vld [vmem:[%s6534_s1 + $0x124] ss:$8 sps:$4 sm:$0xff] (!%p188_p2)   ;;  %p215_p3 = scmp.lt.s32.totalorder (!%p188_p2), %s4331_s19, 1 }
   0x7   : > { %1938 = vmatpush1.bf16.msra.mxu0 (!%p188_p2), %v5040_v1  ;;  %v5046_v5 = vld [vmem:[%s6534_s1 + $0x120] ss:$8 sps:$4 sm:$0xff] (!%p188_p2)   ;;  %v5047_v6 = vld [vmem:[%s6534_s1 + $0x134] ss:$8 sps:$4 sm:$0xff] (!%p188_p2)   ;;  %v5049_v7 = vld [vmem:[%s6534_s1 + $0x130] ss:$8 sps:$4 sm:$0xff] (!%p188_p2)  }
   0x8   : > { %1939 = vmatprep.subr.bf16.mxu0 (!%p188_p2), %v5041_v2  ;;  %v5050_v8 = vld [vmem:[%s6534_s1 + $0x144] ss:$8 sps:$4 sm:$0xff] (!%p188_p2)   ;;  %v5052_v9 = vld [vmem:[%s6534_s1 + $0x140] ss:$8 sps:$4 sm:$0xff] (!%p188_p2)   ;;  %v5053_v10 = vld [vmem:[%s6534_s1 + $0x154] ss:$8 sps:$4 sm:$0xff] (!%p188_p2)  }
   0x9   : > { %v5055_v11 = vld [vmem:[%s6534_s1 + $0x150] ss:$8 sps:$4 sm:$0xff] (!%p188_p2)   ;;  %v5056_v12 = vld [vmem:[%s6534_s1 + $0x164] ss:$8 sps:$4 sm:$0xff] (!%p188_p2)   ;;  %v5058_v16 = vld [vmem:[%s6534_s1 + $0x160] ss:$8 sps:$4 sm:$0xff] (!%p188_p2)  }
   0xa   : > { %v5059_v17 = vld [vmem:[%s6534_s1 + $0x174] ss:$8 sps:$4 sm:$0xff] (!%p188_p2)   ;;  %v5061_v18 = vld [vmem:[%s6534_s1 + $0x170] ss:$8 sps:$4 sm:$0xff] (!%p188_p2)   ;;  %v5062_v19 = vld [vmem:[%s6534_s1 + $0x184] ss:$8 sps:$4 sm:$0xff] (!%p188_p2)  }
   0xb   : > { %1940 = vmatpush1.bf16.msra.mxu0 (!%p188_p2), %v5043_v3  ;;  %v5064_v20 = vld [vmem:[%s6534_s1 + $0x180] ss:$8 sps:$4 sm:$0xff] (!%p188_p2)   ;;  %v5065_v21 = vld [vmem:[%s6534_s1 + $0x194] ss:$8 sps:$4 sm:$0xff] (!%p188_p2)   ;;  %v5067_v22 = vld [vmem:[%s6534_s1 + $0x190] ss:$8 sps:$4 sm:$0xff] (!%p188_p2)  }
   0xc   : > { %1941 = vmatprep.subr.bf16.mxu0 (!%p188_p2), %v5044_v4  ;;  %v5068_v23 = vld [vmem:[%s6534_s1 + $0x1a4] ss:$8 sps:$4 sm:$0xff] (!%p188_p2)   ;;  %v5070_v24 = vld [vmem:[%s6534_s1 + $0x1a0] ss:$8 sps:$4 sm:$0xff] (!%p188_p2)   ;;  %v5071_v25 = vld [vmem:[%s6534_s1 + $0x1b4] ss:$8 sps:$4 sm:$0xff] (!%p188_p2)  }
   0xd   : > { %s6550_s19 = smov (!%p215_p3, %s4331_s19), 1  ;;  %v5073_v28 = vld [vmem:[%s6534_s1 + $0x1b0] ss:$8 sps:$4 sm:$0xff]   ;;  %v5074_v33 = vld [vmem:[%s6534_s1 + $0x1c4] ss:$8 sps:$4 sm:$0xff]   ;;  %vm231_vm3 = vcmask 1040384  }
   0xe   : > { %s5028_s17 = smul.u32 288, %s6550_s19  ;;  %v5076_v36 = vld [vmem:[%s6534_s1 + $0x1c0] ss:$8 sps:$4 sm:$0xff]   ;;  %v5077_v37 = vld [vmem:[%s6534_s1 + $0x1d4] ss:$8 sps:$4 sm:$0xff]   ;;  %vm2407_vm8 = vcmask 1043456  }
   0xf   : > { %1942 = vmatpush1.bf16.msra.mxu0 %v5046_v5  ;;  %vm385_vm0 = vsmask.f32 3328  ;;  %vm386_vm1 = vsmask.f32 7440  ;;  %v5079_v48 = vld [vmem:[%s6534_s1 + $0x1d0] ss:$8 sps:$4 sm:$0xff]  }
  0x10   : > { %1943 = vmatprep.subr.bf16.mxu0 %v5047_v6  ;;  %s5430_s26 = scalar_lea.vmem %s6533_s0, %s5028_s17  ;;  %v5080_v53 = vld [vmem:[%s6534_s1 + $0x1e4] ss:$8 sps:$4 sm:$0xff]   ;;  %v5082_v62 = vld [vmem:[%s6534_s1 + $0x1e0] ss:$8 sps:$4 sm:$0xff]   ;;  %v5083_v3 = vld [vmem:[%s6534_s1 + $0x1f4] ss:$8 sps:$4 sm:$0xff]  }
  0x11   : > { %v4359_v13 = vld [vmem:[%s5430_s26 + $0x10] sm:$0xf]  ;;  %v369_v26 = vld [vmem:[%s5430_s26] sm:$0xf]  ;;  %v370_v38 = vld [vmem:[%s5430_s26 + $0x4] sm:$0x1] }
  0x12   : > { %v4360_v14 = vld [vmem:[%s5430_s26 + $0x30] sm:$0xf]  ;;  %v371_v27 = vld [vmem:[%s5430_s26 + $0x20] sm:$0xf]  ;;  %v389_v29 = vshrl.u32 %v369_v26, 16  ;;  %v392_v30 = vshll.u32 %v369_v26, 16  ;;  %vm5500_vm2 = vmor %vm385_vm0, %vm386_vm1 }
  0x13   : > { %1944 = vmatpush1.bf16.msra.mxu0 %v5049_v7  ;;  %v4367_v15 = vcombine.low %v4359_v13, %v4360_v14  ;;  %v403_v31 = vshrl.u32 %v371_v27, 16  ;;  %v406_v32 = vshll.u32 %v371_v27, 16  ;;  %v373_v34 = vld [vmem:[%s5430_s26 + $0x40] sm:$0xf]  ;;  %v372_v39 = vld [vmem:[%s5430_s26 + $0x24] sm:$0x1] }
  0x14   : > { %1945 = vmatprep.subr.bf16.mxu0 %v5050_v8  ;;  %v375_v35 = vld [vmem:[%s5430_s26 + $0x60] sm:$0xf]  ;;  %v391_v40 = vrot.slane %v389_v29, 4  ;;  %v394_v41 = vrot.slane %v392_v30, 5  ;;  %v417_v44 = vshrl.u32 %v373_v34, 16  ;;  %v420_v45 = vshll.u32 %v373_v34, 16 }
  0x15   : > { %1969 = vmatprep.mubr.bf16.mxu0 %v4367_v15  ;;  %v405_v42 = vrot.slane %v403_v31, 4  ;;  %v408_v43 = vrot.slane %v406_v32, 5  ;;  %v431_v46 = vshrl.u32 %v375_v35, 16  ;;  %v434_v47 = vshll.u32 %v375_v35, 16  ;;  %v374_v58 = vld [vmem:[%s5430_s26 + $0x44] sm:$0x1] }
  0x16   : > { %v395_v49 = vor.u32 %v394_v41, %v391_v40  ;;  %v398_v50 = vshll.u32 %v370_v38, 16  ;;  %v412_v52 = vshll.u32 %v372_v39, 16  ;;  %v419_v54 = vrot.slane %v417_v44, 4  ;;  %v376_v59 = vld [vmem:[%s5430_s26 + $0x64] sm:$0x1]  ;;  %v5336_v4 = vld [vmem:[%s6536_s3 + $0x230] sm:$0xff]  }
  0x17   : > { %1946 = vmatpush1.bf16.msra.mxu0 %v5052_v9  ;;  %v409_v51 = vor.u32 %v408_v43, %v405_v42  ;;  %v422_v55 = vrot.slane %v420_v45, 5  ;;  %v433_v56 = vrot.slane %v431_v46, 4  ;;  %v436_v57 = vrot.slane %v434_v47, 5  ;;  %v377_v60 = vld [vmem:[%s5430_s26 + $0x80] sm:$0xf]  ;;  %s4736_s13 = sshll.u32 %s6550_s19, 5 }
  0x18   : > { %1947 = vmatprep.subr.bf16.mxu0 %v5053_v10  ;;  %v379_v61 = vld [vmem:[%s5430_s26 + $0xa0] sm:$0xf]  ;;  %v396_v63 = vrot.slane %v395_v49, 4  ;;  %v400_v0 = vrot.slane %v398_v50, 5  ;;  %v414_v2 = vrot.slane %v412_v52, 5  ;;  %v426_v6 = vshll.u32 %v374_v58, 16  ;;  %s224_s16 = scalar_lea.vmem %s6538_s5, %s4736_s13 }
  0x19   : > { %v410_v1 = vrot.slane %v409_v51, 4  ;;  %v423_v5 = vor.u32 %v422_v55, %v419_v54  ;;  %v437_v7 = vor.u32 %v436_v57, %v433_v56  ;;  %v440_v8 = vshll.u32 %v376_v59, 16  ;;  %v5085_v13 = vld [vmem:[%s6534_s1 + $0x1f0] ss:$8 sps:$4 sm:$0xff]   ;;  %v5088_v14 = vld [vmem:[%s6534_s1 + $0x204] ss:$8 sps:$4 sm:$0xff]  }
  0x1a   : > { %v445_v9 = vshrl.u32 %v377_v60, 16  ;;  %v448_v10 = vshll.u32 %v377_v60, 16  ;;  %v401_v15 = vsel %vm5500_vm2, %v396_v63, %v400_v0  ;;  %v5086_v29 = vld [vmem:[%s6534_s1 + $0x200] ss:$8 sps:$4 sm:$0xff]   ;;  %v5091_v31 = vld [vmem:[%s6534_s1 + $0x214] ss:$8 sps:$4 sm:$0xff]  }
  0x1b   : > { %1948 = vmatpush1.bf16.msra.mxu0 %v5055_v11  ;;  %v459_v11 = vshrl.u32 %v379_v61, 16  ;;  %v381_v34 = vld [vmem:[%s5430_s26 + $0xc0] sm:$0xf]  ;;  %v4385_v38 = vld [vmem:[%s5430_s26 + $0x30] sm:$0xf]  ;;  %vm2681_vm10 = vcmask 1042432  }
  0x1c   : > { %1949 = vmatprep.subr.bf16.mxu0 %v5056_v12  ;;  %v462_v12 = vshll.u32 %v379_v61, 16  ;;  %v450_v26 = vrot.slane %v448_v10, 5  ;;  %v383_v35 = vld [vmem:[%s5430_s26 + $0xe0] sm:$0xf]  ;;  %v5089_v39 = vld [vmem:[%s6534_s1 + $0x210] ss:$8 sps:$4 sm:$0xff]  }
  0x1d   : > { %v461_v27 = vrot.slane %v459_v11, 4  ;;  %v5094_v44 = vld [vmem:[%s6534_s1 + $0x224] ss:$8 sps:$4 sm:$0xff]   ;;  %v473_v45 = vshrl.u32 %v381_v34, 16  ;;  %v476_v46 = vshll.u32 %v381_v34, 16  ;;  %v487_v47 = vshrl.u32 %v383_v35, 16 }
  0x1e   : > { %v4363_v49 = vld [vmem:[%s5430_s26 + $0x90] sm:$0xf]  ;;  %v625_v52 = vshrl.u32 %v4385_v38, 16  ;;  %v628_v56 = vshll.u32 %v4385_v38, 16  ;;  %v5092_v57 = vld [vmem:[%s6534_s1 + $0x220] ss:$8 sps:$4 sm:$0xff]  }
  0x1f   : > { %1950 = vmatpush1.bf16.msra.mxu0 %v5058_v16  ;;  %v415_v16 = vsel %vm5500_vm2, %v410_v1, %v414_v2  ;;  %v382_v61 = vld [vmem:[%s5430_s26 + $0xc4] sm:$0x1]  ;;  %v475_v0 = vrot.slane %v473_v45, 4  ;;  %v478_v1 = vrot.slane %v476_v46, 5  ;;  %v489_v2 = vrot.slane %v487_v47, 4 }
  0x20   : > { %1951 = vmatprep.subr.bf16.mxu0 %v5059_v17  ;;  %v4361_v17 = vld [vmem:[%s5430_s26 + $0x50] sm:$0xf]  ;;  %v4355_v30 = vcombine.low %v401_v15, %v415_v16  ;;  %v384_v63 = vld [vmem:[%s5430_s26 + $0xe4] sm:$0x1]  ;;  %v630_v10 = vrot.slane %v628_v56, 5  ;;  %vm2682_vm11 = vcmask 1046532  }
  0x21   : > { %v5158_v11 = vld [vmem:[%s6534_s1 + $0x4] ss:$8 sps:$4 sm:$0xff]   ;;  %v5103_v34 = vld [vmem:[%s6534_s1 + $0x254] ss:$8 sps:$4 sm:$0xff]   ;;  %vm232_vm4 = vsmask.f32 256  ;;  %vm6305_vm12 = vmor %vm2681_vm10, %vm2682_vm11 }
  0x22   : > { %v5100_v15 = vld [vmem:[%s6534_s1 + $0x244] ss:$8 sps:$4 sm:$0xff]   ;;  %1864 = vmatprep.subr.bf16.mxu1 %v5158_v11  ;;  %v5109_v56 = vld [vmem:[%s6534_s1 + $0x274] ss:$8 sps:$4 sm:$0xff]   ;;  %vm5779_vm5 = vmand %vm231_vm3, %vm232_vm4  ;;  %vm264_vm6 = vsmask.f32 7938 }
  0x23   : > { %1952 = vmatpush1.bf16.msra.mxu0 %v5061_v18  ;;  %v4362_v18 = vld [vmem:[%s5430_s26 + $0x70] sm:$0xf]  ;;  %v5106_v45 = vld [vmem:[%s6534_s1 + $0x264] ss:$8 sps:$4 sm:$0xff]   ;;  %vm6000_vm7 = vmand %vm231_vm3, %vm264_vm6 }
  0x24   : > { %1953 = vmatprep.subr.bf16.mxu0 %v5062_v19  ;;  %v424_v19 = vrot.slane %v423_v5, 4  ;;  %v4368_v32 = vcombine.low %v4361_v17, %v4362_v18  ;;  %v4365_v17 = vld [vmem:[%s5430_s26 + $0xd0] sm:$0xf]  ;;  %v482_v18 = vshll.u32 %v382_v61, 16  ;;  %vm6163_vm9 = vmand %vm2407_vm8, %vm264_vm6 }
  0x25   : > { %v5190_v61 = vld [vmem:[%s6534_s1 + $0x50] ss:$8 sps:$4 sm:$0xff]  }
  0x27   : > { %1954 = vmatpush1.bf16.msra.mxu0 %v5064_v20  ;;  %v428_v20 = vrot.slane %v426_v6, 5  ;;  %v4384_v6 = vld [vmem:[%s5430_s26 + $0x14] sm:$0x1] }
  0x28   : > { %1955 = vmatprep.subr.bf16.mxu0 %v5065_v21  ;;  %v438_v21 = vrot.slane %v437_v7, 4 }
  0x29   : > { %v429_v40 = vsel %vm5500_vm2, %v424_v19, %v428_v20  ;;  %v4366_v20 = vld [vmem:[%s5430_s26 + $0xf0] sm:$0xf] }
  0x2b   : > { %1956 = vmatpush1.bf16.msra.mxu0 %v5067_v22  ;;  %v442_v22 = vrot.slane %v440_v8, 5 }
  0x2c   : > { %1957 = vmatprep.subr.bf16.mxu0 %v5068_v23  ;;  %v378_v23 = vld [vmem:[%s5430_s26 + $0x84] sm:$0x1] }
  0x2d   : > { %v443_v41 = vsel %vm5500_vm2, %v438_v21, %v442_v22  ;;  %v479_v21 = vor.u32 %v478_v1, %v475_v0  ;;  %v5115_v0 = vld [vmem:[%s6534_s1 + $0x294] ss:$8 sps:$4 sm:$0xff]   ;;  %v5196_v1 = vld [vmem:[%s6534_s1 + $0x60] ss:$8 sps:$4 sm:$0xff]  }
  0x2e   : > { %v4356_v58 = vcombine.low %v429_v40, %v443_v41 }
  0x2f   : > { %1958 = vmatpush1.bf16.msra.mxu0 %v5070_v24  ;;  %v380_v24 = vld [vmem:[%s5430_s26 + $0xa4] sm:$0x1] }
  0x30   : > { %1959 = vmatprep.subr.bf16.mxu0 %v5071_v25  ;;  %v447_v25 = vrot.slane %v445_v9, 4  ;;  %v627_v9 = vrot.slane %v625_v52, 4 }
  0x32   : > { %v451_v42 = vor.u32 %v450_v26, %v447_v25  ;;  %v620_v26 = vshll.u32 %v4384_v6, 16  ;;  %v5116_v6 = vld [vmem:[%s6534_s1 + $0x2a0] ss:$8 sps:$4 sm:$0xff]  }
  0x33   : > { %1960 = vmatpush1.bf16.msra.mxu0 %v5073_v28  ;;  %v464_v28 = vrot.slane %v462_v12, 5  ;;  %v5160_v12 = vld [vmem:[%s6534_s1] ss:$8 sps:$4 sm:$0xff]  }
  0x34   : > { %1961 = vmatprep.subr.bf16.mxu0 %v5074_v33  ;;  %v454_v33 = vshll.u32 %v378_v23, 16  ;;  %v452_v59 = vrot.slane %v451_v42, 4  ;;  %v496_v23 = vshll.u32 %v384_v63, 16  ;;  %1865 = vmatpush1.bf16.msra.mxu1 %v5160_v12  ;;  %v622_v40 = vrot.slane %v620_v26, 5  ;;  %v5194_v63 = vld [vmem:[%s6534_s1 + $0x64] ss:$8 sps:$4 sm:$0xff]  }
  0x35   : > { %v465_v43 = vor.u32 %v464_v28, %v461_v27  ;;  %v631_v27 = vor.u32 %v630_v10, %v627_v9  ;;  %v4389_v9 = vld [vmem:[%s5430_s26 + $0x70] sm:$0xf]  ;;  %v5121_v10 = vld [vmem:[%s6534_s1 + $0x2b4] ss:$8 sps:$4 sm:$0xff]   ;;  %v5346_v12 = vmov 0  }
  0x36   : > { %v456_v54 = vrot.slane %v454_v33, 5  ;;  %v4370_v33 = vcombine.low %v4365_v17, %v4366_v20  ;;  %v498_v38 = vrot.slane %v496_v23, 5  ;;  %226 = vst [vmem:[#allocation2] sm:$0xf] %v5346_v12  ;;  %227 = vst [vmem:[#allocation2 + $0x4] sm:$0x1] %v5346_v12 }
  0x37   : > { %1962 = vmatpush1.bf16.msra.mxu0 %v5076_v36  ;;  %v468_v36 = vshll.u32 %v380_v24, 16  ;;  %v466_v60 = vrot.slane %v465_v43, 4  ;;  %v5164_v24 = vld [vmem:[%s6534_s1 + $0x14] ss:$8 sps:$4 sm:$0xff]   ;;  %v632_v41 = vrot.slane %v631_v27, 4  ;;  %v656_v17 = vshll.u32 %v4389_v9, 16 }
  0x38   : > { %1963 = vmatprep.subr.bf16.mxu0 %v5077_v37  ;;  %v4383_v37 = vld [vmem:[%s5430_s26 + $0x10] sm:$0xf]  ;;  %v457_v16 = vsel %vm5500_vm2, %v452_v59, %v456_v54  ;;  %1866 = vmatprep.subr.bf16.mxu1 %v5164_v24  ;;  %v5172_v43 = vld [vmem:[%s6534_s1 + $0x20] ss:$8 sps:$4 sm:$0xff]   ;;  %v5112_v59 = vld [vmem:[%s6534_s1 + $0x284] ss:$8 sps:$4 sm:$0xff]  }
  0x39   : > { %v611_v50 = vshrl.u32 %v4383_v37, 16  ;;  %v614_v51 = vshll.u32 %v4383_v37, 16  ;;  %v470_v55 = vrot.slane %v468_v36, 5  ;;  %v484_v36 = vrot.slane %v482_v18, 5  ;;  %v5104_v54 = vld [vmem:[%s6534_s1 + $0x260] ss:$8 sps:$4 sm:$0xff]  }
  0x3a   : > { %229 = vst [vmem:[#allocation2 + $0x48] sm:$0xf] %v5346_v12  ;;  %230 = vst [vmem:[#allocation2 + $0x4c] sm:$0x1] %v5346_v12  ;;  %v5119_v18 = vld [vmem:[%s6534_s1 + $0x2b0] ss:$8 sps:$4 sm:$0xff]  }
  0x3b   : > { %1964 = vmatpush1.bf16.msra.mxu0 %v5079_v48  ;;  %v490_v48 = vshll.u32 %v383_v35, 16  ;;  %v613_v7 = vrot.slane %v611_v50, 4  ;;  %v616_v8 = vrot.slane %v614_v51, 5  ;;  %v471_v19 = vsel %vm5500_vm2, %v466_v60, %v470_v55  ;;  %v5176_v50 = vld [vmem:[%s6534_s1 + $0x34] ss:$8 sps:$4 sm:$0xff]  }
  0x3c   : > { %1965 = vmatprep.subr.bf16.mxu0 %v5080_v53  ;;  %v4364_v53 = vld [vmem:[%s5430_s26 + $0xb0] sm:$0xf]  ;;  %v480_v35 = vrot.slane %v479_v21, 4  ;;  %v5188_v60 = vld [vmem:[%s6534_s1 + $0x54] ss:$8 sps:$4 sm:$0xff]   ;;  %v658_v27 = vrot.slane %v656_v17, 5 }
  0x3d   : > { %v4369_v5 = vcombine.low %v4363_v49, %v4364_v53  ;;  %v617_v25 = vor.u32 %v616_v8, %v613_v7  ;;  %v5178_v51 = vld [vmem:[%s6534_s1 + $0x30] ss:$8 sps:$4 sm:$0xff]   ;;  %v5182_v53 = vld [vmem:[%s6534_s1 + $0x44] ss:$8 sps:$4 sm:$0xff]   ;;  %v5200_v7 = vld [vmem:[%s6534_s1 + $0x74] ss:$8 sps:$4 sm:$0xff]  }
  0x3e   : > { %v485_v46 = vsel %vm5500_vm2, %v480_v35, %v484_v36  ;;  %v5202_v8 = vld [vmem:[%s6534_s1 + $0x70] ss:$8 sps:$4 sm:$0xff]   ;;  %v4388_v20 = vld [vmem:[%s5430_s26 + $0x54] sm:$0x1]  ;;  %v5220_v36 = vld [vmem:[%s6534_s1 + $0xa0] ss:$8 sps:$4 sm:$0xff]  }
  0x3f   : > { %1966 = vmatpush1.bf16.msra.mxu0 %v5082_v62  ;;  %v5097_v62 = vld [vmem:[%s6534_s1 + $0x234] ss:$8 sps:$4 sm:$0xff]  }
  0x40   : > { %1967 = vmatprep.subr.bf16.mxu0 %v5083_v3  ;;  %v492_v3 = vrot.slane %v490_v48, 5  ;;  %v4390_v21 = vld [vmem:[%s5430_s26 + $0x74] sm:$0x1] }
  0x41   : > { %v5212_v24 = vld [vmem:[%s6534_s1 + $0x94] ss:$8 sps:$4 sm:$0xff]   ;;  %v662_v35 = vshll.u32 %v4390_v21, 16 }
  0x42   : > { %v493_v22 = vor.u32 %v492_v3, %v489_v2  ;;  %v5113_v2 = vld [vmem:[%s6534_s1 + $0x290] ss:$8 sps:$4 sm:$0xff]   ;;  %v5118_v3 = vld [vmem:[%s6534_s1 + $0x2a4] ss:$8 sps:$4 sm:$0xff]   ;;  %v5139_v21 = vld [vmem:[%s6534_s1 + $0x314] ss:$8 sps:$4 sm:$0xff]  }
  0x43   : > { %1968 = vmatpush1.bf16.msra.mxu0 %v5085_v13  ;;  %v5095_v13 = vld [vmem:[%s6534_s1 + $0x230] ss:$8 sps:$4 sm:$0xff]  }
  0x44   : > { %2010 = vmatprep.subr.bf16.mxu0 %v5088_v14  ;;  %v4386_v14 = vld [vmem:[%s5430_s26 + $0x34] sm:$0x1]  ;;  %v494_v37 = vrot.slane %v493_v22, 4 }
  0x45   : > { %v634_v28 = vshll.u32 %v4386_v14, 16  ;;  %v5206_v14 = vld [vmem:[%s6534_s1 + $0x84] ss:$8 sps:$4 sm:$0xff]  }
  0x46   : > { %1970 = vmatmul.mubr.bf16.vlgmr.msra.gmra.mrb[0].mxu0 %v4355_v30  ;;  %v5170_v30 = vld [vmem:[%s6534_s1 + $0x24] ss:$8 sps:$4 sm:$0xff]   ;;  %v499_v47 = vsel %vm5500_vm2, %v494_v37, %v498_v38  ;;  %v5125_v37 = vld [vmem:[%s6534_s1 + $0x2d0] ss:$8 sps:$4 sm:$0xff]  }
  0x47   : > { %2011 = vmatpush1.bf16.msra.mxu0 %v5086_v29  ;;  %1979 = vmatprep.mubr.bf16.mxu0 %v4368_v32  ;;  %v5166_v29 = vld [vmem:[%s6534_s1 + $0x10] ss:$8 sps:$4 sm:$0xff]   ;;  %v4357_v32 = vcombine.low %v457_v16, %v471_v19  ;;  %v636_v42 = vrot.slane %v634_v28, 5  ;;  %v4358_v52 = vcombine.low %v485_v46, %v499_v47  ;;  %v653_v16 = vshrl.u32 %v4389_v9, 16  ;;  %v5124_v19 = vld [vmem:[%s6534_s1 + $0x2c4] ss:$8 sps:$4 sm:$0xff]  }
  0x48   : > { %2012 = vmatprep.subr.bf16.mxu0 %v5091_v31  ;;  %v5098_v31 = vld [vmem:[%s6534_s1 + $0x240] ss:$8 sps:$4 sm:$0xff]   ;;  %1867 = vmatpush1.bf16.msra.mxu1 %v5166_v29  ;;  %v4391_v28 = vld [vmem:[%s5430_s26 + $0x90] sm:$0xf]  ;;  %v5218_v29 = vld [vmem:[%s6534_s1 + $0xa4] ss:$8 sps:$4 sm:$0xff]  }
  0x49   : > { %1868 = vmatprep.subr.bf16.mxu1 %v5170_v30  ;;  %v637_v49 = vsel %vm5500_vm2, %v632_v41, %v636_v42  ;;  %v655_v26 = vrot.slane %v653_v16, 4  ;;  %v5122_v30 = vld [vmem:[%s6534_s1 + $0x2c0] ss:$8 sps:$4 sm:$0xff]   ;;  %v664_v47 = vrot.slane %v662_v35, 5  ;;  %v4373_v35 = vld [vmem:[%s5430_s26 + $0x58] sm:$0xf] }
  0x4a   : > { %v5134_v16 = vld [vmem:[%s6534_s1 + $0x300] ss:$8 sps:$4 sm:$0xff]  }
  0x4b   : > { %2013 = vmatpush1.bf16.msra.mxu0 %v5089_v39  ;;  %v618_v39 = vrot.slane %v617_v25, 4  ;;  %v5214_v25 = vld [vmem:[%s6534_s1 + $0x90] ss:$8 sps:$4 sm:$0xff]   ;;  %v659_v38 = vor.u32 %v658_v27, %v655_v26 }
  0x4c   : > { %2014 = vmatprep.subr.bf16.mxu0 %v5094_v44  ;;  %v5101_v44 = vld [vmem:[%s6534_s1 + $0x250] ss:$8 sps:$4 sm:$0xff]   ;;  %1869 = vmatpush1.bf16.msra.mxu1 %v5172_v43  ;;  %v5224_v43 = vld [vmem:[%s6534_s1 + $0xb4] ss:$8 sps:$4 sm:$0xff]  }
  0x4d   : > { %v623_v48 = vsel %vm5500_vm2, %v618_v39, %v622_v40  ;;  %1870 = vmatprep.subr.bf16.mxu1 %v5176_v50  ;;  %v667_v39 = vshrl.u32 %v4391_v28, 16  ;;  %v670_v40 = vshll.u32 %v4391_v28, 16  ;;  %v660_v50 = vrot.slane %v659_v38, 4  ;;  %v4374_v38 = vld [vmem:[%s5430_s26 + $0x78] sm:$0xf] }
  0x4e   : > { %1980 = vmatmul.mubr.bf16.gmra.mrb[4].mxu0 %v4356_v58  ;;  %v4399_v55 = vcombine.low %v623_v48, %v637_v49  ;;  %v5107_v58 = vld [vmem:[%s6534_s1 + $0x270] ss:$8 sps:$4 sm:$0xff]   ;;  %v5128_v49 = vld [vmem:[%s6534_s1 + $0x2e0] ss:$8 sps:$4 sm:$0xff]  }
  0x4f   : > { %2015 = vmatpush1.bf16.msra.mxu0 %v5092_v57  ;;  %1989 = vmatprep.mubr.bf16.mxu0 %v4369_v5  ;;  %v5184_v57 = vld [vmem:[%s6534_s1 + $0x40] ss:$8 sps:$4 sm:$0xff]   ;;  %v4387_v5 = vld [vmem:[%s5430_s26 + $0x50] sm:$0xf] }
  0x50   : > { %2016 = vmatprep.subr.bf16.mxu0 %v5097_v62  ;;  %1871 = vmatpush1.bf16.msra.mxu1 %v5178_v51  ;;  %v5110_v62 = vld [vmem:[%s6534_s1 + $0x280] ss:$8 sps:$4 sm:$0xff]   ;;  %v639_v11 = vshrl.u32 %v4387_v5, 16  ;;  %v5226_v48 = vld [vmem:[%s6534_s1 + $0xb0] ss:$8 sps:$4 sm:$0xff]  }
  0x51   : > { %1872 = vmatprep.subr.bf16.mxu1 %v5182_v53  ;;  %v4392_v51 = vld [vmem:[%s5430_s26 + $0x94] sm:$0x1] }
  0x52   : > { %v641_v22 = vrot.slane %v639_v11, 4  ;;  %v5133_v53 = vld [vmem:[%s6534_s1 + $0x2f4] ss:$8 sps:$4 sm:$0xff]  }
  0x53   : > { %2017 = vmatpush1.bf16.msra.mxu0 %v5095_v13  ;;  %v642_v13 = vshll.u32 %v4387_v5, 16 }
  0x54   : > { %2018 = vmatprep.subr.bf16.mxu0 %v5100_v15  ;;  %1873 = vmatpush1.bf16.msra.mxu1 %v5184_v57  ;;  %v5208_v15 = vld [vmem:[%s6534_s1 + $0x80] ss:$8 sps:$4 sm:$0xff]  }
  0x55   : > { %1874 = vmatprep.subr.bf16.mxu1 %v5188_v60  ;;  %v644_v23 = vrot.slane %v642_v13, 5  ;;  %v4397_v60 = vld [vmem:[%s5430_s26 + $0xf0] sm:$0xf] }
  0x56   : > { %1990 = vmatmul.mubr.bf16.gmra.mrb[8].mxu0 %v4357_v32  ;;  %v4393_v32 = vld [vmem:[%s5430_s26 + $0xb0] sm:$0xf]  ;;  %v709_v11 = vshrl.u32 %v4397_v60, 16  ;;  %v712_v13 = vshll.u32 %v4397_v60, 16  ;;  %v5145_v60 = vld [vmem:[%s6534_s1 + $0x334] ss:$8 sps:$4 sm:$0xff]  }
  0x57   : > { %2019 = vmatpush1.bf16.msra.mxu0 %v5098_v31  ;;  %1999 = vmatprep.mubr.bf16.mxu0 %v4370_v33  ;;  %v5127_v31 = vld [vmem:[%s6534_s1 + $0x2d4] ss:$8 sps:$4 sm:$0xff]   ;;  %v645_v33 = vor.u32 %v644_v23, %v641_v22  ;;  %v681_v41 = vshrl.u32 %v4393_v32, 16  ;;  %v684_v42 = vshll.u32 %v4393_v32, 16 }
  0x58   : > { %2020 = vmatprep.subr.bf16.mxu0 %v5103_v34  ;;  %1875 = vmatpush1.bf16.msra.mxu1 %v5190_v61  ;;  %v648_v34 = vshll.u32 %v4388_v20, 16  ;;  %v5232_v61 = vld [vmem:[%s6534_s1 + $0xc0] ss:$8 sps:$4 sm:$0xff]   ;;  %v711_v28 = vrot.slane %v709_v11, 4  ;;  %v4398_v32 = vld [vmem:[%s5430_s26 + $0xf4] sm:$0x1] }
  0x59   : > { %1876 = vmatprep.subr.bf16.mxu1 %v5194_v63  ;;  %v683_v57 = vrot.slane %v681_v41, 4  ;;  %v4371_v63 = vld [vmem:[%s5430_s26 + $0x18] sm:$0xf] }
  0x5a   : > { %v650_v46 = vrot.slane %v648_v34, 5  ;;  %v5142_v34 = vld [vmem:[%s6534_s1 + $0x324] ss:$8 sps:$4 sm:$0xff]  }
  0x5b   : > { %2021 = vmatpush1.bf16.msra.mxu0 %v5101_v44  ;;  %v5130_v44 = vld [vmem:[%s6534_s1 + $0x2e4] ss:$8 sps:$4 sm:$0xff]  }
  0x5c   : > { %2022 = vmatprep.subr.bf16.mxu0 %v5106_v45  ;;  %1877 = vmatpush1.bf16.msra.mxu1 %v5196_v1  ;;  %v646_v45 = vrot.slane %v645_v33, 4  ;;  %v5248_v33 = vld [vmem:[%s6534_s1 + $0xf4] ss:$8 sps:$4 sm:$0xff]  }
  0x5d   : > { %1878 = vmatprep.subr.bf16.mxu1 %v5200_v7 }
  0x5e   : > { %2000 = vmatmul.mubr.bf16.gmra.mrb[12].mxu0 %v4358_v52  ;;  %v5230_v52 = vld [vmem:[%s6534_s1 + $0xc4] ss:$8 sps:$4 sm:$0xff]   ;;  %v651_v5 = vsel %vm5500_vm2, %v646_v45, %v650_v46 }
  0x5f   : > { %2023 = vmatpush1.bf16.msra.mxu0 %v5104_v54  ;;  %2042 = vmatprep.mubr.bf16.mxu0 %v4399_v55  ;;  %v4394_v54 = vld [vmem:[%s5430_s26 + $0xb4] sm:$0x1]  ;;  %v669_v55 = vrot.slane %v667_v39, 4 }
  0x60   : > { %2024 = vmatprep.subr.bf16.mxu0 %v5109_v56  ;;  %1879 = vmatpush1.bf16.msra.mxu1 %v5202_v8  ;;  %v672_v56 = vrot.slane %v670_v40, 5  ;;  %v690_v1 = vshll.u32 %v4394_v54, 16  ;;  %v5140_v54 = vld [vmem:[%s6534_s1 + $0x320] ss:$8 sps:$4 sm:$0xff]  }
  0x61   : > { %1880 = vmatprep.subr.bf16.mxu1 %v5206_v14  ;;  %v5136_v14 = vld [vmem:[%s6534_s1 + $0x304] ss:$8 sps:$4 sm:$0xff]  }
  0x62   : > { %v673_v7 = vor.u32 %v672_v56, %v669_v55  ;;  %v4380_v55 = vcombine.low %v4373_v35, %v4374_v38  ;;  %v5157_v35 = vld [vmem:[%s6534_s1 + $0x374] ss:$8 sps:$4 sm:$0xff]  }
  0x63   : > { %2025 = vmatpush1.bf16.msra.mxu0 %v5107_v58  ;;  %v686_v58 = vrot.slane %v684_v42, 5 }
  0x64   : > { %2026 = vmatprep.subr.bf16.mxu0 %v5112_v59  ;;  %1881 = vmatpush1.bf16.msra.mxu1 %v5208_v15  ;;  %v4395_v59 = vld [vmem:[%s5430_s26 + $0xd0] sm:$0xf]  ;;  %v674_v23 = vrot.slane %v673_v7, 4 }
  0x65   : > { %1882 = vmatprep.subr.bf16.mxu1 %v5212_v24  ;;  %v687_v8 = vor.u32 %v686_v58, %v683_v57  ;;  %v695_v9 = vshrl.u32 %v4395_v59, 16  ;;  %v5238_v15 = vld [vmem:[%s6534_s1 + $0xd0] ss:$8 sps:$4 sm:$0xff]   ;;  %v4345_v58 = vld [vmem:[%s5430_s26 + $0x48] sm:$0xf] }
  0x67   : > { %2027 = vmatpush1.bf16.msra.mxu0 %v5110_v62  ;;  %v5131_v62 = vld [vmem:[%s6534_s1 + $0x2f0] ss:$8 sps:$4 sm:$0xff]   ;;  %v688_v24 = vrot.slane %v687_v8, 4  ;;  %v697_v26 = vrot.slane %v695_v9, 4  ;;  %v298_v9 = vld [vmem:[%s5430_s26 + $0x40] sm:$0xf] }
  0x68   : > { %2028 = vmatprep.subr.bf16.mxu0 %v5115_v0  ;;  %1883 = vmatpush1.bf16.msra.mxu1 %v5214_v25  ;;  %v676_v0 = vshll.u32 %v4392_v51, 16  ;;  %v4396_v25 = vld [vmem:[%s5430_s26 + $0xd4] sm:$0x1]  ;;  %v296_v51 = vld [vmem:[%s5430_s26] sm:$0xf] }
  0x69   : > { %1884 = vmatprep.subr.bf16.mxu1 %v5218_v29  ;;  %v714_v29 = vrot.slane %v712_v13, 5  ;;  %v704_v41 = vshll.u32 %v4396_v25, 16  ;;  %v4347_v13 = vld [vmem:[%s5430_s26 + $0x88] sm:$0xf] }
  0x6a   : > { %v678_v17 = vrot.slane %v676_v0, 5  ;;  %v4416_v25 = vld [vmem:[%s5430_s26 + $0x48] sm:$0xf] }
  0x6b   : > { %2029 = vmatpush1.bf16.msra.mxu0 %v5113_v2  ;;  %v5236_v2 = vld [vmem:[%s6534_s1 + $0xd4] ss:$8 sps:$4 sm:$0xff]   ;;  %v715_v46 = vor.u32 %v714_v29, %v711_v28  ;;  %v706_v57 = vrot.slane %v704_v41, 5  ;;  %v300_v28 = vld [vmem:[%s5430_s26 + $0x80] sm:$0xf] }
  0x6c   : > { %2030 = vmatprep.subr.bf16.mxu0 %v5118_v3  ;;  %1885 = vmatpush1.bf16.msra.mxu1 %v5220_v36  ;;  %v4372_v3 = vld [vmem:[%s5430_s26 + $0x38] sm:$0xf]  ;;  %v4343_v36 = vld [vmem:[%s5430_s26 + $0x8] sm:$0xf]  ;;  %v679_v39 = vsel %vm5500_vm2, %v674_v23, %v678_v17  ;;  %v5151_v17 = vld [vmem:[%s6534_s1 + $0x354] ss:$8 sps:$4 sm:$0xff]  }
  0x6d   : > { %1886 = vmatprep.subr.bf16.mxu1 %v5224_v43  ;;  %v4379_v20 = vcombine.low %v4371_v63, %v4372_v3  ;;  %v4375_v3 = vld [vmem:[%s5430_s26 + $0x98] sm:$0xf]  ;;  %v301_v29 = vld [vmem:[%s5430_s26 + $0xa0] sm:$0xf]  ;;  %v5276_v43 = vld [vmem:[%s6536_s3 + $0xd0] sm:$0xff]  }
  0x6e   : > { %v4378_v23 = vld [vmem:[%s5430_s26 + $0xf8] sm:$0xf]  ;;  %v4341_v38 = vcombine.low %v300_v28, %v301_v29 }
  0x6f   : > { %2031 = vmatpush1.bf16.msra.mxu0 %v5116_v6  ;;  %v665_v6 = vsel %vm5500_vm2, %v660_v50, %v664_v47  ;;  %v718_v47 = vshll.u32 %v4398_v32, 16  ;;  %v261_v50 = vld [vmem:[#allocation2 + $0x48] sm:$0x1] }
  0x70   : > { %2032 = vmatprep.subr.bf16.mxu0 %v5121_v10  ;;  %1887 = vmatpush1.bf16.msra.mxu1 %v5226_v48  ;;  %v698_v10 = vshll.u32 %v4395_v59, 16  ;;  %v4400_v22 = vcombine.low %v651_v5, %v665_v6  ;;  %v5250_v48 = vld [vmem:[%s6534_s1 + $0xf0] ss:$8 sps:$4 sm:$0xff]   ;;  %v4346_v59 = vld [vmem:[%s5430_s26 + $0x68] sm:$0xf] }
  0x71   : > { %1888 = vmatprep.subr.bf16.mxu1 %v5230_v52  ;;  %v297_v52 = vld [vmem:[%s5430_s26 + $0x20] sm:$0xf]  ;;  %v720_v63 = vrot.slane %v718_v47, 5  ;;  %v4376_v5 = vld [vmem:[%s5430_s26 + $0xb8] sm:$0xf] }
  0x72   : > { %v700_v27 = vrot.slane %v698_v10, 5  ;;  %v4339_v0 = vcombine.low %v296_v51, %v297_v52  ;;  %v5148_v6 = vld [vmem:[%s6534_s1 + $0x344] ss:$8 sps:$4 sm:$0xff]   ;;  %v299_v10 = vld [vmem:[%s5430_s26 + $0x60] sm:$0xf]  ;;  %v4381_v11 = vcombine.low %v4375_v3, %v4376_v5 }
  0x73   : > { %2033 = vmatpush1.bf16.msra.mxu0 %v5119_v18  ;;  %v692_v18 = vrot.slane %v690_v1, 5  ;;  %v4352_v1 = vcombine.low %v4345_v58, %v4346_v59  ;;  %v4350_v32 = vld [vmem:[%s5430_s26 + $0xe8] sm:$0xf]  ;;  %v303_v47 = vld [vmem:[%s5430_s26 + $0xe0] sm:$0xf] }
  0x74   : > { %2034 = vmatprep.subr.bf16.mxu0 %v5124_v19  ;;  %1889 = vmatpush1.bf16.msra.mxu1 %v5232_v61  ;;  %v5242_v19 = vld [vmem:[%s6534_s1 + $0xe4] ss:$8 sps:$4 sm:$0xff]   ;;  %v701_v45 = vor.u32 %v700_v27, %v697_v26  ;;  %v5833_v26 = vld [vmem:[%s5430_s26 + $0x20] sm:$0xf]  ;;  %v5191_v58 = vld [vmem:[%s6534_s1 + $0x3d0] ss:$8 sps:$4 sm:$0xff]  }
  0x75   : > { %1890 = vmatprep.subr.bf16.mxu1 %v5236_v2  ;;  %v693_v40 = vsel %vm5500_vm2, %v688_v24, %v692_v18  ;;  %v5143_v2 = vld [vmem:[%s6534_s1 + $0x330] ss:$8 sps:$4 sm:$0xff]   ;;  %v4340_v18 = vcombine.low %v298_v9, %v299_v10  ;;  %v4415_v24 = vld [vmem:[%s5430_s26 + $0x28] sm:$0xf]  ;;  %v5836_v27 = vld [vmem:[%s5430_s26 + $0x40] sm:$0xf] }
  0x76   : > { %v4401_v56 = vcombine.low %v679_v39, %v693_v40  ;;  %v702_v61 = vrot.slane %v701_v45, 4  ;;  %v5155_v39 = vld [vmem:[%s6534_s1 + $0x370] ss:$8 sps:$4 sm:$0xff]   ;;  %v847_v40 = vshrl.u32 %v5836_v27, 16  ;;  %v850_v41 = vshll.u32 %v5836_v27, 16 }
  0x77   : > { %2035 = vmatpush1.bf16.msra.mxu0 %v5122_v30  ;;  %v5244_v30 = vld [vmem:[%s6534_s1 + $0xe0] ss:$8 sps:$4 sm:$0xff]   ;;  %v5175_v51 = vld [vmem:[%s6534_s1 + $0x3a4] ss:$8 sps:$4 sm:$0xff]   ;;  %v5215_v9 = vld [vmem:[%s6534_s1 + $0x410] ss:$8 sps:$4 sm:$0xff]  }
  0x78   : > { %2036 = vmatprep.subr.bf16.mxu0 %v5127_v31  ;;  %1891 = vmatpush1.bf16.msra.mxu1 %v5238_v15  ;;  %v5137_v31 = vld [vmem:[%s6534_s1 + $0x310] ss:$8 sps:$4 sm:$0xff]   ;;  %v707_v7 = vsel %vm5500_vm2, %v702_v61, %v706_v57  ;;  %v5146_v15 = vld [vmem:[%s6534_s1 + $0x340] ss:$8 sps:$4 sm:$0xff]   ;;  %v5193_v57 = vld [vmem:[%s6534_s1 + $0x3d4] ss:$8 sps:$4 sm:$0xff]  }
  0x79   : > { %1892 = vmatprep.subr.bf16.mxu1 %v5242_v19  ;;  %v302_v45 = vld [vmem:[%s5430_s26 + $0xc0] sm:$0xf]  ;;  %v5199_v59 = vld [vmem:[%s6534_s1 + $0x3e4] ss:$8 sps:$4 sm:$0xff]   ;;  %v5205_v61 = vld [vmem:[%s6534_s1 + $0x3f4] ss:$8 sps:$4 sm:$0xff]  }
  0x7a   : > { %v5173_v52 = vld [vmem:[%s6534_s1 + $0x3a0] ss:$8 sps:$4 sm:$0xff]  }
  0x7b   : > { %2037 = vmatpush1.bf16.msra.mxu0 %v5125_v37  ;;  %v4344_v37 = vld [vmem:[%s5430_s26 + $0x28] sm:$0xf]  ;;  %v4405_v10 = vld [vmem:[%s5430_s26 + $0x60] sm:$0xf] }
  0x7c   : > { %2038 = vmatprep.subr.bf16.mxu0 %v5130_v44  ;;  %v4351_v42 = vcombine.low %v4343_v36, %v4344_v37  ;;  %v234_v44 = vld [vmem:[#allocation2] sm:$0x1]  ;;  %1893 = vmatpush1.bf16.msra.mxu1 %v5244_v30  ;;  %v833_v36 = vshrl.u32 %v5833_v26, 16  ;;  %v836_v37 = vshll.u32 %v5833_v26, 16  ;;  %v4418_v3 = vld [vmem:[%s5430_s26 + $0x88] sm:$0xf] }
  0x7d   : > { %1894 = vmatprep.subr.bf16.mxu1 %v5248_v33  ;;  %v5152_v33 = vld [vmem:[%s6534_s1 + $0x360] ss:$8 sps:$4 sm:$0xff]   ;;  %v5241_v26 = vld [vmem:[%s6534_s1 + $0x454] ss:$8 sps:$4 sm:$0xff]  }
  0x7e   : > { %1896 = vmatprep.mubr.bf16.mxu1 %v4351_v42  ;;  %v5209_v5 = vld [vmem:[%s6534_s1 + $0x400] ss:$8 sps:$4 sm:$0xff]   ;;  %v835_v28 = vrot.slane %v833_v36, 4  ;;  %v838_v29 = vrot.slane %v836_v37, 5 }
  0x7f   : > { %2039 = vmatpush1.bf16.msra.mxu0 %v5128_v49  ;;  %v235_v49 = vsel %vm5779_vm5, 0, %v234_v44  ;;  %v5163_v44 = vld [vmem:[%s6534_s1 + $0x384] ss:$8 sps:$4 sm:$0xff]  }
  0x80   : > { %2040 = vmatprep.subr.bf16.mxu0 %v5133_v53  ;;  %236 = vst [vmem:[#allocation2] sm:$0x1] %v235_v49  ;;  %v262_v53 = vsel %vm5779_vm5, 0, %v261_v50  ;;  %1895 = vmatpush1.bf16.msra.mxu1 %v5250_v48  ;;  %v5169_v48 = vld [vmem:[%s6534_s1 + $0x394] ss:$8 sps:$4 sm:$0xff]   ;;  %v4342_v49 = vcombine.low %v302_v45, %v303_v47  ;;  %v839_v27 = vor.u32 %v838_v29, %v835_v28 }
  0x81   : > { %263 = vst [vmem:[#allocation2 + $0x48] sm:$0x1] %v262_v53  ;;  %v5167_v50 = vld [vmem:[%s6534_s1 + $0x390] ss:$8 sps:$4 sm:$0xff]   ;;  %v5181_v53 = vld [vmem:[%s6534_s1 + $0x3b4] ss:$8 sps:$4 sm:$0xff]  }
  0x82   : > { %v5239_v47 = vld [vmem:[%s6534_s1 + $0x450] ss:$8 sps:$4 sm:$0xff]   ;;  %v4439_v28 = vld [vmem:[%s5430_s26 + $0xe0] sm:$0xf] }
  0x83   : > { %2041 = vmatpush1.bf16.msra.mxu0 %v5131_v62  ;;  %v716_v62 = vrot.slane %v715_v46, 4  ;;  %1897 = vmatmul.mubr.bf16.vlgmr.msra.gmra.mrb[0].mxu1 %v4339_v0  ;;  %v5161_v46 = vld [vmem:[%s6534_s1 + $0x380] ss:$8 sps:$4 sm:$0xff]  }
  0x84   : > { %2083 = vmatprep.subr.bf16.mxu0 %v5136_v14  ;;  %1906 = vmatprep.mubr.bf16.mxu1 %v4352_v1  ;;  %v4348_v14 = vld [vmem:[%s5430_s26 + $0xa8] sm:$0xf]  ;;  %v4404_v0 = vld [vmem:[%s5430_s26 + $0x40] sm:$0xf]  ;;  %v5211_v1 = vld [vmem:[%s6534_s1 + $0x404] ss:$8 sps:$4 sm:$0xff]  }
  0x85   : > { %v721_v8 = vsel %vm5500_vm2, %v716_v62, %v720_v63  ;;  %v4353_v19 = vcombine.low %v4347_v13, %v4348_v14  ;;  %v5203_v62 = vld [vmem:[%s6534_s1 + $0x3f0] ss:$8 sps:$4 sm:$0xff]   ;;  %v4403_v63 = vld [vmem:[%s5430_s26 + $0x20] sm:$0xf]  ;;  %v5223_v13 = vld [vmem:[%s6534_s1 + $0x424] ss:$8 sps:$4 sm:$0xff]  }
  0x86   : > { %2043 = vmatmul.mubr.bf16.vlgmr.msra.gmra.mrb[0].mxu0 %v4379_v20  ;;  %v5149_v20 = vld [vmem:[%s6534_s1 + $0x350] ss:$8 sps:$4 sm:$0xff]   ;;  %v4419_v14 = vld [vmem:[%s5430_s26 + $0xa8] sm:$0xf] }
  0x87   : > { %2084 = vmatpush1.bf16.msra.mxu0 %v5134_v16  ;;  %2052 = vmatprep.mubr.bf16.mxu0 %v4400_v22  ;;  %v4402_v16 = vcombine.low %v707_v7, %v721_v8  ;;  %v4377_v22 = vld [vmem:[%s5430_s26 + $0xd8] sm:$0xf]  ;;  %v5217_v7 = vld [vmem:[%s6534_s1 + $0x414] ss:$8 sps:$4 sm:$0xff]  }
  0x88   : > { %2085 = vmatprep.subr.bf16.mxu0 %v5139_v21  ;;  %v5154_v21 = vld [vmem:[%s6534_s1 + $0x364] ss:$8 sps:$4 sm:$0xff]   ;;  %v4382_v30 = vcombine.low %v4377_v22, %v4378_v23  ;;  %v4408_v22 = vld [vmem:[%s5430_s26 + $0xc0] sm:$0xf] }
  0x89   : > { %v5235_v23 = vld [vmem:[%s6534_s1 + $0x444] ss:$8 sps:$4 sm:$0xff]  }
  0x8b   : > { %2086 = vmatpush1.bf16.msra.mxu0 %v5137_v31  ;;  %1907 = vmatmul.mubr.bf16.gmra.mrb[4].mxu1 %v4340_v18  ;;  %v4349_v31 = vld [vmem:[%s5430_s26 + $0xc8] sm:$0xf]  ;;  %v5229_v18 = vld [vmem:[%s6534_s1 + $0x434] ss:$8 sps:$4 sm:$0xff]  }
  0x8c   : > { %2087 = vmatprep.subr.bf16.mxu0 %v5142_v34  ;;  %1916 = vmatprep.mubr.bf16.mxu1 %v4353_v19  ;;  %v4423_v34 = vcombine.low %v4415_v24, %v4416_v25  ;;  %v4354_v42 = vcombine.low %v4349_v31, %v4350_v32  ;;  %v4421_v24 = vld [vmem:[%s5430_s26 + $0xe8] sm:$0xf]  ;;  %v852_v31 = vrot.slane %v850_v41, 5  ;;  %v4428_v32 = vld [vmem:[%s5430_s26 + $0x24] sm:$0x1] }
  0x8d   : > { %v4422_v25 = vld [vmem:[%s5430_s26 + $0x108] sm:$0xf]  ;;  %v842_v37 = vshll.u32 %v4428_v32, 16 }
  0x8e   : > { %2053 = vmatmul.mubr.bf16.gmra.mrb[4].mxu0 %v4380_v55  ;;  %v5187_v55 = vld [vmem:[%s6534_s1 + $0x3c4] ss:$8 sps:$4 sm:$0xff]   ;;  %v4426_v36 = vcombine.low %v4421_v24, %v4422_v25 }
  0x8f   : > { %2088 = vmatpush1.bf16.msra.mxu0 %v5140_v54  ;;  %2062 = vmatprep.mubr.bf16.mxu0 %v4401_v56  ;;  %v5179_v54 = vld [vmem:[%s6534_s1 + $0x3b0] ss:$8 sps:$4 sm:$0xff]   ;;  %v5185_v56 = vld [vmem:[%s6534_s1 + $0x3c0] ss:$8 sps:$4 sm:$0xff]  }
  0x90   : > { %2089 = vmatprep.subr.bf16.mxu0 %v5145_v60  ;;  %v5197_v60 = vld [vmem:[%s6534_s1 + $0x3e0] ss:$8 sps:$4 sm:$0xff]  }
  0x93   : > { %2090 = vmatpush1.bf16.msra.mxu0 %v5143_v2  ;;  %1917 = vmatmul.mubr.bf16.gmra.mrb[8].mxu1 %v4341_v38  ;;  %v4417_v2 = vld [vmem:[%s5430_s26 + $0x68] sm:$0xf]  ;;  %v4433_v38 = vld [vmem:[%s5430_s26 + $0x80] sm:$0xf] }
  0x94   : > { %2091 = vmatprep.subr.bf16.mxu0 %v5148_v6  ;;  %1926 = vmatprep.mubr.bf16.mxu1 %v4354_v42  ;;  %v4411_v6 = vcombine.low %v4403_v63, %v4404_v0  ;;  %v4424_v8 = vcombine.low %v4417_v2, %v4418_v3  ;;  %v875_v45 = vshrl.u32 %v4433_v38, 16  ;;  %v4435_v63 = vld [vmem:[%s5430_s26 + $0xa0] sm:$0xf] }
  0x95   : > { %v4437_v0 = vld [vmem:[%s5430_s26 + $0xc0] sm:$0xf] }
  0x96   : > { %2063 = vmatmul.mubr.bf16.gmra.mrb[8].mxu0 %v4381_v11  ;;  %v4406_v11 = vld [vmem:[%s5430_s26 + $0x80] sm:$0xf] }
  0x97   : > { %2092 = vmatpush1.bf16.msra.mxu0 %v5146_v15  ;;  %2072 = vmatprep.mubr.bf16.mxu0 %v4402_v16  ;;  %v4420_v15 = vld [vmem:[%s5430_s26 + $0xc8] sm:$0xf] }
  0x98   : > { %2093 = vmatprep.subr.bf16.mxu0 %v5151_v17  ;;  %v5221_v16 = vld [vmem:[%s6534_s1 + $0x420] ss:$8 sps:$4 sm:$0xff]   ;;  %v4412_v17 = vcombine.low %v4405_v10, %v4406_v11  ;;  %v4425_v19 = vcombine.low %v4419_v14, %v4420_v15  ;;  %v892_v10 = vshll.u32 %v4435_v63, 16  ;;  %v903_v11 = vshrl.u32 %v4437_v0, 16  ;;  %v5251_v14 = vld [vmem:[%s6534_s1 + $0x470] ss:$8 sps:$4 sm:$0xff]  }
  0x9a   : > { %v905_v24 = vrot.slane %v903_v11, 4 }
  0x9b   : > { %2094 = vmatpush1.bf16.msra.mxu0 %v5149_v20  ;;  %1927 = vmatmul.mubr.bf16.gmra.mrb[12].mxu1 %v4342_v49  ;;  %v5227_v20 = vld [vmem:[%s6534_s1 + $0x430] ss:$8 sps:$4 sm:$0xff]   ;;  %v4410_v49 = vld [vmem:[%s5430_s26 + $0x100] sm:$0xf] }
  0x9c   : > { %2095 = vmatprep.subr.bf16.mxu0 %v5154_v21  ;;  %v4407_v21 = vld [vmem:[%s5430_s26 + $0xa0] sm:$0xf] }
  0x9e   : > { %2073 = vmatmul.mubr.bf16.gmra.mrb[12].mxu0 %v4382_v30  ;;  %v849_v30 = vrot.slane %v847_v40, 4 }
  0x9f   : > { %2096 = vmatpush1.bf16.msra.mxu0 %v5152_v33  ;;  %2115 = vmatprep.mubr.bf16.mxu0 %v4423_v34  ;;  %v4430_v33 = vld [vmem:[%s5430_s26 + $0x44] sm:$0x1]  ;;  %v4413_v34 = vcombine.low %v4407_v21, %v4408_v22 }
  0xa0   : > { %2097 = vmatprep.subr.bf16.mxu0 %v5157_v35  ;;  %v4431_v35 = vld [vmem:[%s5430_s26 + $0x60] sm:$0xf]  ;;  %v853_v40 = vor.u32 %v852_v31, %v849_v30  ;;  %v856_v41 = vshll.u32 %v4430_v33, 16  ;;  %v4438_v21 = vld [vmem:[%s5430_s26 + $0xc4] sm:$0x1] }
  0xa1   : > { %v861_v42 = vshrl.u32 %v4431_v35, 16  ;;  %v912_v30 = vshll.u32 %v4438_v21, 16  ;;  %v4441_v31 = vld [vmem:[%s5430_s26 + $0x100] sm:$0xf]  ;;  %v5258_v21 = vld [vmem:[%s6536_s3 + $0x50] sm:$0xff]  }
  0xa3   : > { %2098 = vmatpush1.bf16.msra.mxu0 %v5155_v39  ;;  %v5233_v39 = vld [vmem:[%s6534_s1 + $0x440] ss:$8 sps:$4 sm:$0xff]  }
  0xa4   : > { %2099 = vmatprep.subr.bf16.mxu0 %v5163_v44  ;;  %v864_v44 = vshll.u32 %v4431_v35, 16  ;;  %v269_v35 = vld [vmem:[#allocation2 + $0xc] sm:$0x1] }
  0xa7   : > { %2100 = vmatpush1.bf16.msra.mxu0 %v5161_v46  ;;  %v878_v46 = vshll.u32 %v4433_v38, 16 }
  0xa8   : > { %2101 = vmatprep.subr.bf16.mxu0 %v5169_v48  ;;  %v4409_v48 = vld [vmem:[%s5430_s26 + $0xe0] sm:$0xf] }
  0xab   : > { %2102 = vmatpush1.bf16.msra.mxu0 %v5167_v50  ;;  %v5247_v50 = vld [vmem:[%s6534_s1 + $0x464] ss:$8 sps:$4 sm:$0xff]  }
  0xac   : > { %2103 = vmatprep.subr.bf16.mxu0 %v5175_v51  ;;  %v840_v51 = vrot.slane %v839_v27, 4 }
  0xaf   : > { %2104 = vmatpush1.bf16.msra.mxu0 %v5173_v52  ;;  %v844_v52 = vrot.slane %v842_v37, 5  ;;  %v920_v37 = vshll.u32 %v4439_v28, 16 }
  0xb0   : > { %2105 = vmatprep.subr.bf16.mxu0 %v5181_v53  ;;  %v854_v53 = vrot.slane %v853_v40, 4  ;;  %v931_v40 = vshrl.u32 %v4441_v31, 16 }
  0xb3   : > { %2106 = vmatpush1.bf16.msra.mxu0 %v5179_v54  ;;  %v858_v54 = vrot.slane %v856_v41, 5  ;;  %v934_v41 = vshll.u32 %v4441_v31, 16  ;;  %v278_v31 = vld [vmem:[#allocation2 + $0x24] sm:$0x1] }
  0xb4   : > { %2107 = vmatprep.subr.bf16.mxu0 %v5187_v55  ;;  %v4432_v55 = vld [vmem:[%s5430_s26 + $0x64] sm:$0x1] }
  0xb5   : > { %v870_v2 = vshll.u32 %v4432_v55, 16 }
  0xb7   : > { %2108 = vmatpush1.bf16.msra.mxu0 %v5185_v56  ;;  %v4434_v56 = vld [vmem:[%s5430_s26 + $0x84] sm:$0x1]  ;;  %v872_v15 = vrot.slane %v870_v2, 5 }
  0xb8   : > { %2109 = vmatprep.subr.bf16.mxu0 %v5193_v57  ;;  %v863_v57 = vrot.slane %v861_v42, 4  ;;  %v884_v3 = vshll.u32 %v4434_v56, 16  ;;  %v270_v42 = vsel %vm6000_vm7, 0, %v269_v35  ;;  %v266_v35 = vld [vmem:[#allocation2 + $0x4] sm:$0x1] }
  0xb9   : > { %271 = vst [vmem:[#allocation2 + $0xc] sm:$0x1] %v270_v42  ;;  %v5264_v42 = vld [vmem:[%s6536_s3 + $0x68] sm:$0xff]  }
  0xbb   : > { %2110 = vmatpush1.bf16.msra.mxu0 %v5191_v58  ;;  %v866_v58 = vrot.slane %v864_v44, 5 }
  0xbc   : > { %2111 = vmatprep.subr.bf16.mxu0 %v5199_v59  ;;  %v877_v59 = vrot.slane %v875_v45, 4 }
  0xbf   : > { %2112 = vmatpush1.bf16.msra.mxu0 %v5197_v60  ;;  %v880_v60 = vrot.slane %v878_v46, 5 }
  0xc0   : > { %2113 = vmatprep.subr.bf16.mxu0 %v5205_v61  ;;  %v4414_v61 = vcombine.low %v4409_v48, %v4410_v49  ;;  %v914_v48 = vrot.slane %v912_v30, 5  ;;  %v4440_v49 = vld [vmem:[%s5430_s26 + $0xe4] sm:$0x1] }
  0xc1   : > { %v926_v55 = vshll.u32 %v4440_v49, 16  ;;  %v5266_v49 = vld [vmem:[%s6536_s3 + $0x70] sm:$0xff]  }
  0xc3   : > { %2114 = vmatpush1.bf16.msra.mxu0 %v5203_v62  ;;  %v5245_v62 = vld [vmem:[%s6534_s1 + $0x460] ss:$8 sps:$4 sm:$0xff]  }
  0xc4   : > { %2156 = vmatprep.subr.bf16.mxu0 %v5211_v1  ;;  %v5253_v1 = vld [vmem:[%s6534_s1 + $0x474] ss:$8 sps:$4 sm:$0xff]  }
  0xc6   : > { %2116 = vmatmul.mubr.bf16.vlgmr.msra.gmra.mrb[0].mxu0 %v4411_v6  ;;  %v859_v6 = vsel %vm5500_vm2, %v854_v53, %v858_v54  ;;  %v933_v53 = vrot.slane %v931_v40, 4  ;;  %v936_v54 = vrot.slane %v934_v41, 5 }
  0xc7   : > { %2157 = vmatpush1.bf16.msra.mxu0 %v5209_v5  ;;  %2125 = vmatprep.mubr.bf16.mxu0 %v4424_v8  ;;  %v845_v5 = vsel %vm5500_vm2, %v840_v51, %v844_v52  ;;  %v881_v8 = vor.u32 %v880_v60, %v877_v59  ;;  %v922_v52 = vrot.slane %v920_v37, 5  ;;  %v281_v37 = vld [vmem:[#allocation2 + $0x2c] sm:$0x1] }
  0xc8   : > { %2158 = vmatprep.subr.bf16.mxu0 %v5217_v7  ;;  %v867_v7 = vor.u32 %v866_v58, %v863_v57  ;;  %v937_v60 = vor.u32 %v936_v54, %v933_v53  ;;  %v282_v41 = vsel %vm6000_vm7, 0, %v281_v37 }
  0xc9   : > { %283 = vst [vmem:[#allocation2 + $0x2c] sm:$0x1] %v282_v41 }
  0xcb   : > { %2159 = vmatpush1.bf16.msra.mxu0 %v5215_v9  ;;  %v889_v9 = vshrl.u32 %v4435_v63, 16  ;;  %v928_v63 = vrot.slane %v926_v55, 5  ;;  %v5268_v55 = vld [vmem:[%s6536_s3 + $0x78] sm:$0xff]  }
  0xcc   : > { %2160 = vmatprep.subr.bf16.mxu0 %v5223_v13  ;;  %v906_v13 = vshll.u32 %v4437_v0, 16  ;;  %v938_v0 = vrot.slane %v937_v60, 4 }
  0xcd   : > { %v891_v22 = vrot.slane %v889_v9, 4 }
  0xce   : > { %2126 = vmatmul.mubr.bf16.gmra.mrb[4].mxu0 %v4412_v17  ;;  %v4443_v17 = vcombine.low %v845_v5, %v859_v6  ;;  %v908_v25 = vrot.slane %v906_v13, 5  ;;  %v2231_v6 = vlaneseq  ;;  %v5254_v13 = vld [vmem:[%s6536_s3 + $0x40] sm:$0xff]  }
  0xcf   : > { %2161 = vmatpush1.bf16.msra.mxu0 %v5221_v16  ;;  %2135 = vmatprep.mubr.bf16.mxu0 %v4425_v19  ;;  %v886_v16 = vrot.slane %v884_v3, 5  ;;  %v882_v19 = vrot.slane %v881_v8, 4  ;;  %v6024_v8 = vld [vmem:[%s6535_s2] ss:$2 sm:$0x3] }
  0xd0   : > { %2162 = vmatprep.subr.bf16.mxu0 %v5229_v18  ;;  %v868_v18 = vrot.slane %v867_v7, 4  ;;  %v6019_v7 = vshrl.u32 %v2231_v6, 7  ;;  %4768 = vmatprep.subr.bf16.mxu1 %v5254_v13 }
  0xd1   : > { %v887_v33 = vsel %vm5500_vm2, %v882_v19, %v886_v16  ;;  %v272_v16 = vld [vmem:[#allocation2 + $0x14] sm:$0x1] }
  0xd2   : > { %v873_v32 = vsel %vm5500_vm2, %v868_v18, %v872_v15  ;;  %v2237_v9 = vsub.s32 1, %v6019_v7  ;;  %v240_v15 = vld [vmem:[#allocation2 + $0x10] sm:$0x1]  ;;  %v273_v19 = vsel %vm6000_vm7, 0, %v272_v16 }
  0xd3   : > { %2163 = vmatpush1.bf16.msra.mxu0 %v5227_v20  ;;  %v4436_v20 = vld [vmem:[%s5430_s26 + $0xa4] sm:$0x1]  ;;  %v4444_v45 = vcombine.low %v873_v32, %v887_v33  ;;  %v241_v18 = vsel %vm5779_vm5, 0, %v240_v15  ;;  %274 = vst [vmem:[#allocation2 + $0x14] sm:$0x1] %v273_v19  ;;  %v5260_v32 = vld [vmem:[%s6536_s3 + $0x58] sm:$0xff]  }
  0xd4   : > { %2164 = vmatprep.subr.bf16.mxu0 %v5235_v23  ;;  %v894_v23 = vrot.slane %v892_v10, 5  ;;  %v898_v29 = vshll.u32 %v4436_v20, 16  ;;  %v6033_v10 = vrot.slane %v6024_v8, %v2237_v9  ;;  %v5257_v20 = vld [vmem:[%s6536_s3 + $0x8] sm:$0xff]   ;;  %242 = vst [vmem:[#allocation2 + $0x10] sm:$0x1] %v241_v18  ;;  %v5261_v33 = vld [vmem:[%s6536_s3 + $0x18] sm:$0xff]  }
  0xd6   : > { %2136 = vmatmul.mubr.bf16.gmra.mrb[8].mxu0 %v4413_v34  ;;  %v237_v34 = vld [vmem:[#allocation2 + $0x8] sm:$0x1]  ;;  %v895_v38 = vor.u32 %v894_v23, %v891_v22  ;;  %v900_v44 = vrot.slane %v898_v29, 5  ;;  %v5259_v22 = vld [vmem:[%s6536_s3 + $0x10] sm:$0xff]   ;;  %v243_v23 = vld [vmem:[#allocation2 + $0x18] sm:$0x1] }
  0xd7   : > { %2165 = vmatpush1.bf16.msra.mxu0 %v5233_v39  ;;  %2145 = vmatprep.mubr.bf16.mxu0 %v4426_v36  ;;  %v909_v39 = vor.u32 %v908_v25, %v905_v24  ;;  %v917_v36 = vshrl.u32 %v4439_v28, 16  ;;  %v244_v24 = vsel %vm5779_vm5, 0, %v243_v23  ;;  %v275_v25 = vld [vmem:[#allocation2 + $0x1c] sm:$0x1]  ;;  %v246_v29 = vld [vmem:[#allocation2 + $0x20] sm:$0x1] }
  0xd8   : > { %2166 = vmatprep.subr.bf16.mxu0 %v5241_v26  ;;  %v238_v26 = vsel %vm5779_vm5, 0, %v237_v34  ;;  %v896_v46 = vrot.slane %v895_v38, 4  ;;  %245 = vst [vmem:[#allocation2 + $0x18] sm:$0x1] %v244_v24  ;;  %v276_v28 = vsel %vm6000_vm7, 0, %v275_v25  ;;  %v247_v30 = vsel %vm5779_vm5, 0, %v246_v29 }
  0xd9   : > { %239 = vst [vmem:[#allocation2 + $0x8] sm:$0x1] %v238_v26  ;;  %v919_v51 = vrot.slane %v917_v36, 4  ;;  %277 = vst [vmem:[#allocation2 + $0x1c] sm:$0x1] %v276_v28  ;;  %v279_v34 = vsel %vm6000_vm7, 0, %v278_v31 }
  0xda   : > { %v901_v57 = vsel %vm5500_vm2, %v896_v46, %v900_v44  ;;  %248 = vst [vmem:[#allocation2 + $0x20] sm:$0x1] %v247_v30  ;;  %280 = vst [vmem:[#allocation2 + $0x24] sm:$0x1] %v279_v34  ;;  %v267_v38 = vsel %vm6000_vm7, 0, %v266_v35  ;;  %v5263_v36 = vld [vmem:[%s6536_s3 + $0x20] sm:$0xff]  }
  0xdb   : > { %2167 = vmatpush1.bf16.msra.mxu0 %v5239_v47  ;;  %v910_v47 = vrot.slane %v909_v39, 4  ;;  %v923_v59 = vor.u32 %v922_v52, %v919_v51  ;;  %v5262_v39 = vld [vmem:[%s6536_s3 + $0x60] sm:$0xff]   ;;  %268 = vst [vmem:[#allocation2 + $0x4] sm:$0x1] %v267_v38  ;;  %v249_v26 = vld [vmem:[#allocation2 + $0x28] sm:$0x1] }
  0xdc   : > { %2168 = vmatprep.subr.bf16.mxu0 %v5247_v50  ;;  %v4442_v50 = vld [vmem:[%s5430_s26 + $0x104] sm:$0x1]  ;;  %v250_v40 = vsel %vm5779_vm5, 0, %v249_v26  ;;  %v252_v44 = vld [vmem:[#allocation2 + $0x30] sm:$0x1] }
  0xdd   : > { %v940_v56 = vshll.u32 %v4442_v50, 16  ;;  %v915_v58 = vsel %vm5500_vm2, %v910_v47, %v914_v48  ;;  %251 = vst [vmem:[#allocation2 + $0x28] sm:$0x1] %v250_v40  ;;  %v253_v46 = vsel %vm5779_vm5, 0, %v252_v44  ;;  %v5265_v48 = vld [vmem:[%s6536_s3 + $0x28] sm:$0xff]   ;;  %v5267_v50 = vld [vmem:[%s6536_s3 + $0x30] sm:$0xff]  }
  0xde   : > { %2146 = vmatmul.mubr.bf16.gmra.mrb[12].mxu0 %v4414_v61  ;;  %v4445_v61 = vcombine.low %v901_v57, %v915_v58  ;;  %254 = vst [vmem:[#allocation2 + $0x30] sm:$0x1] %v253_v46  ;;  %v255_v51 = vld [vmem:[#allocation2 + $0x38] sm:$0x1]  ;;  %v287_v52 = vld [vmem:[#allocation2 + $0x3c] sm:$0x1] }
  0xdf   : > { %2169 = vmatpush1.bf16.msra.mxu0 %v5245_v62  ;;  %2188 = vmatprep.mubr.bf16.mxu0 %v5346_v12  ;;  %v924_v62 = vrot.slane %v923_v59, 4  ;;  %v256_v53 = vsel %vm5779_vm5, 0, %v255_v51  ;;  %v288_v54 = vsel %vm6000_vm7, 0, %v287_v52  ;;  %v290_v57 = vld [vmem:[#allocation2 + $0x44] sm:$0x1]  ;;  %v5269_v58 = vld [vmem:[%s6536_s3 + $0x38] sm:$0xff]  }
  0xe0   : > { %2170 = vmatprep.subr.bf16.mxu0 %v5253_v1  ;;  %v942_v1 = vrot.slane %v940_v56, 5  ;;  %257 = vst [vmem:[#allocation2 + $0x38] sm:$0x1] %v256_v53  ;;  %289 = vst [vmem:[#allocation2 + $0x3c] sm:$0x1] %v288_v54  ;;  %v291_v60 = vsel %vm6000_vm7, 0, %v290_v57 }
  0xe1   : > { %v929_v2 = vsel %vm5500_vm2, %v924_v62, %v928_v63  ;;  %v258_v56 = vld [vmem:[#allocation2 + $0x40] sm:$0x1]  ;;  %292 = vst [vmem:[#allocation2 + $0x44] sm:$0x1] %v291_v60 }
  0xe2   : > { %v943_v3 = vsel %vm5500_vm2, %v938_v0, %v942_v1  ;;  %v259_v59 = vsel %vm5779_vm5, 0, %v258_v56  ;;  %v5271_v1 = vld [vmem:[%s6536_s3 + $0xc0] sm:$0xff]  }
  0xe3   : > { %2171 = vmatpush1.bf16.msra.mxu0 %v5251_v14  ;;  %v4446_v5 = vcombine.low %v929_v2, %v943_v3  ;;  %v5255_v14 = vld [vmem:[%s6536_s3] sm:$0xff]   ;;  %260 = vst [vmem:[#allocation2 + $0x40] sm:$0x1] %v259_v59 }
  0xe4   : > { %4769 = vmatpush3.bf16.msra.mxu1 %v5255_v14  ;;  %v2501_v38 = vld [vmem:[#allocation2] sm:$0xf] }
  0xe5   : > { %v2518_v41 = vshrl.u32 %v2501_v38, 16  ;;  %v2521_v53 = vshll.u32 %v2501_v38, 16 }
  0xe6   : > { %2189 = vmatmul.mubr.bf16.vlgmr.msra.gmra.mrb[0].mxu0 %v4443_v17  ;;  %v5256_v17 = vld [vmem:[%s6536_s3 + $0x48] sm:$0xff]  }
  0xe7   : > { %2198 = vmatprep.mubr.bf16.mxu0 %v5346_v12  ;;  %4770 = vmatprep.subr.bf16.mxu1 %v5256_v17  ;;  %v6158_v57 = vrot.slane %v2518_v41, 4 }
  0xe8   : > { %4771 = vmatpush3.bf16.msra.mxu1 %v5257_v20  ;;  %v293_v20 = vld [vmem:[#allocation2 + $0x4c] sm:$0x1] }
  0xe9   : > { %4772 = vmatprep.subr.bf16.mxu1 %v5258_v21  ;;  %v294_v21 = vsel %vm6000_vm7, 0, %v293_v20 }
  0xea   : > { %295 = vst [vmem:[#allocation2 + $0x4c] sm:$0x1] %v294_v21 }
  0xec   : > { %4773 = vmatpush3.bf16.msra.mxu1 %v5259_v22  ;;  %v2233_v22 = vsub.s32 0, %v6019_v7 }
  0xed   : > { %4774 = vmatprep.subr.bf16.mxu1 %v5260_v32 }
  0xee   : > { %2199 = vmatmul.mubr.bf16.gmra.mrb[4].mxu0 %v4444_v45  ;;  %v284_v45 = vld [vmem:[#allocation2 + $0x34] sm:$0x1]  ;;  %v6139_v23 = vrot.slane %v6024_v8, %v2233_v22 }
  0xef   : > { %2208 = vmatprep.mubr.bf16.mxu0 %v5346_v12  ;;  %v285_v47 = vsel %vm6000_vm7, 0, %v284_v45 }
  0xf0   : > { %4775 = vmatpush3.bf16.msra.mxu1 %v5261_v33  ;;  %286 = vst [vmem:[#allocation2 + $0x34] sm:$0x1] %v285_v47 }
  0xf1   : > { %4776 = vmatprep.subr.bf16.mxu1 %v5262_v39 }
  0xf4   : > { %4777 = vmatpush3.bf16.msra.mxu1 %v5263_v36 }
  0xf5   : > { %4778 = vmatprep.subr.bf16.mxu1 %v5264_v42 }
  0xf6   : > { %2209 = vmatmul.mubr.bf16.gmra.mrb[8].mxu0 %v4445_v61 }
  0xf7   : > { %2218 = vmatprep.mubr.bf16.mxu0 %v5346_v12  ;;  %v6030_v12 = vld [vmem:[%s6535_s2 + $0x1] ss:$2 sm:$0x3] }
  0xf8   : > { %v6036_v11 = vrot.slane %v6030_v12, %v2237_v9  ;;  %4779 = vmatpush3.bf16.msra.mxu1 %v5265_v48  ;;  %v6142_v28 = vrot.slane %v6030_v12, %v2233_v22 }
  0xf9   : > { %4780 = vmatprep.subr.bf16.mxu1 %v5266_v49 }
  0xfc   : > { %4781 = vmatpush3.bf16.msra.mxu1 %v5267_v50 }
  0xfd   : > { %4782 = vmatprep.subr.bf16.mxu1 %v5268_v55 }
  0xfe   : > { %2219 = vmatmul.mubr.bf16.gmra.mrb[12].mxu0 %v4446_v5 }
 0x100   : > { %4783 = vmatpush3.bf16.msra.mxu1 %v5269_v58 }
 0x101   : > { %4808 = vmatprep.subr.bf16.mxu1 %v5271_v1  ;;  %v2412_v1 = vld [vmem:[#allocation2 + $0xc] sm:$0x1] }
 0x156   : > { %v1898_v61 = vpop.f32.mrb[0].mxu1 }
 0x157   : > { %v1900_v62 = vpop.f32.mrb[1].mxu1 }
 0x158   : > { %v1902_v63 = vpop.f32.mrb[2].mxu1 }
 0x159   : > { %v1904_v0 = vpop.f32.mrb[3].mxu1 }
 0x15e   : > { %v1908_v2 = vpop.f32.mrb[4].mxu1 }
 0x15f   : > { %v1910_v3 = vpop.f32.mrb[5].mxu1 }
 0x160   : > { %v1912_v5 = vpop.f32.mrb[6].mxu1 }
 0x161   : > { %v1914_v6 = vpop.f32.mrb[7].mxu1 }
 0x166   : > { %v6119_v9 = vpop.f32.mrb[8].mxu1 }
 0x167   : > { %v6121_v13 = vpop.f32.mrb[9].mxu1 }
 0x168   : > { %v6123_v14 = vpop.f32.mrb[10].mxu1 }
 0x169   : > { %v6125_v15 = vpop.f32.mrb[11].mxu1 }
 0x16e   : > { %v6127_v16 = vpop.f32.mrb[12].mxu1 }
 0x16f   : > { %v6129_v17 = vpop.f32.mrb[13].mxu1 }
 0x170   : > { %v6131_v18 = vpop.f32.mrb[14].mxu1 }
 0x171   : > { %v6133_v19 = vpop.f32.mrb[15].mxu1 }
 0x1b9   : > { %v2190_v24 = vpop.f32.mrb[0].mxu0 }
 0x1ba   : > { %v4964_v25 = vadd.f32 %v2190_v24, %v1898_v61  ;;  %v2192_v29 = vpop.f32.mrb[1].mxu0  ;;  %v2415_v24 = vld [vmem:[#allocation2 + $0x10] sm:$0xf] }
 0x1bb   : > { %v4965_v30 = vadd.f32 %v2192_v29, %v1900_v62  ;;  %v2194_v31 = vpop.f32.mrb[2].mxu0  ;;  %v2502_v62 = vld [vmem:[#allocation2 + $0x4] sm:$0x1]  ;;  %v2418_v29 = vld [vmem:[#allocation2 + $0x14] sm:$0x1] }
 0x1bc   : > { %v2241_v32 = vmul.f32 %v4964_v25, %v6139_v23  ;;  %v4966_v33 = vadd.f32 %v2194_v31, %v1902_v63  ;;  %v2196_v34 = vpop.f32.mrb[3].mxu0  ;;  %v5274_v63 = vld [vmem:[%s6536_s3 + $0x88] sm:$0xff]  }
 0x1bd   : > { %v2242_v27 = vmul.f32 %v4965_v30, %v6033_v10  ;;  %v4967_v35 = vadd.f32 %v2196_v34, %v1904_v0  ;;  %v2409_v0 = vld [vmem:[#allocation2 + $0x8] sm:$0xf]  ;;  %v2527_v34 = vshll.u32 %v2502_v62, 16 }
 0x1be   : > { %v2270_v7 = vadd.f32 %v6142_v28, %v2241_v32  ;;  %v2243_v8 = vmul.f32 %v4966_v33, %v6139_v23  ;;  %v2523_v33 = vrot.slane %v2521_v53, 5 }
 0x1bf   : > { %v6149_v39 = vadd.f32 %v6036_v11, %v2242_v27  ;;  %v2244_v12 = vmul.f32 %v4967_v35, %v6033_v10 }
 0x1c0   : > { %v2286_v36 = vmax.f32 %v2270_v7, 0.0  ;;  %v2272_v26 = vadd.f32 %v6142_v28, %v2243_v8 }
 0x1c1   : > { %v6154_v37 = vadd.f32 %v6036_v11, %v2244_v12  ;;  %v2200_v40 = vpop.f32.mrb[4].mxu0 }
 0x1c2   : > { %v4737_v42 = vpack.c.bf16 %v2286_v36, %v2286_v36  ;;  %v2287_v44 = vmax.f32 %v2272_v26, 0.0  ;;  %v4968_v45 = vadd.f32 %v2200_v40, %v1908_v2  ;;  %v2202_v46 = vpop.f32.mrb[5].mxu0 }
 0x1c3   : > { %v4969_v47 = vadd.f32 %v2202_v46, %v1910_v3  ;;  %v2204_v48 = vpop.f32.mrb[6].mxu0 }
 0x1c4   : > { %v2327_v49 = vshrl.u32 %v4737_v42, 16  ;;  %v4738_v50 = vpack.c.bf16 %v2287_v44, %v2287_v44  ;;  %v2245_v51 = vmul.f32 %v4968_v45, %v6139_v23  ;;  %v2206_v52 = vpop.f32.mrb[7].mxu0  ;;  %v4970_v55 = vadd.f32 %v2204_v48, %v1912_v5 }
 0x1c5   : > { %v2246_v54 = vmul.f32 %v4969_v47, %v6033_v10  ;;  %v4971_v56 = vadd.f32 %v2206_v52, %v1914_v6  ;;  %v2330_v59 = vshll.u32 %v4737_v42, 16  ;;  %v6192_v52 = vrot.slane %v2527_v34, 5 }
 0x1c6   : > { %v2329_v58 = vrot.slane %v2327_v49, 7  ;;  %v2335_v60 = vshrl.u32 %v4738_v50, 16  ;;  %v2274_v61 = vadd.f32 %v6142_v28, %v2245_v51  ;;  %v2338_v2 = vshll.u32 %v4738_v50, 16 }
 0x1c7   : > { %v6168_v3 = vadd.f32 %v6036_v11, %v2246_v54  ;;  %v2247_v5 = vmul.f32 %v4970_v55, %v6139_v23  ;;  %v2248_v6 = vmul.f32 %v4971_v56, %v6033_v10  ;;  %v2421_v56 = vld [vmem:[#allocation2 + $0x18] sm:$0xf] }
 0x1c8   : > { %v2332_v20 = vor.u32 %v2330_v59, %v2329_v58  ;;  %v2333_v21 = vrot.slane %v2329_v58, 4  ;;  %v2337_v22 = vrot.slane %v2335_v60, 7  ;;  %v2288_v25 = vmax.f32 %v2274_v61, 0.0  ;;  %v2424_v58 = vld [vmem:[#allocation2 + $0x1c] sm:$0x1] }
 0x1c9   : > { %v2276_v30 = vadd.f32 %v6142_v28, %v2247_v5  ;;  %v6174_v31 = vadd.f32 %v6036_v11, %v2248_v6  ;;  %v2210_v32 = vpop.f32.mrb[8].mxu0  ;;  %v2430_v6 = vld [vmem:[#allocation2 + $0x24] sm:$0x1] }
 0x1ca   : > { %v2410_v27 = vsel %vm6163_vm9, %v2332_v20, %v2409_v0  ;;  %v2413_v35 = vsel %vm5779_vm5, %v2333_v21, %v2412_v1  ;;  %v2340_v7 = vor.u32 %v2338_v2, %v2337_v22  ;;  %v2341_v8 = vrot.slane %v2337_v22, 4  ;;  %v2212_v38 = vpop.f32.mrb[9].mxu0  ;;  %v2427_v1 = vld [vmem:[#allocation2 + $0x20] sm:$0xf] }
 0x1cb   : > { %2411 = vst [vmem:[#allocation2 + $0x8] sm:$0xf] %v2410_v27  ;;  %2414 = vst [vmem:[#allocation2 + $0xc] sm:$0x1] %v2413_v35  ;;  %v4739_v12 = vpack.c.bf16 %v2288_v25, %v2288_v25  ;;  %v2289_v36 = vmax.f32 %v2276_v30, 0.0  ;;  %v4972_v26 = vadd.f32 %v2210_v32, %v6119_v9  ;;  %v4973_v40 = vadd.f32 %v2212_v38, %v6121_v13  ;;  %v2214_v41 = vpop.f32.mrb[10].mxu0 }
 0x1cc   : > { %v2416_v42 = vsel %vm6163_vm9, %v2340_v7, %v2415_v24  ;;  %v2419_v44 = vsel %vm5779_vm5, %v2341_v8, %v2418_v29  ;;  %v4974_v45 = vadd.f32 %v2214_v41, %v6123_v14  ;;  %v2216_v46 = vpop.f32.mrb[11].mxu0  ;;  %v2524_v9 = vor.u32 %v2523_v33, %v6158_v57 }
 0x1cd   : > { %2417 = vst [vmem:[#allocation2 + $0x10] sm:$0xf] %v2416_v42  ;;  %2420 = vst [vmem:[#allocation2 + $0x14] sm:$0x1] %v2419_v44  ;;  %v2343_v47 = vshrl.u32 %v4739_v12, 16  ;;  %v4740_v48 = vpack.c.bf16 %v2289_v36, %v2289_v36  ;;  %v2249_v49 = vmul.f32 %v4972_v26, %v6139_v23  ;;  %v2250_v13 = vmul.f32 %v4973_v40, %v6033_v10 }
 0x1ce   : > { %v2251_v50 = vmul.f32 %v4974_v45, %v6139_v23  ;;  %v4975_v51 = vadd.f32 %v2216_v46, %v6125_v15  ;;  %v2346_v54 = vshll.u32 %v4739_v12, 16  ;;  %v6204_v25 = vrot.slane %v2524_v9, 4  ;;  %v2433_v46 = vld [vmem:[#allocation2 + $0x28] sm:$0xf] }
 0x1cf   : > { %v2345_v53 = vrot.slane %v2343_v47, 7  ;;  %v2351_v14 = vshrl.u32 %v4740_v48, 16  ;;  %v2278_v55 = vadd.f32 %v6142_v28, %v2249_v49  ;;  %v2354_v59 = vshll.u32 %v4740_v48, 16 }
 0x1d0   : > { %v6196_v60 = vadd.f32 %v6036_v11, %v2250_v13  ;;  %v2280_v57 = vadd.f32 %v6142_v28, %v2251_v50  ;;  %v2252_v61 = vmul.f32 %v4975_v51, %v6033_v10  ;;  %v2436_v13 = vld [vmem:[#allocation2 + $0x2c] sm:$0x1]  ;;  %v2439_v51 = vld [vmem:[#allocation2 + $0x30] sm:$0xf] }
 0x1d1   : > { %v2348_v62 = vor.u32 %v2346_v54, %v2345_v53  ;;  %v2349_v0 = vrot.slane %v2345_v53, 4  ;;  %v2353_v15 = vrot.slane %v2351_v14, 7  ;;  %v2290_v2 = vmax.f32 %v2278_v55, 0.0  ;;  %v2220_v5 = vpop.f32.mrb[12].mxu0  ;;  %v2442_v53 = vld [vmem:[#allocation2 + $0x34] sm:$0x1] }
 0x1d2   : > { %v2291_v20 = vmax.f32 %v2280_v57, 0.0  ;;  %v6201_v21 = vadd.f32 %v6036_v11, %v2252_v61  ;;  %v4976_v22 = vadd.f32 %v2220_v5, %v6127_v16  ;;  %v2222_v24 = vpop.f32.mrb[13].mxu0  ;;  %v2503_v38 = vld [vmem:[#allocation2 + $0x8] sm:$0xf]  ;;  %v2504_v57 = vld [vmem:[#allocation2 + $0xc] sm:$0x1] }
 0x1d3   : > { %v2422_v29 = vsel %vm6163_vm9, %v2348_v62, %v2421_v56  ;;  %v2425_v30 = vsel %vm5779_vm5, %v2349_v0, %v2424_v58  ;;  %v2356_v32 = vor.u32 %v2354_v59, %v2353_v15  ;;  %v2357_v33 = vrot.slane %v2353_v15, 4  ;;  %v2224_v34 = vpop.f32.mrb[14].mxu0 }
 0x1d4   : > { %2423 = vst [vmem:[#allocation2 + $0x18] sm:$0xf] %v2422_v29  ;;  %2426 = vst [vmem:[#allocation2 + $0x1c] sm:$0x1] %v2425_v30  ;;  %v4741_v27 = vpack.c.bf16 %v2290_v2, %v2290_v2  ;;  %v4742_v35 = vpack.c.bf16 %v2291_v20, %v2291_v20  ;;  %v2253_v7 = vmul.f32 %v4976_v22, %v6139_v23  ;;  %v2226_v8 = vpop.f32.mrb[15].mxu0  ;;  %v2532_v50 = vshrl.u32 %v2503_v38, 16 }
 0x1d5   : > { %v4977_v16 = vadd.f32 %v2222_v24, %v6129_v17  ;;  %v2428_v12 = vsel %vm6163_vm9, %v2356_v32, %v2427_v1  ;;  %v2431_v36 = vsel %vm5779_vm5, %v2357_v33, %v2430_v6  ;;  %v4978_v26 = vadd.f32 %v2224_v34, %v6131_v18  ;;  %v2505_v1 = vld [vmem:[#allocation2 + $0x10] sm:$0xf]  ;;  %v2506_v6 = vld [vmem:[#allocation2 + $0x14] sm:$0x1]  ;;  %v2445_v34 = vld [vmem:[#allocation2 + $0x38] sm:$0xf] }
 0x1d6   : > { %v4979_v40 = vadd.f32 %v2226_v8, %v6133_v19  ;;  %2429 = vst [vmem:[#allocation2 + $0x20] sm:$0xf] %v2428_v12  ;;  %2432 = vst [vmem:[#allocation2 + $0x24] sm:$0x1] %v2431_v36  ;;  %v2359_v41 = vshrl.u32 %v4741_v27, 16  ;;  %v2362_v42 = vshll.u32 %v4741_v27, 16  ;;  %v2282_v17 = vadd.f32 %v6142_v28, %v2253_v7 }
 0x1d7   : > { %v2367_v44 = vshrl.u32 %v4742_v35, 16  ;;  %v2370_v45 = vshll.u32 %v4742_v35, 16  ;;  %v2254_v47 = vmul.f32 %v4977_v16, %v6033_v10  ;;  %v2255_v48 = vmul.f32 %v4978_v26, %v6139_v23  ;;  %v2448_v27 = vld [vmem:[#allocation2 + $0x3c] sm:$0x1] }
 0x1d8   : > { %v2256_v49 = vmul.f32 %v4979_v40, %v6033_v10  ;;  %v2361_v9 = vrot.slane %v2359_v41, 7  ;;  %v2535_v19 = vshll.u32 %v2503_v38, 16  ;;  %v2292_v54 = vmax.f32 %v2282_v17, 0.0  ;;  %v2454_v17 = vld [vmem:[#allocation2 + $0x44] sm:$0x1] }
 0x1d9   : > { %v2369_v18 = vrot.slane %v2367_v44, 7  ;;  %v6223_v14 = vadd.f32 %v6036_v11, %v2254_v47  ;;  %v2284_v55 = vadd.f32 %v6142_v28, %v2255_v48  ;;  %v2534_v0 = vrot.slane %v2532_v50, 4 }
 0x1da   : > { %v6227_v56 = vadd.f32 %v6036_v11, %v2256_v49  ;;  %v2364_v58 = vor.u32 %v2362_v42, %v2361_v9  ;;  %v2365_v23 = vrot.slane %v2361_v9, 4  ;;  %v4743_v61 = vpack.c.bf16 %v2292_v54, %v2292_v54  ;;  %v5273_v54 = vld [vmem:[%s6536_s3 + $0xc8] sm:$0xff]  }
 0x1db   : > { %v2372_v59 = vor.u32 %v2370_v45, %v2369_v18  ;;  %v2373_v10 = vrot.slane %v2369_v18, 4  ;;  %v2293_v62 = vmax.f32 %v2284_v55, 0.0  ;;  %v2537_v15 = vrot.slane %v2535_v19, 5  ;;  %v2507_v30 = vld [vmem:[#allocation2 + $0x18] sm:$0xf] }
 0x1dc   : > { %v2434_v2 = vsel %vm6163_vm9, %v2364_v58, %v2433_v46  ;;  %v2437_v5 = vsel %vm5779_vm5, %v2365_v23, %v2436_v13  ;;  %v2375_v20 = vshrl.u32 %v4743_v61, 16  ;;  %v2530_v24 = vsel %vm5500_vm2, %v6204_v25, %v6192_v52  ;;  %v2508_v32 = vld [vmem:[#allocation2 + $0x1c] sm:$0x1]  ;;  %v2451_v25 = vld [vmem:[#allocation2 + $0x40] sm:$0xf] }
 0x1dd   : > { %v2440_v11 = vsel %vm6163_vm9, %v2372_v59, %v2439_v51  ;;  %v2443_v28 = vsel %vm5779_vm5, %v2373_v10, %v2442_v53  ;;  %2435 = vst [vmem:[#allocation2 + $0x28] sm:$0xf] %v2434_v2  ;;  %2438 = vst [vmem:[#allocation2 + $0x2c] sm:$0x1] %v2437_v5  ;;  %v4744_v22 = vpack.c.bf16 %v2293_v62, %v2293_v62  ;;  %v2378_v33 = vshll.u32 %v4743_v61, 16  ;;  %v5272_v53 = vld [vmem:[%s6536_s3 + $0x80] sm:$0xff]  }
 0x1de   : > { %2441 = vst [vmem:[#allocation2 + $0x30] sm:$0xf] %v2440_v11  ;;  %2444 = vst [vmem:[#allocation2 + $0x34] sm:$0x1] %v2443_v28  ;;  %v2538_v29 = vor.u32 %v2537_v15, %v2534_v0  ;;  %v2541_v35 = vshll.u32 %v2504_v57, 16  ;;  %v2546_v7 = vshrl.u32 %v2505_v1, 16 }
 0x1df   : > { %v2549_v16 = vshll.u32 %v2505_v1, 16  ;;  %v2377_v8 = vrot.slane %v2375_v20, 7  ;;  %v2383_v38 = vshrl.u32 %v4744_v22, 16  ;;  %v2555_v36 = vshll.u32 %v2506_v6, 16  ;;  %v2509_v13 = vld [vmem:[#allocation2 + $0x20] sm:$0xf] }
 0x1e0   : > { %v2539_v12 = vrot.slane %v2538_v29, 4  ;;  %v2386_v26 = vshll.u32 %v4744_v22, 16  ;;  %v2543_v40 = vrot.slane %v2541_v35, 5  ;;  %v2548_v41 = vrot.slane %v2546_v7, 4  ;;  %v5270_v58 = vld [vmem:[#allocation2] ss:$8 sps:$4 sm:$0xff]  }
 0x1e1   : > { %v2551_v42 = vrot.slane %v2549_v16, 5  ;;  %v2380_v44 = vor.u32 %v2378_v33, %v2377_v8  ;;  %v2381_v45 = vrot.slane %v2377_v8, 4  ;;  %v2385_v52 = vrot.slane %v2383_v38, 7  ;;  %v2510_v0 = vld [vmem:[#allocation2 + $0x24] sm:$0x1] }
 0x1e2   : > { %v2560_v46 = vshrl.u32 %v2507_v30, 16  ;;  %v2544_v47 = vsel %vm5500_vm2, %v2539_v12, %v2543_v40  ;;  %v2563_v49 = vshll.u32 %v2507_v30, 16  ;;  %v2569_v9 = vshll.u32 %v2508_v32, 16 }
 0x1e3   : > { %v2552_v48 = vor.u32 %v2551_v42, %v2548_v41  ;;  %v2446_v18 = vsel %vm6163_vm9, %v2380_v44, %v2445_v34  ;;  %v2449_v50 = vsel %vm5779_vm5, %v2381_v45, %v2448_v27  ;;  %v2388_v19 = vor.u32 %v2386_v26, %v2385_v52  ;;  %v5277_v45 = vld [vmem:[%s6536_s3 + $0x90] sm:$0xff]  }
 0x1e4   : > { %v2389_v51 = vrot.slane %v2385_v52, 4  ;;  %2447 = vst [vmem:[#allocation2 + $0x38] sm:$0xf] %v2446_v18  ;;  %2450 = vst [vmem:[#allocation2 + $0x3c] sm:$0x1] %v2449_v50  ;;  %v4604_v55 = vcombine.low %v2530_v24, %v2544_v47  ;;  %v2562_v23 = vrot.slane %v2560_v46, 4 }
 0x1e5   : > { %v2565_v59 = vrot.slane %v2563_v49, 5  ;;  %v2511_v10 = vld [vmem:[#allocation2 + $0x28] sm:$0xf]  ;;  %v2452_v57 = vsel %vm6163_vm9, %v2388_v19, %v2451_v25  ;;  %v2557_v62 = vrot.slane %v2555_v36, 5  ;;  %v2574_v15 = vshrl.u32 %v2509_v13, 16  ;;  %v5278_v47 = vld [vmem:[%s6536_s3 + $0xd8] sm:$0xff]  }
 0x1e6   : > { %v2455_v61 = vsel %vm5779_vm5, %v2389_v51, %v2454_v17  ;;  %2453 = vst [vmem:[#allocation2 + $0x40] sm:$0xf] %v2452_v57  ;;  %3917 = vmatprep.mubr.bf16.mxu1 %v4604_v55  ;;  %v2553_v1 = vrot.slane %v2552_v48, 4  ;;  %v2512_v5 = vld [vmem:[#allocation2 + $0x2c] sm:$0x1]  ;;  %v2577_v11 = vshll.u32 %v2509_v13, 16 }
 0x1e7   : > { %2456 = vst [vmem:[#allocation2 + $0x44] sm:$0x1] %v2455_v61  ;;  %v2566_v2 = vor.u32 %v2565_v59, %v2562_v23  ;;  %v2513_v28 = vld [vmem:[#allocation2 + $0x30] sm:$0xf]  ;;  %3918 = vmatmul.mubr.bf16.vlgmr.msra.gmra.mrb[16].mxu1 %v5270_v58  ;;  %v2571_v6 = vrot.slane %v2569_v9, 5  ;;  %v2576_v20 = vrot.slane %v2574_v15, 4 }
 0x1e8   : > { %v2588_v22 = vshrl.u32 %v2511_v10, 16  ;;  %v2591_v24 = vshll.u32 %v2511_v10, 16  ;;  %4809 = vmatpush3.bf16.msra.mxu1 %v5272_v53  ;;  %v2579_v30 = vrot.slane %v2577_v11, 5  ;;  %v2583_v32 = vshll.u32 %v2510_v0, 16  ;;  %v2514_v12 = vld [vmem:[#allocation2 + $0x34] sm:$0x1] }
 0x1e9   : > { %v2567_v29 = vrot.slane %v2566_v2, 4  ;;  %v2602_v33 = vshrl.u32 %v2513_v28, 16  ;;  %4810 = vmatprep.subr.bf16.mxu1 %v5273_v54  ;;  %v2597_v35 = vshll.u32 %v2512_v5, 16  ;;  %v2605_v7 = vshll.u32 %v2513_v28, 16  ;;  %v5275_v17 = vld [vmem:[#allocation2 + $0x10] ss:$8 sps:$4 sm:$0xff]  }
 0x1ea   : > { %v2590_v34 = vrot.slane %v2588_v22, 4  ;;  %v2593_v27 = vrot.slane %v2591_v24, 5  ;;  %v2558_v16 = vsel %vm5500_vm2, %v2553_v1, %v2557_v62  ;;  %v2580_v38 = vor.u32 %v2579_v30, %v2576_v20  ;;  %v5279_v55 = vld [vmem:[%s6536_s3 + $0x98] sm:$0xff]   ;;  %v5281_v10 = vld [vmem:[%s6536_s3 + $0xe0] sm:$0xff]   ;;  %v5283_v5 = vld [vmem:[%s6536_s3 + $0xe8] sm:$0xff]  }
 0x1eb   : > { %v2572_v8 = vsel %vm5500_vm2, %v2567_v29, %v2571_v6  ;;  %v2604_v36 = vrot.slane %v2602_v33, 4  ;;  %v2515_v41 = vld [vmem:[#allocation2 + $0x38] sm:$0xf]  ;;  %v2516_v42 = vld [vmem:[#allocation2 + $0x3c] sm:$0x1]  ;;  %v2607_v44 = vrot.slane %v2605_v7, 5 }
 0x1ec   : > { %v4605_v26 = vcombine.low %v2558_v16, %v2572_v8  ;;  %v2594_v40 = vor.u32 %v2593_v27, %v2590_v34  ;;  %4811 = vmatpush3.bf16.msra.mxu1 %v5274_v63  ;;  %v2581_v52 = vrot.slane %v2580_v38, 4  ;;  %v2616_v25 = vshrl.u32 %v2515_v41, 16  ;;  %v5282_v0 = vld [vmem:[%s6536_s3 + $0xa0] sm:$0xff]   ;;  %v5284_v28 = vld [vmem:[%s6536_s3 + $0xa8] sm:$0xff]   ;;  %v5286_v63 = vld [vmem:[%s6536_s3 + $0xf0] sm:$0xff]  }
 0x1ed   : > { %v2619_v46 = vshll.u32 %v2515_v41, 16  ;;  %4812 = vmatprep.subr.bf16.mxu1 %v5276_v43  ;;  %v2585_v48 = vrot.slane %v2583_v32, 5  ;;  %v2599_v9 = vrot.slane %v2597_v35, 5  ;;  %v2608_v13 = vor.u32 %v2607_v44, %v2604_v36  ;;  %v5280_v2 = vld [vmem:[#allocation2 + $0x20] ss:$8 sps:$4 sm:$0xff]   ;;  %v5287_v24 = vld [vmem:[%s6536_s3 + $0xb0] sm:$0xff]  }
 0x1ee   : > { %3925 = vmatprep.mubr.bf16.mxu1 %v4605_v26  ;;  %v2595_v49 = vrot.slane %v2594_v40, 4  ;;  %v2611_v18 = vshll.u32 %v2514_v12, 16  ;;  %v2618_v50 = vrot.slane %v2616_v25, 4  ;;  %v2625_v51 = vshll.u32 %v2516_v42, 16  ;;  %v2649_v6 = vld [vmem:[#allocation2] sm:$0xe] }
 0x1ef   : > { %v2621_v19 = vrot.slane %v2619_v46, 5  ;;  %3926 = vmatmul.mubr.bf16.gmra.mrb[20].mxu1 %v5275_v17  ;;  %v2586_v53 = vsel %vm5500_vm2, %v2581_v52, %v2585_v48  ;;  %v2609_v23 = vrot.slane %v2608_v13, 4  ;;  %v2650_v43 = vld [vmem:[#allocation2 + $0x4] sm:$0x1]  ;;  %v2651_v20 = vld [vmem:[#allocation2 + $0x8] sm:$0xe] }
 0x1f0   : > { %v2600_v54 = vsel %vm5500_vm2, %v2595_v49, %v2599_v9  ;;  %4813 = vmatpush3.bf16.msra.mxu1 %v5277_v45  ;;  %v2613_v57 = vrot.slane %v2611_v18, 5  ;;  %v2627_v62 = vrot.slane %v2625_v51, 5  ;;  %v2652_v22 = vld [vmem:[#allocation2 + $0xc] sm:$0x1]  ;;  %v5285_v29 = vld [vmem:[#allocation2 + $0x30] ss:$8 sps:$4 sm:$0xff]  }
 0x1f1   : > { %v4606_v58 = vcombine.low %v2586_v53, %v2600_v54  ;;  %v2622_v59 = vor.u32 %v2621_v19, %v2618_v50  ;;  %4814 = vmatprep.subr.bf16.mxu1 %v5278_v47  ;;  %v5289_v30 = vld [vmem:[%s6536_s3 + $0xf8] sm:$0xff]   ;;  %v5288_v32 = vld [vmem:[#allocation2 + $0x8] ss:$8 sps:$4 sm:$0xff]   ;;  %v4608_v33 = vrot.slane %v2649_v6, 9  ;;  %v2686_v34 = vrot.slane %v2650_v43, 5  ;;  %v5291_v8 = vld [vmem:[%s6536_s3 + $0x140] sm:$0xff]  }
 0x1f2   : > { %v2614_v15 = vsel %vm5500_vm2, %v2609_v23, %v2613_v57  ;;  %v4609_v27 = vrot.slane %v2651_v20, 9  ;;  %v2690_v35 = vrot.slane %v2652_v22, 5  ;;  %v5290_v16 = vld [vmem:[%s6536_s3 + $0xb8] sm:$0xff]   ;;  %v5293_v40 = vld [vmem:[%s6536_s3 + $0x100] sm:$0xff]   ;;  %v5294_v42 = vld [vmem:[%s6536_s3 + $0x148] sm:$0xff]  }
 0x1f3   : > { %3933 = vmatprep.mubr.bf16.mxu1 %v4606_v58  ;;  %v2623_v61 = vrot.slane %v2622_v59, 4  ;;  %v2687_v38 = vsel %vm6305_vm12, %v4608_v33, %v2686_v34  ;;  %v2655_v36 = vld [vmem:[#allocation2 + $0x18] sm:$0xe]  ;;  %v2656_v26 = vld [vmem:[#allocation2 + $0x1c] sm:$0x1]  ;;  %v5295_v17 = vld [vmem:[%s6536_s3 + $0x108] sm:$0xff]  }
 0x1f4   : > { %4815 = vmatpush3.bf16.msra.mxu1 %v5279_v55  ;;  %v2691_v12 = vsel %vm6305_vm12, %v4609_v27, %v2690_v35  ;;  %v2653_v44 = vld [vmem:[#allocation2 + $0x10] sm:$0xe]  ;;  %v2654_v45 = vld [vmem:[#allocation2 + $0x14] sm:$0x1]  ;;  %v5292_v52 = vld [vmem:[#allocation2 + $0x18] ss:$8 sps:$4 sm:$0xff]  }
 0x1f5   : > { %v2628_v1 = vsel %vm5500_vm2, %v2623_v61, %v2627_v62  ;;  %4816 = vmatprep.subr.bf16.mxu1 %v5281_v10  ;;  %v4616_v41 = vcombine.low %v2687_v38, %v2691_v12  ;;  %v4611_v25 = vrot.slane %v2655_v36, 9  ;;  %v2698_v46 = vrot.slane %v2656_v26, 5  ;;  %v5296_v49 = vld [vmem:[%s6536_s3 + $0x150] sm:$0xff]   ;;  %v2659_v13 = vld [vmem:[#allocation2 + $0x28] sm:$0xe]  ;;  %v5299_v55 = vld [vmem:[%s6536_s3 + $0x158] sm:$0xff]  }
 0x1f6   : > { %v4607_v11 = vcombine.low %v2614_v15, %v2628_v1  ;;  %v4610_v47 = vrot.slane %v2653_v44, 9  ;;  %v2694_v48 = vrot.slane %v2654_v45, 5  ;;  %v2660_v18 = vld [vmem:[#allocation2 + $0x2c] sm:$0x1]  ;;  %v5298_v19 = vld [vmem:[%s6536_s3 + $0x110] sm:$0xff]   ;;  %v4613_v23 = vrot.slane %v2659_v13, 9 }
 0x1f7   : > { %3934 = vmatmul.mubr.bf16.gmra.mrb[24].mxu1 %v5280_v2  ;;  %v2699_v9 = vsel %vm6305_vm12, %v4611_v25, %v2698_v46  ;;  %v2657_v51 = vld [vmem:[#allocation2 + $0x20] sm:$0xe]  ;;  %v2658_v53 = vld [vmem:[#allocation2 + $0x24] sm:$0x1]  ;;  %v5297_v58 = vld [vmem:[#allocation2 + $0x28] ss:$8 sps:$4 sm:$0xff]  }
 0x1f8   : > { %4817 = vmatpush3.bf16.msra.mxu1 %v5282_v0  ;;  %3941 = vmatprep.mubr.bf16.mxu1 %v4607_v11  ;;  %v2695_v50 = vsel %vm6305_vm12, %v4610_v47, %v2694_v48  ;;  %v2706_v59 = vrot.slane %v2660_v18, 5  ;;  %v2774_v10 = vld [vmem:[#allocation2 + $0x10] sm:$0xf]  ;;  %v5300_v57 = vld [vmem:[%s6536_s3 + $0x118] sm:$0xff]   ;;  %v4612_v61 = vrot.slane %v2657_v51, 9  ;;  %v2702_v62 = vrot.slane %v2658_v53, 5 }
 0x1f9   : > { %4818 = vmatprep.subr.bf16.mxu1 %v5283_v5  ;;  %v4617_v54 = vcombine.low %v2695_v50, %v2699_v9  ;;  %v5301_v0 = vld [vmem:[%s6536_s3 + $0x160] sm:$0xff]   ;;  %v2661_v15 = vld [vmem:[#allocation2 + $0x30] sm:$0xe]  ;;  %v2662_v1 = vld [vmem:[#allocation2 + $0x34] sm:$0x1]  ;;  %v2803_v11 = vshrl.u32 %v2774_v10, 16 }
 0x1fa   : > { %v2772_v2 = vld [vmem:[#allocation2 + $0x8] sm:$0xf]  ;;  %v2663_v5 = vld [vmem:[#allocation2 + $0x38] sm:$0xe]  ;;  %v2664_v6 = vld [vmem:[#allocation2 + $0x3c] sm:$0x1] }
 0x1fb   : > { %v2920_v43 = vld [vmem:[#allocation2 + $0x8] sm:$0xe]  ;;  %v2922_v20 = vld [vmem:[#allocation2 + $0x10] sm:$0xe]  ;;  %v2923_v22 = vld [vmem:[#allocation2 + $0x14] sm:$0x1] }
 0x1fc   : > { %4819 = vmatpush3.bf16.msra.mxu1 %v5284_v28  ;;  %v2806_v28 = vshll.u32 %v2774_v10, 16  ;;  %v4614_v33 = vrot.slane %v2661_v15, 9  ;;  %v2710_v34 = vrot.slane %v2662_v1, 5  ;;  %v4615_v27 = vrot.slane %v2663_v5, 9  ;;  %v2921_v35 = vld [vmem:[#allocation2 + $0xc] sm:$0x1] }
 0x1fd   : > { %4820 = vmatprep.subr.bf16.mxu1 %v5286_v63  ;;  %v2707_v63 = vsel %vm6305_vm12, %v4613_v23, %v2706_v59  ;;  %v5304_v38 = vld [vmem:[%s6536_s3 + $0x168] sm:$0xff]   ;;  %v2714_v12 = vrot.slane %v2664_v6, 5  ;;  %v2805_v36 = vrot.slane %v2803_v11, 4  ;;  %v5306_v46 = vld [vmem:[%s6536_s3 + $0x170] sm:$0xff]   ;;  %v2954_v47 = vrot.slane %v2921_v35, 5  ;;  %v5310_v35 = vld [vmem:[%s6536_s3 + $0x1c0] sm:$0xff]  }
 0x1fe   : > { %v2808_v26 = vrot.slane %v2806_v28, 5  ;;  %v5305_v25 = vld [vmem:[%s6536_s3 + $0x128] sm:$0xff]   ;;  %v2776_v48 = vld [vmem:[#allocation2 + $0x18] sm:$0xf]  ;;  %v2925_v50 = vld [vmem:[#allocation2 + $0x1c] sm:$0x1] }
 0x1ff   : > { %3942 = vmatmul.mubr.bf16.gmra.mrb[28].mxu1 %v5285_v29  ;;  %v2792_v29 = vshll.u32 %v2772_v2, 16  ;;  %v2773_v9 = vld [vmem:[#allocation2 + $0xc] sm:$0x1]  ;;  %v2924_v18 = vld [vmem:[#allocation2 + $0x18] sm:$0xe]  ;;  %v2817_v59 = vshrl.u32 %v2776_v48, 16 }
 0x200   : > { %4821 = vmatpush3.bf16.msra.mxu1 %v5287_v24  ;;  %3982 = vmatprep.mubr.bf16.mxu1 %v5288_v32  ;;  %v2789_v24 = vshrl.u32 %v2772_v2, 16  ;;  %v5303_v32 = vld [vmem:[%s6536_s3 + $0x120] sm:$0xff]   ;;  %v2809_v13 = vor.u32 %v2808_v26, %v2805_v36  ;;  %v2820_v10 = vshll.u32 %v2776_v48, 16  ;;  %v5308_v2 = vld [vmem:[%s6536_s3 + $0x178] sm:$0xff]   ;;  %v4630_v11 = vrot.slane %v2924_v18, 9 }
 0x201   : > { %4822 = vmatprep.subr.bf16.mxu1 %v5289_v30  ;;  %v2703_v30 = vsel %vm6305_vm12, %v4612_v61, %v2702_v62  ;;  %v2794_v45 = vrot.slane %v2792_v29, 5  ;;  %v2926_v23 = vld [vmem:[#allocation2 + $0x20] sm:$0xe]  ;;  %v5307_v61 = vld [vmem:[%s6536_s3 + $0x130] sm:$0xff]   ;;  %v2927_v15 = vld [vmem:[#allocation2 + $0x24] sm:$0x1] }
 0x202   : > { %v2791_v44 = vrot.slane %v2789_v24, 4  ;;  %v2810_v5 = vrot.slane %v2809_v13, 4  ;;  %v2962_v28 = vrot.slane %v2925_v50, 5  ;;  %v2782_v24 = vld [vmem:[#allocation2 + $0x30] sm:$0xf]  ;;  %v5312_v13 = vld [vmem:[%s6536_s3 + $0x1c8] sm:$0xff]  }
 0x203   : > { %v2929_v36 = vld [vmem:[#allocation2 + $0x2c] sm:$0x1]  ;;  %v2859_v26 = vshrl.u32 %v2782_v24, 16 }
 0x204   : > { %4823 = vmatpush3.bf16.msra.mxu1 %v5290_v16  ;;  %v4618_v16 = vcombine.low %v2703_v30, %v2707_v63  ;;  %v5309_v63 = vld [vmem:[%s6536_s3 + $0x138] sm:$0xff]   ;;  %v2966_v30 = vrot.slane %v2927_v15, 5 }
 0x205   : > { %4848 = vmatprep.subr.bf16.mxu1 %v5291_v8  ;;  %v5302_v8 = vld [vmem:[#allocation2 + $0x38] ss:$8 sps:$4 sm:$0xff]  }
 0x207   : > { %3983 = vmatmul.mubr.bf16.vlgmr.msra.gmra.mrb[32].mxu1 %v4616_v41  ;;  %v2958_v41 = vrot.slane %v2923_v22, 5 }
 0x208   : > { %3990 = vmatprep.mubr.bf16.mxu1 %v5292_v52  ;;  %4849 = vmatpush3.bf16.msra.mxu1 %v5293_v40  ;;  %v4629_v40 = vrot.slane %v2922_v20, 9  ;;  %v2778_v52 = vld [vmem:[#allocation2 + $0x20] sm:$0xf] }
 0x209   : > { %4850 = vmatprep.subr.bf16.mxu1 %v5294_v42  ;;  %v2775_v42 = vld [vmem:[#allocation2 + $0x14] sm:$0x1]  ;;  %v2831_v53 = vshrl.u32 %v2778_v52, 16 }
 0x20a   : > { %v2812_v51 = vshll.u32 %v2775_v42, 16 }
 0x20b   : > { %v2833_v20 = vrot.slane %v2831_v53, 4 }
 0x20c   : > { %4851 = vmatpush3.bf16.msra.mxu1 %v5295_v17  ;;  %v4628_v17 = vrot.slane %v2920_v43, 9  ;;  %v2814_v6 = vrot.slane %v2812_v51, 5  ;;  %v4631_v43 = vrot.slane %v2926_v23, 9 }
 0x20d   : > { %4852 = vmatprep.subr.bf16.mxu1 %v5296_v49  ;;  %v2715_v49 = vsel %vm6305_vm12, %v4615_v27, %v2714_v12  ;;  %v2928_v12 = vld [vmem:[#allocation2 + $0x28] sm:$0xe] }
 0x20e   : > { %v2955_v62 = vsel %vm6305_vm12, %v4628_v17, %v2954_v47  ;;  %v2967_v17 = vsel %vm6305_vm12, %v4631_v43, %v2966_v30  ;;  %v4632_v50 = vrot.slane %v2928_v12, 9  ;;  %v3041_v30 = vld [vmem:[#allocation2 + $0x10] sm:$0xf] }
 0x20f   : > { %3991 = vmatmul.mubr.bf16.gmra.mrb[36].mxu1 %v4617_v54  ;;  %v2834_v54 = vshll.u32 %v2778_v52, 16 }
 0x210   : > { %3998 = vmatprep.mubr.bf16.mxu1 %v5297_v58  ;;  %4853 = vmatpush3.bf16.msra.mxu1 %v5298_v19  ;;  %v2959_v19 = vsel %vm6305_vm12, %v4629_v40, %v2958_v41  ;;  %v2795_v58 = vor.u32 %v2794_v45, %v2791_v44  ;;  %v2862_v40 = vshll.u32 %v2782_v24, 16  ;;  %v2963_v41 = vsel %vm6305_vm12, %v4630_v11, %v2962_v28  ;;  %v2930_v44 = vld [vmem:[#allocation2 + $0x30] sm:$0xe]  ;;  %v2931_v45 = vld [vmem:[#allocation2 + $0x34] sm:$0x1] }
 0x211   : > { %4854 = vmatprep.subr.bf16.mxu1 %v5299_v55  ;;  %v2711_v55 = vsel %vm6305_vm12, %v4614_v33, %v2710_v34  ;;  %v4636_v1 = vcombine.low %v2955_v62, %v2959_v19  ;;  %v2836_v22 = vrot.slane %v2834_v54, 5  ;;  %v2822_v33 = vrot.slane %v2820_v10, 5  ;;  %v2780_v34 = vld [vmem:[#allocation2 + $0x28] sm:$0xf]  ;;  %v2781_v54 = vld [vmem:[#allocation2 + $0x2c] sm:$0x1] }
 0x212   : > { %v2796_v29 = vrot.slane %v2795_v58, 4  ;;  %v2845_v52 = vshrl.u32 %v2780_v34, 16  ;;  %v2970_v19 = vrot.slane %v2929_v36, 5  ;;  %v4633_v51 = vrot.slane %v2930_v44, 9  ;;  %v5313_v62 = vld [vmem:[%s6536_s3 + $0x188] sm:$0xff]  }
 0x213   : > { %v2837_v42 = vor.u32 %v2836_v22, %v2833_v20  ;;  %v2974_v53 = vrot.slane %v2931_v45, 5  ;;  %v2864_v58 = vrot.slane %v2862_v40, 5  ;;  %v4637_v23 = vcombine.low %v2963_v41, %v2967_v17  ;;  %v2783_v28 = vld [vmem:[#allocation2 + $0x34] sm:$0x1]  ;;  %v2934_v22 = vld [vmem:[#allocation2 + $0x40] sm:$0xe] }
 0x214   : > { %4855 = vmatpush3.bf16.msra.mxu1 %v5300_v57  ;;  %v4619_v57 = vcombine.low %v2711_v55, %v2715_v49  ;;  %v2861_v55 = vrot.slane %v2859_v26, 4  ;;  %v2847_v10 = vrot.slane %v2845_v52, 4  ;;  %v2971_v11 = vsel %vm6305_vm12, %v4632_v50, %v2970_v19  ;;  %v5315_v26 = vld [vmem:[%s6536_s3 + $0x190] sm:$0xff]   ;;  %v2932_v40 = vld [vmem:[#allocation2 + $0x38] sm:$0xe] }
 0x215   : > { %4856 = vmatprep.subr.bf16.mxu1 %v5301_v0  ;;  %v2798_v0 = vshll.u32 %v2773_v9, 16  ;;  %v5311_v9 = vld [vmem:[%s6536_s3 + $0x180] sm:$0xff]   ;;  %v2975_v43 = vsel %vm6305_vm12, %v4633_v51, %v2974_v53  ;;  %v4635_v41 = vrot.slane %v2934_v22, 9  ;;  %v3061_v44 = vshll.u32 %v3041_v30, 16  ;;  %v5316_v52 = vld [vmem:[%s6536_s3 + $0x1d8] sm:$0xff]  }
 0x216   : > { %v2865_v20 = vor.u32 %v2864_v58, %v2861_v55  ;;  %v4638_v36 = vcombine.low %v2971_v11, %v2975_v43  ;;  %v2787_v51 = vld [vmem:[#allocation2 + $0x44] sm:$0x1]  ;;  %v4634_v55 = vrot.slane %v2932_v40, 9  ;;  %v3045_v11 = vld [vmem:[#allocation2 + $0x20] sm:$0xf] }
 0x217   : > { %3999 = vmatmul.mubr.bf16.gmra.mrb[40].mxu1 %v4618_v16  ;;  %v2800_v27 = vrot.slane %v2798_v0, 5  ;;  %v2777_v16 = vld [vmem:[#allocation2 + $0x1c] sm:$0x1] }
 0x218   : > { %4006 = vmatprep.mubr.bf16.mxu1 %v5302_v8  ;;  %4857 = vmatpush3.bf16.msra.mxu1 %v5303_v32  ;;  %v2819_v32 = vrot.slane %v2817_v59, 4  ;;  %v2779_v8 = vld [vmem:[#allocation2 + $0x24] sm:$0x1]  ;;  %v2826_v48 = vshll.u32 %v2777_v16, 16  ;;  %v2838_v59 = vrot.slane %v2837_v42, 4  ;;  %v2868_v16 = vshll.u32 %v2783_v28, 16 }
 0x219   : > { %4858 = vmatprep.subr.bf16.mxu1 %v5304_v38  ;;  %v2815_v38 = vsel %vm5500_vm2, %v2810_v5, %v2814_v6  ;;  %v2840_v18 = vshll.u32 %v2779_v8, 16  ;;  %v3043_v6 = vld [vmem:[#allocation2 + $0x18] sm:$0xf]  ;;  %v2935_v8 = vld [vmem:[#allocation2 + $0x44] sm:$0x1]  ;;  %v3058_v42 = vshrl.u32 %v3041_v30, 16 }
 0x21a   : > { %v2823_v47 = vor.u32 %v2822_v33, %v2819_v32  ;;  %v2828_v15 = vrot.slane %v2826_v48, 5  ;;  %v3075_v12 = vshll.u32 %v3043_v6, 16  ;;  %v5317_v48 = vld [vmem:[%s6536_s3 + $0x198] sm:$0xff]   ;;  %v2870_v19 = vrot.slane %v2868_v16, 5 }
 0x21b   : > { %v2842_v5 = vrot.slane %v2840_v18, 5  ;;  %v2896_v28 = vshll.u32 %v2787_v51, 16  ;;  %v3089_v16 = vshll.u32 %v3045_v11, 16 }
 0x21c   : > { %4859 = vmatpush3.bf16.msra.mxu1 %v5305_v25  ;;  %v2848_v25 = vshll.u32 %v2780_v34, 16  ;;  %v2824_v0 = vrot.slane %v2823_v47, 4 }
 0x21d   : > { %4860 = vmatprep.subr.bf16.mxu1 %v5306_v46  ;;  %v2801_v46 = vsel %vm5500_vm2, %v2796_v29, %v2800_v27  ;;  %v2843_v32 = vsel %vm5500_vm2, %v2838_v59, %v2842_v5  ;;  %v3063_v59 = vrot.slane %v3061_v44, 5  ;;  %v3044_v5 = vld [vmem:[#allocation2 + $0x1c] sm:$0x1] }
 0x21e   : > { %v4624_v49 = vcombine.low %v2801_v46, %v2815_v38  ;;  %v3072_v38 = vshrl.u32 %v3043_v6, 16  ;;  %v2933_v46 = vld [vmem:[#allocation2 + $0x3c] sm:$0x1] }
 0x21f   : > { %4007 = vmatmul.mubr.bf16.gmra.mrb[44].mxu1 %v4619_v57  ;;  %v2850_v57 = vrot.slane %v2848_v25, 5  ;;  %v2866_v25 = vrot.slane %v2865_v20, 4  ;;  %v2978_v58 = vrot.slane %v2933_v46, 5  ;;  %v5322_v46 = vld [vmem:[%s6536_s3 + $0x1f0] sm:$0xff]  }
 0x220   : > { %4861 = vmatpush3.bf16.msra.mxu1 %v5307_v61  ;;  %4047 = vmatprep.mubr.bf16.mxu1 %v4636_v1  ;;  %v2786_v61 = vld [vmem:[#allocation2 + $0x40] sm:$0xf]  ;;  %v5314_v1 = vld [vmem:[%s6536_s3 + $0x1d0] sm:$0xff]   ;;  %v3074_v53 = vrot.slane %v3072_v38, 4 }
 0x221   : > { %4862 = vmatprep.subr.bf16.mxu1 %v5308_v2  ;;  %v2784_v2 = vld [vmem:[#allocation2 + $0x38] sm:$0xf]  ;;  %v2887_v24 = vshrl.u32 %v2786_v61, 16  ;;  %v2890_v29 = vshll.u32 %v2786_v61, 16  ;;  %v2851_v33 = vor.u32 %v2850_v57, %v2847_v10  ;;  %v3047_v10 = vld [vmem:[#allocation2 + $0x28] sm:$0xf]  ;;  %v2871_v57 = vsel %vm5500_vm2, %v2866_v25, %v2870_v19 }
 0x222   : > { %v2873_v34 = vshrl.u32 %v2784_v2, 16  ;;  %v2876_v27 = vshll.u32 %v2784_v2, 16  ;;  %v5318_v61 = vld [vmem:[%s6536_s3 + $0x1e0] sm:$0xff]   ;;  %v3100_v43 = vshrl.u32 %v3047_v10, 16  ;;  %v3103_v20 = vshll.u32 %v3047_v10, 16 }
 0x223   : > { %v2889_v17 = vrot.slane %v2887_v24, 4  ;;  %v2892_v47 = vrot.slane %v2890_v29, 5  ;;  %v2979_v24 = vsel %vm6305_vm12, %v4634_v55, %v2978_v58  ;;  %v5319_v29 = vld [vmem:[%s6536_s3 + $0x1a0] sm:$0xff]   ;;  %v5323_v58 = vld [vmem:[%s6536_s3 + $0x1b0] sm:$0xff]  }
 0x224   : > { %4863 = vmatpush3.bf16.msra.mxu1 %v5309_v63  ;;  %v2854_v63 = vshll.u32 %v2781_v54, 16  ;;  %v2878_v18 = vrot.slane %v2876_v27, 5  ;;  %v3077_v54 = vrot.slane %v3075_v12, 5  ;;  %v3081_v27 = vshll.u32 %v3044_v5, 16  ;;  %v3046_v19 = vld [vmem:[#allocation2 + $0x24] sm:$0x1] }
 0x225   : > { %4888 = vmatprep.subr.bf16.mxu1 %v5310_v35  ;;  %v2829_v35 = vsel %vm5500_vm2, %v2824_v0, %v2828_v15  ;;  %v2893_v0 = vor.u32 %v2892_v47, %v2889_v17  ;;  %v3102_v40 = vrot.slane %v3100_v43, 4 }
 0x226   : > { %v4625_v45 = vcombine.low %v2829_v35, %v2843_v32  ;;  %v2856_v50 = vrot.slane %v2854_v63, 5  ;;  %v3042_v63 = vld [vmem:[#allocation2 + $0x14] sm:$0x1]  ;;  %v3078_v6 = vor.u32 %v3077_v54, %v3074_v53  ;;  %v3086_v35 = vshrl.u32 %v3045_v11, 16  ;;  %v3055_v11 = vld [vmem:[#allocation2 + $0x48] sm:$0xf] }
 0x227   : > { %4048 = vmatmul.mubr.bf16.vlgmr.msra.gmra.mrb[48].mxu1 %v4624_v49  ;;  %v2852_v49 = vrot.slane %v2851_v33, 4  ;;  %v5320_v33 = vld [vmem:[%s6536_s3 + $0x1e8] sm:$0xff]   ;;  %v3067_v12 = vshll.u32 %v3042_v63, 16  ;;  %v3083_v17 = vrot.slane %v3081_v27, 5  ;;  %v3053_v63 = vld [vmem:[#allocation2 + $0x40] sm:$0xf] }
 0x228   : > { %4055 = vmatprep.mubr.bf16.mxu1 %v4637_v23  ;;  %4889 = vmatpush3.bf16.msra.mxu1 %v5311_v9  ;;  %v2982_v9 = vrot.slane %v2935_v8, 5  ;;  %v3060_v23 = vrot.slane %v3058_v42, 4  ;;  %v5321_v42 = vld [vmem:[%s6536_s3 + $0x1a8] sm:$0xff]   ;;  %v3088_v47 = vrot.slane %v3086_v35, 4  ;;  %v3142_v35 = vshrl.u32 %v3053_v63, 16 }
 0x229   : > { %4890 = vmatprep.subr.bf16.mxu1 %v5312_v13  ;;  %v2875_v13 = vrot.slane %v2873_v34, 4  ;;  %v2857_v15 = vsel %vm5500_vm2, %v2852_v49, %v2856_v50  ;;  %v2894_v34 = vrot.slane %v2893_v0, 4 }
 0x22a   : > { %v4626_v22 = vcombine.low %v2857_v15, %v2871_v57  ;;  %v3064_v32 = vor.u32 %v3063_v59, %v3060_v23  ;;  %v5324_v59 = vld [vmem:[%s6536_s3 + $0x1f8] sm:$0xff]   ;;  %v3095_v15 = vshll.u32 %v3046_v19, 16 }
 0x22b   : > { %v2879_v2 = vor.u32 %v2878_v18, %v2875_v13  ;;  %v3048_v13 = vld [vmem:[#allocation2 + $0x2c] sm:$0x1]  ;;  %v3049_v18 = vld [vmem:[#allocation2 + $0x30] sm:$0xf] }
 0x22c   : > { %4891 = vmatpush3.bf16.msra.mxu1 %v5313_v62  ;;  %v2785_v62 = vld [vmem:[#allocation2 + $0x3c] sm:$0x1]  ;;  %v3109_v57 = vshll.u32 %v3048_v13, 16 }
 0x22d   : > { %4892 = vmatprep.subr.bf16.mxu1 %v5314_v1  ;;  %v2983_v1 = vsel %vm6305_vm12, %v4635_v41, %v2982_v9  ;;  %v2882_v30 = vshll.u32 %v2785_v62, 16  ;;  %v2880_v38 = vrot.slane %v2879_v2, 4  ;;  %v3105_v41 = vrot.slane %v3103_v20, 5 }
 0x22e   : > { %v4639_v8 = vcombine.low %v2979_v24, %v2983_v1  ;;  %v3069_v9 = vrot.slane %v3067_v12, 5  ;;  %v3117_v62 = vshll.u32 %v3049_v18, 16  ;;  %v3111_v20 = vrot.slane %v3109_v57, 5 }
 0x22f   : > { %4056 = vmatmul.mubr.bf16.gmra.mrb[52].mxu1 %v4625_v45  ;;  %v2884_v44 = vrot.slane %v2882_v30, 5  ;;  %v3065_v45 = vrot.slane %v3064_v32, 4  ;;  %v3106_v51 = vor.u32 %v3105_v41, %v3102_v40  ;;  %v3052_v30 = vld [vmem:[#allocation2 + $0x3c] sm:$0x1]  ;;  %v3156_v32 = vshrl.u32 %v3055_v11, 16 }
 0x230   : > { %4063 = vmatprep.mubr.bf16.mxu1 %v4638_v36  ;;  %4893 = vmatpush3.bf16.msra.mxu1 %v5315_v26  ;;  %v2898_v36 = vrot.slane %v2896_v28, 5  ;;  %v3079_v26 = vrot.slane %v3078_v6, 4  ;;  %v5325_v28 = vld [vmem:[%s6536_s3 + $0x1b8] sm:$0xff]   ;;  %v5327_v6 = vld [vmem:[%s6536_s3 + $0x200] sm:$0xff]   ;;  %v3119_v24 = vrot.slane %v3117_v62, 5  ;;  %v3137_v40 = vshll.u32 %v3052_v30, 16 }
 0x231   : > { %4894 = vmatprep.subr.bf16.mxu1 %v5316_v52  ;;  %v3051_v52 = vld [vmem:[#allocation2 + $0x38] sm:$0xf]  ;;  %v2885_v49 = vsel %vm5500_vm2, %v2880_v38, %v2884_v44  ;;  %v3070_v23 = vsel %vm5500_vm2, %v3065_v45, %v3069_v9  ;;  %v3107_v1 = vrot.slane %v3106_v51, 4  ;;  %v3054_v9 = vld [vmem:[#allocation2 + $0x44] sm:$0x1] }
 0x232   : > { %v2899_v25 = vsel %vm5500_vm2, %v2894_v34, %v2898_v36  ;;  %v3084_v50 = vsel %vm5500_vm2, %v3079_v26, %v3083_v17  ;;  %v3128_v53 = vshrl.u32 %v3051_v52, 16  ;;  %v3131_v54 = vshll.u32 %v3051_v52, 16  ;;  %v5326_v38 = vld [vmem:[#allocation2 + $0x10] ss:$8 sps:$4 sm:$0xff]   ;;  %v5328_v36 = vld [vmem:[%s6536_s3 + $0x208] sm:$0xff]  }
 0x233   : > { %v4627_v55 = vcombine.low %v2885_v49, %v2899_v25  ;;  %v4644_v0 = vcombine.low %v3070_v23, %v3084_v50  ;;  %v3112_v34 = vsel %vm5500_vm2, %v3107_v1, %v3111_v20  ;;  %v3144_v25 = vrot.slane %v3142_v35, 4  ;;  %v3056_v17 = vld [vmem:[#allocation2 + $0x4c] sm:$0x1]  ;;  %v3191_v1 = vld [vmem:[#allocation2 + $0x18] sm:$0xe] }
 0x234   : > { %4895 = vmatpush3.bf16.msra.mxu1 %v5317_v48  ;;  %v3091_v48 = vrot.slane %v3089_v16, 5  ;;  %v3130_v2 = vrot.slane %v3128_v53, 4  ;;  %v3133_v5 = vrot.slane %v3131_v54, 5  ;;  %v3145_v16 = vshll.u32 %v3053_v63, 16  ;;  %v5329_v53 = vld [vmem:[#allocation2 + $0x20] ss:$8 sps:$4 sm:$0xff]  }
 0x235   : > { %4896 = vmatprep.subr.bf16.mxu1 %v5318_v61  ;;  %v3114_v61 = vshrl.u32 %v3049_v18, 16  ;;  %v3139_v49 = vrot.slane %v3137_v40, 5  ;;  %v3165_v51 = vshll.u32 %v3056_v17, 16  ;;  %v3189_v63 = vld [vmem:[#allocation2 + $0x10] sm:$0xe] }
 0x236   : > { %v3092_v10 = vor.u32 %v3091_v48, %v3088_v47  ;;  %v3134_v27 = vor.u32 %v3133_v5, %v3130_v2  ;;  %v5330_v47 = vld [vmem:[%s6536_s3 + $0x210] sm:$0xff]   ;;  %v3192_v2 = vld [vmem:[#allocation2 + $0x1c] sm:$0x1]  ;;  %v3195_v30 = vld [vmem:[#allocation2 + $0x28] sm:$0xe] }
 0x237   : > { %4064 = vmatmul.mubr.bf16.gmra.mrb[56].mxu1 %v4626_v22  ;;  %v3116_v22 = vrot.slane %v3114_v61, 4  ;;  %v3167_v57 = vrot.slane %v3165_v51, 5  ;;  %v5333_v61 = vld [vmem:[%s6536_s3 + $0x220] sm:$0xff]   ;;  %v5332_v5 = vld [vmem:[#allocation2 + $0x30] ss:$8 sps:$4 sm:$0xff]   ;;  %v3227_v20 = vrot.slane %v3192_v2, 5 }
 0x238   : > { %4071 = vmatprep.mubr.bf16.mxu1 %v4639_v8  ;;  %4897 = vmatpush3.bf16.msra.mxu1 %v5319_v29  ;;  %v3093_v43 = vrot.slane %v3092_v10, 4  ;;  %v3097_v29 = vrot.slane %v3095_v15, 5  ;;  %v3050_v8 = vld [vmem:[#allocation2 + $0x34] sm:$0x1]  ;;  %v3135_v52 = vrot.slane %v3134_v27, 4 }
 0x239   : > { %4898 = vmatprep.subr.bf16.mxu1 %v5320_v33  ;;  %v3159_v33 = vshll.u32 %v3055_v11, 16  ;;  %v3120_v26 = vor.u32 %v3119_v24, %v3116_v22  ;;  %v3123_v45 = vshll.u32 %v3050_v8, 16  ;;  %v5334_v11 = vld [vmem:[%s6536_s3 + $0x228] sm:$0xff]   ;;  %v4648_v22 = vrot.slane %v3189_v63, 9  ;;  %v3200_v27 = vld [vmem:[#allocation2 + $0x3c] sm:$0x1] }
 0x23a   : > { %v3098_v12 = vsel %vm5500_vm2, %v3093_v43, %v3097_v29  ;;  %v3140_v50 = vsel %vm5500_vm2, %v3135_v52, %v3139_v49  ;;  %v4649_v43 = vrot.slane %v3191_v1, 9  ;;  %v5335_v35 = vld [vmem:[#allocation2 + $0x40] ss:$8 sps:$4 sm:$0xff]   ;;  %v3197_v40 = vld [vmem:[#allocation2 + $0x30] sm:$0xe] }
 0x23b   : > { %v4645_v41 = vcombine.low %v3098_v12, %v3112_v34  ;;  %v3161_v44 = vrot.slane %v3159_v33, 5  ;;  %v3121_v48 = vrot.slane %v3120_v26, 4  ;;  %v3125_v18 = vrot.slane %v3123_v45, 5  ;;  %v5337_v33 = vld [vmem:[%s6536_s3 + $0x238] sm:$0xff]   ;;  %v3193_v8 = vld [vmem:[#allocation2 + $0x20] sm:$0xe] }
 0x23c   : > { %4899 = vmatpush3.bf16.msra.mxu1 %v5321_v42  ;;  %v3158_v42 = vrot.slane %v3156_v32, 4  ;;  %v3228_v29 = vsel %vm6305_vm12, %v4649_v43, %v3227_v20  ;;  %v3196_v32 = vld [vmem:[#allocation2 + $0x2c] sm:$0x1]  ;;  %v3199_v34 = vld [vmem:[#allocation2 + $0x38] sm:$0xe]  ;;  %v4650_v45 = vrot.slane %v3193_v8, 9 }
 0x23d   : > { %4900 = vmatprep.subr.bf16.mxu1 %v5322_v46  ;;  %v3147_v46 = vrot.slane %v3145_v16, 5  ;;  %v3126_v54 = vsel %vm5500_vm2, %v3121_v48, %v3125_v18  ;;  %v3235_v26 = vrot.slane %v3196_v32, 5  ;;  %v3201_v49 = vld [vmem:[#allocation2 + $0x40] sm:$0xe] }
 0x23e   : > { %v3162_v13 = vor.u32 %v3161_v44, %v3158_v42  ;;  %v4646_v23 = vcombine.low %v3126_v54, %v3140_v50  ;;  %v4653_v42 = vrot.slane %v3199_v34, 9  ;;  %v3243_v44 = vrot.slane %v3200_v27, 5 }
 0x23f   : > { %4072 = vmatmul.mubr.bf16.gmra.mrb[60].mxu1 %v4627_v55  ;;  %v3148_v19 = vor.u32 %v3147_v46, %v3144_v25  ;;  %v5331_v55 = vld [vmem:[%s6536_s3 + $0x218] sm:$0xff]   ;;  %v4652_v25 = vrot.slane %v3197_v40, 9  ;;  %v4654_v54 = vrot.slane %v3201_v49, 9 }
 0x240   : > { %4901 = vmatpush3.bf16.msra.mxu1 %v5323_v58  ;;  %4112 = vmatprep.mubr.bf16.mxu1 %v4644_v0  ;;  %v3151_v58 = vshll.u32 %v3054_v9, 16  ;;  %v3163_v10 = vrot.slane %v3162_v13, 4  ;;  %v3244_v48 = vsel %vm6305_vm12, %v4653_v42, %v3243_v44  ;;  %v3202_v9 = vld [vmem:[#allocation2 + $0x44] sm:$0x1]  ;;  %v3204_v13 = vld [vmem:[#allocation2 + $0x4c] sm:$0x1] }
 0x241   : > { %4902 = vmatprep.subr.bf16.mxu1 %v5324_v59  ;;  %v3149_v59 = vrot.slane %v3148_v19, 4 }
 0x242   : > { %v3153_v62 = vrot.slane %v3151_v58, 5  ;;  %v3168_v15 = vsel %vm5500_vm2, %v3163_v10, %v3167_v57  ;;  %v3251_v58 = vrot.slane %v3204_v13, 5 }
 0x244   : > { %4903 = vmatpush3.bf16.msra.mxu1 %v5325_v28  ;;  %v3154_v0 = vsel %vm5500_vm2, %v3149_v59, %v3153_v62 }
 0x245   : > { %4940 = vmatprep.subr.bf16.mxu1 %v5327_v6  ;;  %v4647_v28 = vcombine.low %v3154_v0, %v3168_v15 }
 0x247   : > { %4113 = vmatmul.mubr.bf16.vlgmr.msra.gmra.mrb[64].mxu1 %v5326_v38  ;;  %v3194_v38 = vld [vmem:[#allocation2 + $0x24] sm:$0x1] }
 0x248   : > { %4120 = vmatprep.mubr.bf16.mxu1 %v4645_v41  ;;  %4941 = vmatpush3.bf16.msra.mxu1 %v5327_v6  ;;  %v3190_v6 = vld [vmem:[#allocation2 + $0x14] sm:$0x1]  ;;  %v3231_v52 = vrot.slane %v3194_v38, 5 }
 0x249   : > { %4942 = vmatprep.subr.bf16.mxu1 %v5328_v36  ;;  %v3223_v24 = vrot.slane %v3190_v6, 5  ;;  %v3198_v41 = vld [vmem:[#allocation2 + $0x34] sm:$0x1] }
 0x24a   : > { %v3239_v46 = vrot.slane %v3198_v41, 5  ;;  %v3232_v18 = vsel %vm6305_vm12, %v4650_v45, %v3231_v52 }
 0x24b   : > { %v3224_v16 = vsel %vm6305_vm12, %v4648_v22, %v3223_v24 }
 0x24c   : > { %4943 = vmatpush3.bf16.msra.mxu1 %v5328_v36  ;;  %v4656_v12 = vcombine.low %v3224_v16, %v3228_v29  ;;  %v4651_v36 = vrot.slane %v3195_v30, 9  ;;  %v3240_v19 = vsel %vm6305_vm12, %v4652_v25, %v3239_v46 }
 0x24d   : > { %4944 = vmatprep.subr.bf16.mxu1 %v5330_v47 }
 0x24e   : > { %v3236_v17 = vsel %vm6305_vm12, %v4651_v36, %v3235_v26 }
 0x24f   : > { %4121 = vmatmul.mubr.bf16.gmra.mrb[68].mxu1 %v5329_v53  ;;  %v4657_v50 = vcombine.low %v3232_v18, %v3236_v17  ;;  %v4658_v53 = vcombine.low %v3240_v19, %v3244_v48 }
 0x250   : > { %4128 = vmatprep.mubr.bf16.mxu1 %v4646_v23  ;;  %4945 = vmatpush3.bf16.msra.mxu1 %v5330_v47  ;;  %v3203_v47 = vld [vmem:[#allocation2 + $0x48] sm:$0xe] }
 0x251   : > { %4946 = vmatprep.subr.bf16.mxu1 %v5331_v55  ;;  %v4655_v51 = vrot.slane %v3203_v47, 9 }
 0x253   : > { %v3252_v59 = vsel %vm6305_vm12, %v4655_v51, %v3251_v58 }
 0x254   : > { %4947 = vmatpush3.bf16.msra.mxu1 %v5331_v55  ;;  %v3247_v55 = vrot.slane %v3202_v9, 5 }
 0x255   : > { %4948 = vmatprep.subr.bf16.mxu1 %v5333_v61 }
 0x256   : > { %v3248_v23 = vsel %vm6305_vm12, %v4654_v54, %v3247_v55 }
 0x257   : > { %4129 = vmatmul.mubr.bf16.gmra.mrb[72].mxu1 %v5332_v5  ;;  %v4659_v10 = vcombine.low %v3248_v23, %v3252_v59 }
 0x258   : > { %4136 = vmatprep.mubr.bf16.mxu1 %v4647_v28  ;;  %4949 = vmatpush3.bf16.msra.mxu1 %v5333_v61 }
 0x259   : > { %4950 = vmatprep.subr.bf16.mxu1 %v5334_v11 }
 0x25c   : > { %4951 = vmatpush3.bf16.msra.mxu1 %v5334_v11 }
 0x25d   : > { %4952 = vmatprep.subr.bf16.mxu1 %v5336_v4 }
 0x25f   : > { %4137 = vmatmul.mubr.bf16.gmra.mrb[76].mxu1 %v5335_v35 }
 0x260   : > { %4953 = vmatpush3.bf16.msra.mxu1 %v5336_v4  ;;  %4956 = vmatprep.mubr.bf16.mxu1 %v4656_v12 }
 0x261   : > { %4954 = vmatprep.subr.bf16.mxu1 %v5337_v33 }
 0x264   : > { %4955 = vmatpush3.bf16.msra.mxu1 %v5337_v33 }
 0x267   : > { %4957 = vmatmul.mubr.bf16.vlgmr.msra.gmra.mrb[80].mxu1 %v4657_v50 }
 0x268   : > { %4960 = vmatprep.mubr.bf16.mxu1 %v4658_v53 }
 0x26f   : > { %4961 = vmatmul.mubr.bf16.gmra.mrb[84].mxu1 %v4659_v10 }
 0x2ba   : > { %v4784_v57 = vpop.f32.mrb[16].mxu1 }
 0x2bb   : > { %v4785_v61 = vpop.f32.mrb[17].mxu1 }
 0x2bc   : > { %v4786_v62 = vadd.f32 %v4785_v61, %v4784_v57  ;;  %v4787_v0 = vpop.f32.mrb[18].mxu1 }
 0x2bd   : > { %v4788_v15 = vpop.f32.mrb[19].mxu1 }
 0x2be   : > { %v4789_v1 = vadd.f32 %v4788_v15, %v4787_v0 }
 0x2c2   : > { %v4790_v2 = vpop.f32.mrb[20].mxu1 }
 0x2c3   : > { %v4791_v5 = vpop.f32.mrb[21].mxu1 }
 0x2c4   : > { %v4792_v11 = vadd.f32 %v4791_v5, %v4790_v2  ;;  %v4793_v28 = vpop.f32.mrb[22].mxu1 }
 0x2c5   : > { %v4794_v63 = vpop.f32.mrb[23].mxu1 }
 0x2c6   : > { %v4795_v6 = vadd.f32 %v4794_v63, %v4793_v28 }
 0x2ca   : > { %v4796_v43 = vpop.f32.mrb[24].mxu1 }
 0x2cb   : > { %v4797_v20 = vpop.f32.mrb[25].mxu1 }
 0x2cc   : > { %v4798_v4 = vadd.f32 %v4797_v20, %v4796_v43  ;;  %v4799_v22 = vpop.f32.mrb[26].mxu1 }
 0x2cd   : > { %v4800_v7 = vpop.f32.mrb[27].mxu1 }
 0x2ce   : > { %v4801_v24 = vadd.f32 %v4800_v7, %v4799_v22 }
 0x2d2   : > { %v4802_v29 = vpop.f32.mrb[28].mxu1 }
 0x2d3   : > { %v4803_v30 = vpop.f32.mrb[29].mxu1 }
 0x2d4   : > { %v4804_v32 = vadd.f32 %v4803_v30, %v4802_v29  ;;  %v4805_v33 = vpop.f32.mrb[30].mxu1 }
 0x2d5   : > { %v4806_v34 = vpop.f32.mrb[31].mxu1 }
 0x2d6   : > { %v4807_v27 = vadd.f32 %v4806_v34, %v4805_v33 }
 0x2da   : > { %v4824_v35 = vpop.f32.mrb[32].mxu1 }
 0x2db   : > { %v4825_v16 = vpop.f32.mrb[33].mxu1 }
 0x2dc   : > { %v4826_v8 = vadd.f32 %v4825_v16, %v4824_v35  ;;  %v4827_v38 = vpop.f32.mrb[34].mxu1 }
 0x2dd   : > { %v4828_v12 = vpop.f32.mrb[35].mxu1 }
 0x2de   : > { %v3985_v36 = vadd.f32 %v4826_v8, %v4786_v62  ;;  %v4829_v26 = vadd.f32 %v4828_v12, %v4827_v38 }
 0x2e0   : > { %v3988_v40 = vadd.f32 %v4829_v26, %v4789_v1 }
 0x2e2   : > { %v4830_v41 = vpop.f32.mrb[36].mxu1 }
 0x2e3   : > { %v4831_v42 = vpop.f32.mrb[37].mxu1 }
 0x2e4   : > { %v4832_v44 = vadd.f32 %v4831_v42, %v4830_v41  ;;  %v4833_v45 = vpop.f32.mrb[38].mxu1 }
 0x2e5   : > { %v4834_v52 = vpop.f32.mrb[39].mxu1 }
 0x2e6   : > { %v3993_v25 = vadd.f32 %v4832_v44, %v4792_v11  ;;  %v4835_v46 = vadd.f32 %v4834_v52, %v4833_v45 }
 0x2e8   : > { %v3996_v17 = vadd.f32 %v4835_v46, %v4795_v6 }
 0x2ea   : > { %v4836_v47 = vpop.f32.mrb[40].mxu1 }
 0x2eb   : > { %v4837_v48 = vpop.f32.mrb[41].mxu1 }
 0x2ec   : > { %v4838_v49 = vadd.f32 %v4837_v48, %v4836_v47  ;;  %v4839_v9 = vpop.f32.mrb[42].mxu1 }
 0x2ed   : > { %v4840_v13 = vpop.f32.mrb[43].mxu1 }
 0x2ee   : > { %v4001_v18 = vadd.f32 %v4838_v49, %v4798_v4  ;;  %v4841_v50 = vadd.f32 %v4840_v13, %v4839_v9 }
 0x2f0   : > { %v4004_v19 = vadd.f32 %v4841_v50, %v4801_v24 }
 0x2f2   : > { %v4842_v51 = vpop.f32.mrb[44].mxu1 }
 0x2f3   : > { %v4843_v53 = vpop.f32.mrb[45].mxu1 }
 0x2f4   : > { %v4844_v54 = vadd.f32 %v4843_v53, %v4842_v51  ;;  %v4845_v55 = vpop.f32.mrb[46].mxu1 }
 0x2f5   : > { %v4846_v58 = vpop.f32.mrb[47].mxu1 }
 0x2f6   : > { %v4009_v23 = vadd.f32 %v4844_v54, %v4804_v32  ;;  %v4847_v59 = vadd.f32 %v4846_v58, %v4845_v55 }
 0x2f8   : > { %v4012_v10 = vadd.f32 %v4847_v59, %v4807_v27 }
 0x2fa   : > { %v4864_v57 = vpop.f32.mrb[48].mxu1 }
 0x2fb   : > { %v4865_v61 = vpop.f32.mrb[49].mxu1 }
 0x2fc   : > { %v4866_v62 = vadd.f32 %v4865_v61, %v4864_v57  ;;  %v4867_v0 = vpop.f32.mrb[50].mxu1 }
 0x2fd   : > { %v4868_v15 = vpop.f32.mrb[51].mxu1 }
 0x2fe   : > { %v4050_v1 = vadd.f32 %v4866_v62, %v3985_v36  ;;  %v4869_v2 = vadd.f32 %v4868_v15, %v4867_v0 }
 0x300   : > { %v4053_v5 = vadd.f32 %v4869_v2, %v3988_v40 }
 0x302   : > { %v4870_v11 = vpop.f32.mrb[52].mxu1 }
 0x303   : > { %v4871_v28 = vpop.f32.mrb[53].mxu1 }
 0x304   : > { %v4872_v63 = vadd.f32 %v4871_v28, %v4870_v11  ;;  %v4873_v6 = vpop.f32.mrb[54].mxu1  ;;  %v4732_v28 = vld [vmem:[%s6537_s4] ss:$0 sm:$0xff] }
 0x305   : > { %v4874_v43 = vpop.f32.mrb[55].mxu1 }
 0x306   : > { %v4058_v20 = vadd.f32 %v4872_v63, %v3993_v25  ;;  %v4875_v4 = vadd.f32 %v4874_v43, %v4873_v6  ;;  %v4733_v43 = vld [vmem:[%s6537_s4 + $0x1] ss:$0 sm:$0xff] }
 0x308   : > { %v4061_v22 = vadd.f32 %v4875_v4, %v3996_v17 }
 0x30a   : > { %v4876_v7 = vpop.f32.mrb[56].mxu1 }
 0x30b   : > { %v4877_v24 = vpop.f32.mrb[57].mxu1 }
 0x30c   : > { %v4878_v29 = vadd.f32 %v4877_v24, %v4876_v7  ;;  %v4879_v30 = vpop.f32.mrb[58].mxu1 }
 0x30d   : > { %v4880_v32 = vpop.f32.mrb[59].mxu1 }
 0x30e   : > { %v4066_v33 = vadd.f32 %v4878_v29, %v4001_v18  ;;  %v4881_v34 = vadd.f32 %v4880_v32, %v4879_v30 }
 0x310   : > { %v4069_v27 = vadd.f32 %v4881_v34, %v4004_v19 }
 0x312   : > { %v4882_v35 = vpop.f32.mrb[60].mxu1 }
 0x313   : > { %v4883_v16 = vpop.f32.mrb[61].mxu1 }
 0x314   : > { %v4884_v8 = vadd.f32 %v4883_v16, %v4882_v35  ;;  %v4885_v38 = vpop.f32.mrb[62].mxu1 }
 0x315   : > { %v4886_v12 = vpop.f32.mrb[63].mxu1 }
 0x316   : > { %v4074_v36 = vadd.f32 %v4884_v8, %v4009_v23  ;;  %v4887_v26 = vadd.f32 %v4886_v12, %v4885_v38 }
 0x318   : > { %v4077_v40 = vadd.f32 %v4887_v26, %v4012_v10 }
 0x31a   : > { %v4904_v41 = vpop.f32.mrb[64].mxu1 }
 0x31b   : > { %v4905_v42 = vpop.f32.mrb[65].mxu1 }
 0x31c   : > { %v4906_v44 = vadd.f32 %v4905_v42, %v4904_v41  ;;  %v4907_v45 = vpop.f32.mrb[66].mxu1 }
 0x31d   : > { %v4908_v52 = vpop.f32.mrb[67].mxu1 }
 0x31e   : > { %v4909_v25 = vadd.f32 %v4908_v52, %v4907_v45  ;;  %v4115_v46 = vadd.f32 %v4906_v44, %v4050_v1 }
 0x320   : > { %v4118_v17 = vadd.f32 %v4909_v25, %v4053_v5 }
 0x322   : > { %v4910_v47 = vpop.f32.mrb[68].mxu1 }
 0x323   : > { %v4911_v48 = vpop.f32.mrb[69].mxu1 }
 0x324   : > { %v4912_v49 = vadd.f32 %v4911_v48, %v4910_v47  ;;  %v4913_v9 = vpop.f32.mrb[70].mxu1 }
 0x325   : > { %v4914_v13 = vpop.f32.mrb[71].mxu1 }
 0x326   : > { %v4915_v18 = vadd.f32 %v4914_v13, %v4913_v9  ;;  %v4123_v50 = vadd.f32 %v4912_v49, %v4058_v20 }
 0x328   : > { %v4126_v19 = vadd.f32 %v4915_v18, %v4061_v22 }
 0x32a   : > { %v4916_v51 = vpop.f32.mrb[72].mxu1 }
 0x32b   : > { %v4917_v53 = vpop.f32.mrb[73].mxu1 }
 0x32c   : > { %v4918_v54 = vadd.f32 %v4917_v53, %v4916_v51  ;;  %v4919_v55 = vpop.f32.mrb[74].mxu1 }
 0x32d   : > { %v4920_v58 = vpop.f32.mrb[75].mxu1 }
 0x32e   : > { %v4921_v23 = vadd.f32 %v4920_v58, %v4919_v55  ;;  %v4131_v59 = vadd.f32 %v4918_v54, %v4066_v33 }
 0x330   : > { %v4134_v10 = vadd.f32 %v4921_v23, %v4069_v27 }
 0x332   : > { %v4922_v57 = vpop.f32.mrb[76].mxu1 }
 0x333   : > { %v4923_v61 = vpop.f32.mrb[77].mxu1 }
 0x334   : > { %v4924_v62 = vadd.f32 %v4923_v61, %v4922_v57  ;;  %v4925_v0 = vpop.f32.mrb[78].mxu1 }
 0x335   : > { %v4926_v15 = vpop.f32.mrb[79].mxu1 }
 0x336   : > { %v4927_v1 = vadd.f32 %v4926_v15, %v4925_v0  ;;  %v4139_v2 = vadd.f32 %v4924_v62, %v4074_v36 }
 0x338   : > { %v4142_v5 = vadd.f32 %v4927_v1, %v4077_v40 }
 0x33a   : > { %v4958_v11 = vpop.f32.mrb[80].mxu1 }
 0x33b   : > { %v4188_v63 = vadd.f32 %v4958_v11, %v4123_v50  ;;  %v4179_v6 = vpop.f32.mrb[81].mxu1 }
 0x33c   : > { %v4180_v20 = vadd.f32 %v4179_v6, %v4115_v46  ;;  %v4959_v4 = vpop.f32.mrb[82].mxu1 }
 0x33d   : > { %v4217_v22 = vmul.f32 %v4732_v28, %v4188_v63  ;;  %v4191_v7 = vadd.f32 %v4959_v4, %v4126_v19  ;;  %v4182_v24 = vpop.f32.mrb[83].mxu1 }
 0x33e   : > { %v4215_v29 = vmul.f32 %v4732_v28, %v4180_v20  ;;  %v4183_v30 = vadd.f32 %v4182_v24, %v4118_v17 }
 0x33f   : > { %v4230_v32 = vadd.f32 %v4733_v43, %v4217_v22  ;;  %v4218_v33 = vmul.f32 %v4732_v28, %v4191_v7 }
 0x340   : > { %v4228_v34 = vadd.f32 %v4733_v43, %v4215_v29  ;;  %v4216_v27 = vmul.f32 %v4732_v28, %v4183_v30 }
 0x341   : > { %v4246_v35 = vadd.f32 %v4230_v32, %v6168_v3  ;;  %v4231_v16 = vadd.f32 %v4733_v43, %v4218_v33 }
 0x342   : > { %v4244_v8 = vadd.f32 %v4228_v34, %v6149_v39  ;;  %v4229_v38 = vadd.f32 %v4733_v43, %v4216_v27  ;;  %v4962_v12 = vpop.f32.mrb[84].mxu1 }
 0x343   : > { %v4247_v36 = vadd.f32 %v4231_v16, %v6174_v31  ;;  %v4204_v26 = vadd.f32 %v4962_v12, %v4139_v2  ;;  %v4195_v40 = vpop.f32.mrb[85].mxu1  ;;  %v4254_v45 = vmax.f32 %v4246_v35, 0.0 }
 0x344   : > { %v4245_v41 = vadd.f32 %v4229_v38, %v6154_v37  ;;  %v4196_v42 = vadd.f32 %v4195_v40, %v4131_v59  ;;  %v4963_v44 = vpop.f32.mrb[86].mxu1  ;;  %v4252_v3 = vmax.f32 %v4244_v8, 0.0 }
 0x345   : > { %v4255_v52 = vmax.f32 %v4247_v36, 0.0  ;;  %v4221_v25 = vmul.f32 %v4732_v28, %v4204_v26  ;;  %v4207_v46 = vadd.f32 %v4963_v44, %v4142_v5  ;;  %v4198_v17 = vpop.f32.mrb[87].mxu1 }
 0x346   : > { %v4253_v39 = vmax.f32 %v4245_v41, 0.0  ;;  %v4219_v47 = vmul.f32 %v4732_v28, %v4196_v42  ;;  %v4199_v48 = vadd.f32 %v4198_v17, %v4134_v10 }
 0x347   : > { %v4753_v31 = vpack.c.bf16 %v4255_v52, %v4254_v45  ;;  %v4234_v49 = vadd.f32 %v4733_v43, %v4221_v25  ;;  %v4222_v9 = vmul.f32 %v4732_v28, %v4207_v46 }
 0x348   : > { %v4748_v13 = vpack.c.bf16 %v4253_v39, %v4252_v3  ;;  %v4232_v37 = vadd.f32 %v4733_v43, %v4219_v47  ;;  %v4220_v18 = vmul.f32 %v4732_v28, %v4199_v48 }
 0x349   : > { %4765 = vst [vmem:[%s224_s16 + $0x8] sm:$0xff] %v4753_v31   ;;  %v4250_v50 = vadd.f32 %v4234_v49, %v6223_v14  ;;  %v4235_v19 = vadd.f32 %v4733_v43, %v4222_v9 }
 0x34a   : > { %4749 = vst [vmem:[%s224_s16] sm:$0xff] %v4748_v13   ;;  %v4248_v51 = vadd.f32 %v4232_v37, %v6196_v60  ;;  %v4233_v53 = vadd.f32 %v4733_v43, %v4220_v18 }
 0x34b   : > { %v4251_v54 = vadd.f32 %v4235_v19, %v6227_v56  ;;  %v4258_v58 = vmax.f32 %v4250_v50, 0.0 }
 0x34c   : > { %v4249_v55 = vadd.f32 %v4233_v53, %v6201_v21  ;;  %v4256_v59 = vmax.f32 %v4248_v51, 0.0 }
 0x34d   : > { %v4259_v23 = vmax.f32 %v4251_v54, 0.0 }
 0x34e   : > { %v4257_v10 = vmax.f32 %v4249_v55, 0.0 }
 0x34f   : > { %v4763_v57 = vpack.c.bf16 %v4259_v23, %v4258_v58 }
 0x350   : > { %v4758_v61 = vpack.c.bf16 %v4257_v10, %v4256_v59 }
 0x351   : > { %4767 = vst [vmem:[%s224_s16 + $0x18] sm:$0xff] %v4763_v57  }
 0x352   : > { %4766 = vst [vmem:[%s224_s16 + $0x10] sm:$0xff] %v4758_v61  }
 0x353 PF: > { %s15_s18 = sadd.s32 1, %s5344_s18  }
 0x354   : > { %p12_p4 = scmp.ge.s32.totalorder %s15_s18, 4  }
 0x356   :  { %14 = sbr.rel (!%p12_p4) target bundleno = 1 (0x1), region = 79 }

</bundles_post_ra>
